<compile_context>
chip_gen: v6e
topology: v6e:2x2x1
jax: 0.10.0
libtpu: 0.0.40
codegen_flags: <defaults>
</compile_context>

<pallas_src>
import functools

import jax
import jax.numpy as jnp
from jax import lax
from jax.experimental import pallas as pl
from jax.experimental.pallas import tpu as pltpu


# ---------------------------------------------------------------------------
# Kernel 1: transposed conv (s=2, k=4, p=1) via 9 tap matmuls over the raw
#           padded input + per-image BatchNorm partial statistics.
#
# Per grid step (one image):
#   x_ref    : (1, Hp*Wp, Cin)   bf16  flattened, spatially padded NHWC image
#   w_ref    : (9, Cin, 4*Cout)  bf16  tap weights, output cols ordered (ph, pw, co)
#   mask_ref : (Lpp, 1)          f32   1.0 on valid pitch rows, 0.0 on junk rows
#   y_ref    : (1, Lpp, 4*Cout)  bf16  conv output in "padded pitch" row order
#   stats_ref: (1, 2, 4*Cout)    f32   [sum, sum-of-squares] over valid rows
# ---------------------------------------------------------------------------
def _deconv_phase_kernel(x_ref, w_ref, mask_ref, y_ref, stats_ref, *, Wp, Lpp):
    xv = x_ref[0]                                   # (Hp*Wp, Cin) bf16
    acc = None
    for a in range(3):                              # row offset in padded image
        for b in range(3):                          # col offset in padded image
            s0 = a * Wp + b
            xs = xv[s0:s0 + Lpp, :]                 # static sublane slice, no copy of x in HBM
            part = jnp.dot(xs, w_ref[a * 3 + b],
                           preferred_element_type=jnp.float32)   # (Lpp, 4*Cout) f32
            acc = part if acc is None else acc + part

    # per-image BN partial statistics (f32), junk pitch rows masked out
    pv = acc * mask_ref[...]
    stats_ref[0, 0:1, :] = jnp.sum(pv, axis=0, keepdims=True)
    stats_ref[0, 1:2, :] = jnp.sum(pv * pv, axis=0, keepdims=True)

    y_ref[0] = acc.astype(y_ref.dtype)              # bf16 intermediate


# ---------------------------------------------------------------------------
# Kernel 2: fused BatchNorm affine + ReLU + channel concat with skip.
# Writes the final NCHW output slab; spatial is flattened on the lane dim
# (Ho*Wo lanes -> fully unmasked stores).
# ---------------------------------------------------------------------------
def _bn_relu_concat_kernel(y_ref, skip_ref, scale_ref, shift_ref, out_ref):
    cout = y_ref.shape[1]
    cs = skip_ref.shape[1]
    y = y_ref[0].astype(jnp.float32)                              # (Cout, Ho*Wo)
    out_ref[0, :cout, :] = jnp.maximum(y * scale_ref[...] + shift_ref[...], 0.0)
    out_ref[0, cout:cout + cs, :] = skip_ref[0]                   # fused concat


def _tap_weights(w_deconv):
    """(Cin, Cout, 4, 4) ConvTranspose2d weight -> (9, Cin, 4*Cout) tap matrices.

    Tap t = a*3 + b reads the padded input at offset (+a, +b); output column
    q = (ph*2 + pw)*Cout + co is output phase (oh = 2i+ph, ow = 2j+pw) and channel.
    kh = ph + 3 - 2a, kw = pw + 3 - 2b (zero where out of the 4x4 kernel range).
    """
    cin, cout = w_deconv.shape[0], w_deconv.shape[1]
    w = jnp.zeros((3, 3, cin, 2, 2, cout), jnp.float32)
    for a in range(3):
        for ph in range(2):
            kh = ph + 3 - 2 * a
            if 0 <= kh < 4:
                for b in range(3):
                    for pw in range(2):
                        kw = pw + 3 - 2 * b
                        if 0 <= kw < 4:
                            w = w.at[a, b, :, ph, pw, :].set(w_deconv[:, :, kh, kw])
    return w.reshape(9, cin, 4 * cout)


def decoder_forward(x, skip, w_deconv, gamma, beta, *, eps=1e-5):
    """x: (N, Cin, H, W); skip: (N, Cs, 2H, 2W); w_deconv: (Cin, Cout, 4, 4)."""
    N, Cin, H, W = x.shape
    Cout = w_deconv.shape[1]
    Cs = skip.shape[1]
    Ho, Wo = 2 * H, 2 * W
    Hp, Wp = H + 3, W + 2            # pad: top 1, bottom 2, left 1, right 1
    Lpp = H * Wp                     # padded-pitch rows per image (W valid + 2 junk per row)
    S = Ho * Wo

    # ---- small-tensor glue: pad + flatten x (no im2col, no dilation) ----
    x_pad = jnp.pad(jnp.transpose(x, (0, 2, 3, 1)), ((0, 0), (1, 2), (1, 1), (0, 0)))
    x_flat = x_pad.reshape(N, Hp * Wp, Cin).astype(jnp.bfloat16)
    w_taps = _tap_weights(w_deconv).astype(jnp.bfloat16)          # (9, Cin, 4*Cout)
    row_mask = ((jnp.arange(Lpp, dtype=jnp.int32) % Wp) < W
                ).astype(jnp.float32).reshape(Lpp, 1)

    kernel1 = functools.partial(_deconv_phase_kernel, Wp=Wp, Lpp=Lpp)
    y_pp, stats = pl.pallas_call(
        kernel1,
        out_shape=(jax.ShapeDtypeStruct((N, Lpp, 4 * Cout), jnp.bfloat16),
                   jax.ShapeDtypeStruct((N, 2, 4 * Cout), jnp.float32)),
        grid_spec=pltpu.PrefetchScalarGridSpec(
            num_scalar_prefetch=0,
            grid=(N,),
            in_specs=[pl.BlockSpec((1, Hp * Wp, Cin), lambda n: (n, 0, 0)),
                      pl.BlockSpec((9, Cin, 4 * Cout), lambda n: (0, 0, 0)),
                      pl.BlockSpec((Lpp, 1), lambda n: (0, 0))],
            out_specs=(pl.BlockSpec((1, Lpp, 4 * Cout), lambda n: (n, 0, 0)),
                       pl.BlockSpec((1, 2, 4 * Cout), lambda n: (n, 0, 0)))),
        compiler_params=pltpu.CompilerParams(
            dimension_semantics=("parallel",),
            vmem_limit_bytes=32 * 1024 * 1024),
    )(x_flat, w_taps, row_mask)

    # ---- training-mode BN statistics -> per-channel scale / shift (f32) ----
    count = float(N * Ho * Wo)
    sums = stats.reshape(N, 2, 4, Cout).sum(axis=(0, 2))          # reduce images & phases
    mean = sums[0] / count
    var = jnp.maximum(sums[1] / count - mean * mean, 0.0)         # biased var, clamped >= 0
    inv_std = lax.rsqrt(var + eps)
    scale = (gamma * inv_std).astype(jnp.float32).reshape(Cout, 1)
    shift = (beta - mean * gamma * inv_std).astype(jnp.float32).reshape(Cout, 1)

    # ---- one small bf16 rearrangement: phase-separated padded-pitch -> channel-major ----
    # TODO(synk): fold this transpose into kernel 1 (needs an in-kernel relayout of the
    # (Lpp, 4*Cout) tile to channel-major); kept in XLA since it only touches the bf16
    # intermediate (~1/4 of the output bytes).
    y6 = y_pp.reshape(N, H, Wp, 2, 2, Cout)[:, :, :W]             # drop junk pitch columns
    y_cm = jnp.transpose(y6, (0, 5, 1, 3, 2, 4)).reshape(N, Cout, S)

    skip_flat = skip.astype(jnp.float32).reshape(N, Cs, S)        # free reshape (NCHW)

    out_flat = pl.pallas_call(
        _bn_relu_concat_kernel,
        out_shape=jax.ShapeDtypeStruct((N, Cout + Cs, S), jnp.float32),
        grid_spec=pltpu.PrefetchScalarGridSpec(
            num_scalar_prefetch=0,
            grid=(N,),
            in_specs=[pl.BlockSpec((1, Cout, S), lambda n: (n, 0, 0)),
                      pl.BlockSpec((1, Cs, S), lambda n: (n, 0, 0)),
                      pl.BlockSpec((Cout, 1), lambda n: (0, 0)),
                      pl.BlockSpec((Cout, 1), lambda n: (0, 0))],
            out_specs=pl.BlockSpec((1, Cout + Cs, S), lambda n: (n, 0, 0))),
        compiler_params=pltpu.CompilerParams(
            dimension_semantics=("parallel",),
            vmem_limit_bytes=32 * 1024 * 1024),
    )(y_cm, skip_flat, scale, shift)

    return out_flat.reshape(N, Cout + Cs, Ho, Wo)                 # free reshape to NCHW


# ---------------------------------------------------------------------------
# Pure-JAX reference (independent XLA conv path) for validation
# ---------------------------------------------------------------------------
def decoder_reference(x, skip, w_deconv, gamma, beta, eps=1e-5):
    w_rot = jnp.transpose(w_deconv[:, :, ::-1, ::-1], (1, 0, 2, 3))  # (Cout, Cin, kh, kw)
    y = lax.conv_general_dilated(
        x, w_rot, window_strides=(1, 1), padding=((2, 2), (2, 2)),
        lhs_dilation=(2, 2), dimension_numbers=("NCHW", "OIHW", "NCHW"),
        precision=lax.Precision.HIGHEST)
    mean = jnp.mean(y, axis=(0, 2, 3), keepdims=True)
    var = jnp.mean((y - mean) ** 2, axis=(0, 2, 3), keepdims=True)
    yn = (y - mean) / jnp.sqrt(var + eps)
    yn = yn * gamma.reshape(1, -1, 1, 1) + beta.reshape(1, -1, 1, 1)
    yn = jnp.maximum(yn, 0.0)
    return jnp.concatenate([yn, skip], axis=1)


if __name__ == "__main__":
    key = jax.random.PRNGKey(0)
    in_size, out_size = 4, 8
    N, H, W = 2, 16, 16

    k1, k2, k3 = jax.random.split(key, 3)
    x = jax.random.normal(k1, (N, in_size, H, W), jnp.float32)
    skip = jax.random.normal(k2, (N, out_size, 2 * H, 2 * W), jnp.float32)
    # ConvTranspose2d weight layout: (in_channels, out_channels, kH, kW)
    w_deconv = 0.1 * jax.random.normal(k3, (in_size, out_size, 4, 4), jnp.float32)
    gamma = jnp.ones((out_size,), jnp.float32)   # nn.BatchNorm2d default weight
    beta = jnp.zeros((out_size,), jnp.float32)   # nn.BatchNorm2d default bias

    out = jax.jit(decoder_forward)(x, skip, w_deconv, gamma, beta)
    out = jax.block_until_ready(out)

    ref = decoder_reference(x, skip, w_deconv, gamma, beta)
    assert out.shape == (N, 2 * out_size, 2 * H, 2 * W), out.shape
    err = float(jnp.max(jnp.abs(out - ref)))
    assert jnp.allclose(out, ref, rtol=2e-2, atol=2e-2), err
    print("KERNEL_OK")
</pallas_src>

<mosaic_0001>
module attributes {stable_mosaic.version = 11 : i64} {
  func.func @_deconv_phase_kernel(%arg0: i32, %arg1: memref<1x342x4xbf16, #tpu.memory_space<vmem>>, %arg2: memref<9x4x32xbf16, #tpu.memory_space<vmem>>, %arg3: memref<288x1xf32, #tpu.memory_space<vmem>>, %arg4: memref<1x288x32xbf16, #tpu.memory_space<vmem>>, %arg5: memref<1x2x32xf32, #tpu.memory_space<vmem>>) attributes {dimension_semantics = [#tpu.dimension_semantics<parallel>], iteration_bounds = array<i64: 2>, scalar_prefetch = 0 : i64, scratch_operands = 0 : i64, tpu.core_type = #tpu.core_type<tc>, window_params = [{transform_indices = @transform_0, window_bounds = array<i64: 1, 342, 4>}, {pipeline_mode = #tpu.pipeline_mode<synchronous>, transform_indices = @transform_1, window_bounds = array<i64: 9, 4, 32>}, {pipeline_mode = #tpu.pipeline_mode<synchronous>, transform_indices = @transform_2, window_bounds = array<i64: 288, 1>}, {transform_indices = @transform_3, window_bounds = array<i64: 1, 288, 32>}, {transform_indices = @transform_4, window_bounds = array<i64: 1, 2, 32>}]} {
    %c0 = arith.constant 0 : index
    %c0_0 = arith.constant 0 : index
    %c0_1 = arith.constant 0 : index
    %0 = vector.load %arg1[%c0, %c0_0, %c0_1] : memref<1x342x4xbf16, #tpu.memory_space<vmem>>, vector<1x342x4xbf16>
    %1 = vector.shape_cast %0 : vector<1x342x4xbf16> to vector<342x4xbf16>
    %2 = vector.extract_strided_slice %1 {offsets = [0, 0], sizes = [288, 4], strides = [1, 1]} : vector<342x4xbf16> to vector<288x4xbf16>
    %c0_2 = arith.constant 0 : index
    %c0_3 = arith.constant 0 : index
    %c0_4 = arith.constant 0 : index
    %3 = vector.load %arg2[%c0_2, %c0_3, %c0_4] : memref<9x4x32xbf16, #tpu.memory_space<vmem>>, vector<1x4x32xbf16>
    %4 = vector.shape_cast %3 : vector<1x4x32xbf16> to vector<4x32xbf16>
    %cst = arith.constant dense<0.000000e+00> : vector<288x32xf32>
    %5 = tpu.matmul %2, %4, %cst {dimension_numbers = #tpu.dot_dimension_numbers<[1], [0], [0], [1], [0, 0, 1, 1], [], []>} : vector<288x4xbf16>, vector<4x32xbf16>, vector<288x32xf32> -> vector<288x32xf32>
    %6 = vector.extract_strided_slice %1 {offsets = [1, 0], sizes = [288, 4], strides = [1, 1]} : vector<342x4xbf16> to vector<288x4xbf16>
    %c1 = arith.constant 1 : index
    %c0_5 = arith.constant 0 : index
    %c0_6 = arith.constant 0 : index
    %7 = vector.load %arg2[%c1, %c0_5, %c0_6] : memref<9x4x32xbf16, #tpu.memory_space<vmem>>, vector<1x4x32xbf16>
    %8 = vector.shape_cast %7 : vector<1x4x32xbf16> to vector<4x32xbf16>
    %cst_7 = arith.constant dense<0.000000e+00> : vector<288x32xf32>
    %9 = tpu.matmul %6, %8, %cst_7 {dimension_numbers = #tpu.dot_dimension_numbers<[1], [0], [0], [1], [0, 0, 1, 1], [], []>} : vector<288x4xbf16>, vector<4x32xbf16>, vector<288x32xf32> -> vector<288x32xf32>
    %10 = arith.addf %5, %9 : vector<288x32xf32>
    %11 = vector.extract_strided_slice %1 {offsets = [2, 0], sizes = [288, 4], strides = [1, 1]} : vector<342x4xbf16> to vector<288x4xbf16>
    %c2 = arith.constant 2 : index
    %c0_8 = arith.constant 0 : index
    %c0_9 = arith.constant 0 : index
    %12 = vector.load %arg2[%c2, %c0_8, %c0_9] : memref<9x4x32xbf16, #tpu.memory_space<vmem>>, vector<1x4x32xbf16>
    %13 = vector.shape_cast %12 : vector<1x4x32xbf16> to vector<4x32xbf16>
    %cst_10 = arith.constant dense<0.000000e+00> : vector<288x32xf32>
    %14 = tpu.matmul %11, %13, %cst_10 {dimension_numbers = #tpu.dot_dimension_numbers<[1], [0], [0], [1], [0, 0, 1, 1], [], []>} : vector<288x4xbf16>, vector<4x32xbf16>, vector<288x32xf32> -> vector<288x32xf32>
    %15 = arith.addf %10, %14 : vector<288x32xf32>
    %16 = vector.extract_strided_slice %1 {offsets = [18, 0], sizes = [288, 4], strides = [1, 1]} : vector<342x4xbf16> to vector<288x4xbf16>
    %c3 = arith.constant 3 : index
    %c0_11 = arith.constant 0 : index
    %c0_12 = arith.constant 0 : index
    %17 = vector.load %arg2[%c3, %c0_11, %c0_12] : memref<9x4x32xbf16, #tpu.memory_space<vmem>>, vector<1x4x32xbf16>
    %18 = vector.shape_cast %17 : vector<1x4x32xbf16> to vector<4x32xbf16>
    %cst_13 = arith.constant dense<0.000000e+00> : vector<288x32xf32>
    %19 = tpu.matmul %16, %18, %cst_13 {dimension_numbers = #tpu.dot_dimension_numbers<[1], [0], [0], [1], [0, 0, 1, 1], [], []>} : vector<288x4xbf16>, vector<4x32xbf16>, vector<288x32xf32> -> vector<288x32xf32>
    %20 = arith.addf %15, %19 : vector<288x32xf32>
    %21 = vector.extract_strided_slice %1 {offsets = [19, 0], sizes = [288, 4], strides = [1, 1]} : vector<342x4xbf16> to vector<288x4xbf16>
    %c4 = arith.constant 4 : index
    %c0_14 = arith.constant 0 : index
    %c0_15 = arith.constant 0 : index
    %22 = vector.load %arg2[%c4, %c0_14, %c0_15] : memref<9x4x32xbf16, #tpu.memory_space<vmem>>, vector<1x4x32xbf16>
    %23 = vector.shape_cast %22 : vector<1x4x32xbf16> to vector<4x32xbf16>
    %cst_16 = arith.constant dense<0.000000e+00> : vector<288x32xf32>
    %24 = tpu.matmul %21, %23, %cst_16 {dimension_numbers = #tpu.dot_dimension_numbers<[1], [0], [0], [1], [0, 0, 1, 1], [], []>} : vector<288x4xbf16>, vector<4x32xbf16>, vector<288x32xf32> -> vector<288x32xf32>
    %25 = arith.addf %20, %24 : vector<288x32xf32>
    %26 = vector.extract_strided_slice %1 {offsets = [20, 0], sizes = [288, 4], strides = [1, 1]} : vector<342x4xbf16> to vector<288x4xbf16>
    %c5 = arith.constant 5 : index
    %c0_17 = arith.constant 0 : index
    %c0_18 = arith.constant 0 : index
    %27 = vector.load %arg2[%c5, %c0_17, %c0_18] : memref<9x4x32xbf16, #tpu.memory_space<vmem>>, vector<1x4x32xbf16>
    %28 = vector.shape_cast %27 : vector<1x4x32xbf16> to vector<4x32xbf16>
    %cst_19 = arith.constant dense<0.000000e+00> : vector<288x32xf32>
    %29 = tpu.matmul %26, %28, %cst_19 {dimension_numbers = #tpu.dot_dimension_numbers<[1], [0], [0], [1], [0, 0, 1, 1], [], []>} : vector<288x4xbf16>, vector<4x32xbf16>, vector<288x32xf32> -> vector<288x32xf32>
    %30 = arith.addf %25, %29 : vector<288x32xf32>
    %31 = vector.extract_strided_slice %1 {offsets = [36, 0], sizes = [288, 4], strides = [1, 1]} : vector<342x4xbf16> to vector<288x4xbf16>
    %c6 = arith.constant 6 : index
    %c0_20 = arith.constant 0 : index
    %c0_21 = arith.constant 0 : index
    %32 = vector.load %arg2[%c6, %c0_20, %c0_21] : memref<9x4x32xbf16, #tpu.memory_space<vmem>>, vector<1x4x32xbf16>
    %33 = vector.shape_cast %32 : vector<1x4x32xbf16> to vector<4x32xbf16>
    %cst_22 = arith.constant dense<0.000000e+00> : vector<288x32xf32>
    %34 = tpu.matmul %31, %33, %cst_22 {dimension_numbers = #tpu.dot_dimension_numbers<[1], [0], [0], [1], [0, 0, 1, 1], [], []>} : vector<288x4xbf16>, vector<4x32xbf16>, vector<288x32xf32> -> vector<288x32xf32>
    %35 = arith.addf %30, %34 : vector<288x32xf32>
    %36 = vector.extract_strided_slice %1 {offsets = [37, 0], sizes = [288, 4], strides = [1, 1]} : vector<342x4xbf16> to vector<288x4xbf16>
    %c7 = arith.constant 7 : index
    %c0_23 = arith.constant 0 : index
    %c0_24 = arith.constant 0 : index
    %37 = vector.load %arg2[%c7, %c0_23, %c0_24] : memref<9x4x32xbf16, #tpu.memory_space<vmem>>, vector<1x4x32xbf16>
    %38 = vector.shape_cast %37 : vector<1x4x32xbf16> to vector<4x32xbf16>
    %cst_25 = arith.constant dense<0.000000e+00> : vector<288x32xf32>
    %39 = tpu.matmul %36, %38, %cst_25 {dimension_numbers = #tpu.dot_dimension_numbers<[1], [0], [0], [1], [0, 0, 1, 1], [], []>} : vector<288x4xbf16>, vector<4x32xbf16>, vector<288x32xf32> -> vector<288x32xf32>
    %40 = arith.addf %35, %39 : vector<288x32xf32>
    %41 = vector.extract_strided_slice %1 {offsets = [38, 0], sizes = [288, 4], strides = [1, 1]} : vector<342x4xbf16> to vector<288x4xbf16>
    %c8 = arith.constant 8 : index
    %c0_26 = arith.constant 0 : index
    %c0_27 = arith.constant 0 : index
    %42 = vector.load %arg2[%c8, %c0_26, %c0_27] : memref<9x4x32xbf16, #tpu.memory_space<vmem>>, vector<1x4x32xbf16>
    %43 = vector.shape_cast %42 : vector<1x4x32xbf16> to vector<4x32xbf16>
    %cst_28 = arith.constant dense<0.000000e+00> : vector<288x32xf32>
    %44 = tpu.matmul %41, %43, %cst_28 {dimension_numbers = #tpu.dot_dimension_numbers<[1], [0], [0], [1], [0, 0, 1, 1], [], []>} : vector<288x4xbf16>, vector<4x32xbf16>, vector<288x32xf32> -> vector<288x32xf32>
    %45 = arith.addf %40, %44 : vector<288x32xf32>
    %c0_29 = arith.constant 0 : index
    %c0_30 = arith.constant 0 : index
    %46 = vector.load %arg3[%c0_29, %c0_30] : memref<288x1xf32, #tpu.memory_space<vmem>>, vector<288x1xf32>
    %47 = vector.broadcast %46 : vector<288x1xf32> to vector<288x32xf32>
    %48 = arith.mulf %45, %47 : vector<288x32xf32>
    %cst_31 = arith.constant dense<0.000000e+00> : vector<32xf32>
    %49 = vector.multi_reduction <add>, %48, %cst_31 [0] : vector<288x32xf32> to vector<32xf32>
    %50 = vector.shape_cast %49 : vector<32xf32> to vector<1x32xf32>
    %c0_32 = arith.constant 0 : index
    %c0_33 = arith.constant 0 : index
    %c0_34 = arith.constant 0 : index
    %51 = vector.load %arg5[%c0_32, %c0_33, %c0_34] : memref<1x2x32xf32, #tpu.memory_space<vmem>>, vector<1x1x32xf32>
    %52 = vector.shape_cast %51 : vector<1x1x32xf32> to vector<1x32xf32>
    %53 = vector.shape_cast %50 : vector<1x32xf32> to vector<1x1x32xf32>
    tpu.vector_store %arg5[%c0_32, %c0_33, %c0_34], %53 {strides = array<i32>} : memref<1x2x32xf32, #tpu.memory_space<vmem>>, vector<1x1x32xf32>,
    %54 = arith.mulf %48, %48 : vector<288x32xf32>
    %cst_35 = arith.constant dense<0.000000e+00> : vector<32xf32>
    %55 = vector.multi_reduction <add>, %54, %cst_35 [0] : vector<288x32xf32> to vector<32xf32>
    %56 = vector.shape_cast %55 : vector<32xf32> to vector<1x32xf32>
    %c0_36 = arith.constant 0 : index
    %c1_37 = arith.constant 1 : index
    %c0_38 = arith.constant 0 : index
    %57 = vector.load %arg5[%c0_36, %c1_37, %c0_38] : memref<1x2x32xf32, #tpu.memory_space<vmem>>, vector<1x1x32xf32>
    %58 = vector.shape_cast %57 : vector<1x1x32xf32> to vector<1x32xf32>
    %59 = vector.shape_cast %56 : vector<1x32xf32> to vector<1x1x32xf32>
    tpu.vector_store %arg5[%c0_36, %c1_37, %c0_38], %59 {strides = array<i32>} : memref<1x2x32xf32, #tpu.memory_space<vmem>>, vector<1x1x32xf32>,
    %60 = arith.truncf %45 : vector<288x32xf32> to vector<288x32xbf16>
    %c0_39 = arith.constant 0 : index
    %c0_40 = arith.constant 0 : index
    %c0_41 = arith.constant 0 : index
    %61 = vector.load %arg4[%c0_39, %c0_40, %c0_41] : memref<1x288x32xbf16, #tpu.memory_space<vmem>>, vector<1x288x32xbf16>
    %62 = vector.shape_cast %61 : vector<1x288x32xbf16> to vector<288x32xbf16>
    %63 = vector.shape_cast %60 : vector<288x32xbf16> to vector<1x288x32xbf16>
    tpu.vector_store %arg4[%c0_39, %c0_40, %c0_41], %63 {strides = array<i32>} : memref<1x288x32xbf16, #tpu.memory_space<vmem>>, vector<1x288x32xbf16>,
    return
  }
  func.func @transform_0(%arg0: i32) -> (i32, i32, i32) {
    %c0_i32 = arith.constant 0 : i32
    %c0_i32_0 = arith.constant 0 : i32
    %c0_i32_1 = arith.constant 0 : i32
    return %arg0, %c0_i32, %c0_i32_0 : i32, i32, i32
  }
  func.func @transform_1(%arg0: i32) -> (i32, i32, i32) {
    %c0_i32 = arith.constant 0 : i32
    %c0_i32_0 = arith.constant 0 : i32
    %c0_i32_1 = arith.constant 0 : i32
    %c0_i32_2 = arith.constant 0 : i32
    return %c0_i32, %c0_i32_0, %c0_i32_1 : i32, i32, i32
  }
  func.func @transform_2(%arg0: i32) -> (i32, i32) {
    %c0_i32 = arith.constant 0 : i32
    %c0_i32_0 = arith.constant 0 : i32
    %c0_i32_1 = arith.constant 0 : i32
    return %c0_i32, %c0_i32_0 : i32, i32
  }
  func.func @transform_3(%arg0: i32) -> (i32, i32, i32) {
    %c0_i32 = arith.constant 0 : i32
    %c0_i32_0 = arith.constant 0 : i32
    %c0_i32_1 = arith.constant 0 : i32
    return %arg0, %c0_i32, %c0_i32_0 : i32, i32, i32
  }
  func.func @transform_4(%arg0: i32) -> (i32, i32, i32) {
    %c0_i32 = arith.constant 0 : i32
    %c0_i32_0 = arith.constant 0 : i32
    %c0_i32_1 = arith.constant 0 : i32
    return %arg0, %c0_i32, %c0_i32_0 : i32, i32, i32
  }
}

module attributes {stable_mosaic.version = 11 : i64} {
  func.func @_bn_relu_concat_kernel(%arg0: i32, %arg1: memref<1x8x1024xbf16, #tpu.memory_space<vmem>>, %arg2: memref<1x8x1024xf32, #tpu.memory_space<vmem>>, %arg3: memref<8x1xf32, #tpu.memory_space<vmem>>, %arg4: memref<8x1xf32, #tpu.memory_space<vmem>>, %arg5: memref<1x16x1024xf32, #tpu.memory_space<vmem>>) attributes {dimension_semantics = [#tpu.dimension_semantics<parallel>], iteration_bounds = array<i64: 2>, scalar_prefetch = 0 : i64, scratch_operands = 0 : i64, tpu.core_type = #tpu.core_type<tc>, window_params = [{transform_indices = @transform_0, window_bounds = array<i64: 1, 8, 1024>}, {transform_indices = @transform_1, window_bounds = array<i64: 1, 8, 1024>}, {pipeline_mode = #tpu.pipeline_mode<synchronous>, transform_indices = @transform_2, window_bounds = array<i64: 8, 1>}, {pipeline_mode = #tpu.pipeline_mode<synchronous>, transform_indices = @transform_3, window_bounds = array<i64: 8, 1>}, {transform_indices = @transform_4, window_bounds = array<i64: 1, 16, 1024>}]} {
    %c0 = arith.constant 0 : index
    %c0_0 = arith.constant 0 : index
    %c0_1 = arith.constant 0 : index
    %0 = vector.load %arg1[%c0, %c0_0, %c0_1] : memref<1x8x1024xbf16, #tpu.memory_space<vmem>>, vector<1x8x1024xbf16>
    %1 = vector.shape_cast %0 : vector<1x8x1024xbf16> to vector<8x1024xbf16>
    %2 = arith.extf %1 : vector<8x1024xbf16> to vector<8x1024xf32>
    %c0_2 = arith.constant 0 : index
    %c0_3 = arith.constant 0 : index
    %3 = vector.load %arg3[%c0_2, %c0_3] : memref<8x1xf32, #tpu.memory_space<vmem>>, vector<8x1xf32>
    %4 = vector.broadcast %3 : vector<8x1xf32> to vector<8x1024xf32>
    %5 = arith.mulf %2, %4 : vector<8x1024xf32>
    %c0_4 = arith.constant 0 : index
    %c0_5 = arith.constant 0 : index
    %6 = vector.load %arg4[%c0_4, %c0_5] : memref<8x1xf32, #tpu.memory_space<vmem>>, vector<8x1xf32>
    %7 = vector.broadcast %6 : vector<8x1xf32> to vector<8x1024xf32>
    %8 = arith.addf %5, %7 : vector<8x1024xf32>
    %cst = arith.constant 0.000000e+00 : f32
    %9 = vector.broadcast %cst : f32 to vector<8x1024xf32>
    %10 = arith.maximumf %8, %9 : vector<8x1024xf32>
    %c0_6 = arith.constant 0 : index
    %c0_7 = arith.constant 0 : index
    %c0_8 = arith.constant 0 : index
    %11 = vector.load %arg5[%c0_6, %c0_7, %c0_8] : memref<1x16x1024xf32, #tpu.memory_space<vmem>>, vector<1x8x1024xf32>
    %12 = vector.shape_cast %11 : vector<1x8x1024xf32> to vector<8x1024xf32>
    %13 = vector.shape_cast %10 : vector<8x1024xf32> to vector<1x8x1024xf32>
    tpu.vector_store %arg5[%c0_6, %c0_7, %c0_8], %13 {strides = array<i32>} : memref<1x16x1024xf32, #tpu.memory_space<vmem>>, vector<1x8x1024xf32>,
    %c0_9 = arith.constant 0 : index
    %c0_10 = arith.constant 0 : index
    %c0_11 = arith.constant 0 : index
    %14 = vector.load %arg2[%c0_9, %c0_10, %c0_11] : memref<1x8x1024xf32, #tpu.memory_space<vmem>>, vector<1x8x1024xf32>
    %15 = vector.shape_cast %14 : vector<1x8x1024xf32> to vector<8x1024xf32>
    %c0_12 = arith.constant 0 : index
    %c8 = arith.constant 8 : index
    %c0_13 = arith.constant 0 : index
    %16 = vector.load %arg5[%c0_12, %c8, %c0_13] : memref<1x16x1024xf32, #tpu.memory_space<vmem>>, vector<1x8x1024xf32>
    %17 = vector.shape_cast %16 : vector<1x8x1024xf32> to vector<8x1024xf32>
    %18 = vector.shape_cast %15 : vector<8x1024xf32> to vector<1x8x1024xf32>
    tpu.vector_store %arg5[%c0_12, %c8, %c0_13], %18 {strides = array<i32>} : memref<1x16x1024xf32, #tpu.memory_space<vmem>>, vector<1x8x1024xf32>,
    return
  }
  func.func @transform_0(%arg0: i32) -> (i32, i32, i32) {
    %c0_i32 = arith.constant 0 : i32
    %c0_i32_0 = arith.constant 0 : i32
    %c0_i32_1 = arith.constant 0 : i32
    return %arg0, %c0_i32, %c0_i32_0 : i32, i32, i32
  }
  func.func @transform_1(%arg0: i32) -> (i32, i32, i32) {
    %c0_i32 = arith.constant 0 : i32
    %c0_i32_0 = arith.constant 0 : i32
    %c0_i32_1 = arith.constant 0 : i32
    return %arg0, %c0_i32, %c0_i32_0 : i32, i32, i32
  }
  func.func @transform_2(%arg0: i32) -> (i32, i32) {
    %c0_i32 = arith.constant 0 : i32
    %c0_i32_0 = arith.constant 0 : i32
    %c0_i32_1 = arith.constant 0 : i32
    return %c0_i32, %c0_i32_0 : i32, i32
  }
  func.func @transform_3(%arg0: i32) -> (i32, i32) {
    %c0_i32 = arith.constant 0 : i32
    %c0_i32_0 = arith.constant 0 : i32
    %c0_i32_1 = arith.constant 0 : i32
    return %c0_i32, %c0_i32_0 : i32, i32
  }
  func.func @transform_4(%arg0: i32) -> (i32, i32, i32) {
    %c0_i32 = arith.constant 0 : i32
    %c0_i32_0 = arith.constant 0 : i32
    %c0_i32_1 = arith.constant 0 : i32
    return %arg0, %c0_i32, %c0_i32_0 : i32, i32, i32
  }
}

</mosaic_0001>

<bundles_post_ra>
// kernel: decoder_forward.3
= control target key start
LH: loop header
LB: loop body
LE: loop exit
PB: predicated region body
PF: predicated region fallthrough
CT: control target
= control target key end

     0   :  { %s417_s15 = smov 0   ;;  %s461_s0 = inlined_call_operand.vmem [shape: bf16[2,8,1024], index: 0, kind: input, shape index: {}]   ;;  %s462_s1 = inlined_call_operand.vmem [shape: f32[2,8,1024], index: 1, kind: input, shape index: {}]   ;;  %s463_s2 = inlined_call_operand.vmem [shape: f32[8,1], index: 2, kind: input, shape index: {}]   ;;  %s464_s3 = inlined_call_operand.vmem [shape: f32[8,1], index: 3, kind: input, shape index: {}]   ;;  %s465_s4 = inlined_call_operand.vmem [shape: f32[2,16,1024], index: 4, kind: output, shape index: {}]  }
   0x1 LB: > { %s357_s16 = sadd.s32 4294967295, %s389_s15   ;;  %p361_p0 = scmp.ge.s32.totalorder %s389_s15, 1  ;;  %s389_s15 = sphi %s417_s15, %s14_s15  }
   0x2   : > { %p172_p1 = scmp.lt.s32.totalorder %s389_s15, 3 }
   0x4   : > { %p173_p2 = pnand %p361_p0, %p172_p1 }
   0x5   : > { %p203_p3 = scmp.lt.s32.totalorder (!%p173_p2), %s357_s16, 1 }
   0x6   : > { %176 = sbr.rel (%p173_p2) target bundleno = 149 (0x95), region = 36 }
   0xb   : > { %v230_v0 = vld [vmem:[%s463_s2] sm:$0xff]  ;;  %v391_v1 = vmov 0   ;;  %s467_s16 = smov (!%p203_p3, %s357_s16), 1 }
   0xc   : > { %382 = vset.pattern.permute.xlu0 %v391_v1  ;;  %v244_v2 = vld [vmem:[%s464_s3] sm:$0xff]  ;;  %s371_s21 = sshll.u32 %s467_s16, 6  ;;  %s372_s25 = sshll.u32 %s467_s16, 7 }
   0xd   : > { %233 = vperm.xlu0 %382, %v230_v0   ;;  %s212_s24 = scalar_lea.vmem %s462_s1, %s371_s21  ;;  %s437_s28 = scalar_lea.vmem %s465_s4, %s372_s25 }
   0xe   : > { %v274_v3 = vld [vmem:[%s212_s24] sm:$0xff]  ;;  %v275_v4 = vld [vmem:[%s212_s24 + $0x8] sm:$0xff]  ;;  %v276_v5 = vld [vmem:[%s212_s24 + $0x10] sm:$0xff]  ;;  %s370_s29 = sshll.u32 %s467_s16, 5 }
   0xf   : > { %v277_v6 = vld [vmem:[%s212_s24 + $0x18] sm:$0xff]  ;;  %v278_v7 = vld [vmem:[%s212_s24 + $0x20] sm:$0xff]  ;;  %282 = vst [vmem:[%s437_s28 + $0x40] sm:$0xff] %v274_v3  ;;  %283 = vst [vmem:[%s437_s28 + $0x48] sm:$0xff] %v275_v4  ;;  %s207_s6 = scalar_lea.vmem %s461_s0, %s370_s29 }
  0x10   : > { %v279_v8 = vld [vmem:[%s212_s24 + $0x28] sm:$0xff]  ;;  %v280_v9 = vld [vmem:[%s212_s24 + $0x30] sm:$0xff]  ;;  %v281_v10 = vld [vmem:[%s212_s24 + $0x38] sm:$0xff]  ;;  %284 = vst [vmem:[%s437_s28 + $0x50] sm:$0xff] %v276_v5 }
  0x11   : > { %247 = vperm.xlu0 %382, %v244_v2   ;;  %285 = vst [vmem:[%s437_s28 + $0x58] sm:$0xff] %v277_v6  ;;  %286 = vst [vmem:[%s437_s28 + $0x60] sm:$0xff] %v278_v7  ;;  %v218_v11 = vld [vmem:[%s207_s6] sm:$0xff]  ;;  %v219_v12 = vld [vmem:[%s207_s6 + $0x8] sm:$0xff] }
  0x12   : > { %287 = vst [vmem:[%s437_s28 + $0x68] sm:$0xff] %v279_v8  ;;  %288 = vst [vmem:[%s437_s28 + $0x70] sm:$0xff] %v280_v9  ;;  %v220_v13 = vld [vmem:[%s207_s6 + $0x10] sm:$0xff]  ;;  %v221_v14 = vld [vmem:[%s207_s6 + $0x18] sm:$0xff]  ;;  %v222_v15 = vunpack.c.l.bf16 %v218_v11  ;;  %v223_v16 = vunpack.c.h.bf16 %v218_v11  ;;  %v224_v17 = vunpack.c.l.bf16 %v219_v12  ;;  %v225_v18 = vunpack.c.h.bf16 %v219_v12 }
  0x13   : > { %289 = vst [vmem:[%s437_s28 + $0x78] sm:$0xff] %v281_v10  ;;  %v226_v20 = vunpack.c.l.bf16 %v220_v13  ;;  %v227_v21 = vunpack.c.h.bf16 %v220_v13  ;;  %v228_v22 = vunpack.c.l.bf16 %v221_v14  ;;  %v229_v23 = vunpack.c.h.bf16 %v221_v14 }
  0x88   : > { %v234_v19 = vpop.permute.xlu0 %233 }
  0x89   : > { %v236_v24 = vmul.f32 %v234_v19, %v222_v15  ;;  %v237_v25 = vmul.f32 %v234_v19, %v223_v16  ;;  %v238_v26 = vmul.f32 %v234_v19, %v224_v17  ;;  %v239_v27 = vmul.f32 %v234_v19, %v225_v18 }
  0x8a   : > { %v240_v29 = vmul.f32 %v234_v19, %v226_v20  ;;  %v241_v30 = vmul.f32 %v234_v19, %v227_v21  ;;  %v242_v31 = vmul.f32 %v234_v19, %v228_v22  ;;  %v243_v32 = vmul.f32 %v234_v19, %v229_v23 }
  0x8c   : > { %v248_v28 = vpop.permute.xlu0 %247 }
  0x8d   : > { %v250_v33 = vadd.f32 %v248_v28, %v236_v24  ;;  %v251_v34 = vadd.f32 %v248_v28, %v237_v25  ;;  %v252_v35 = vadd.f32 %v248_v28, %v238_v26  ;;  %v253_v36 = vadd.f32 %v248_v28, %v239_v27 }
  0x8e   : > { %v254_v37 = vadd.f32 %v248_v28, %v240_v29  ;;  %v255_v38 = vadd.f32 %v248_v28, %v241_v30  ;;  %v256_v39 = vadd.f32 %v248_v28, %v242_v31  ;;  %v257_v40 = vadd.f32 %v248_v28, %v243_v32 }
  0x8f   : > { %v258_v41 = vmax.f32 %v250_v33, 0.0  ;;  %v259_v42 = vmax.f32 %v251_v34, 0.0  ;;  %v260_v43 = vmax.f32 %v252_v35, 0.0  ;;  %v261_v44 = vmax.f32 %v253_v36, 0.0 }
  0x90   : > { %v262_v45 = vmax.f32 %v254_v37, 0.0  ;;  %v263_v46 = vmax.f32 %v255_v38, 0.0  ;;  %v264_v47 = vmax.f32 %v256_v39, 0.0  ;;  %v265_v48 = vmax.f32 %v257_v40, 0.0 }
  0x91   : > { %266 = vst [vmem:[%s437_s28] sm:$0xff] %v258_v41  ;;  %267 = vst [vmem:[%s437_s28 + $0x8] sm:$0xff] %v259_v42 }
  0x92   : > { %268 = vst [vmem:[%s437_s28 + $0x10] sm:$0xff] %v260_v43  ;;  %269 = vst [vmem:[%s437_s28 + $0x18] sm:$0xff] %v261_v44 }
  0x93   : > { %270 = vst [vmem:[%s437_s28 + $0x20] sm:$0xff] %v262_v45  ;;  %271 = vst [vmem:[%s437_s28 + $0x28] sm:$0xff] %v263_v46 }
  0x94   : > { %272 = vst [vmem:[%s437_s28 + $0x30] sm:$0xff] %v264_v47  ;;  %273 = vst [vmem:[%s437_s28 + $0x38] sm:$0xff] %v265_v48 }
  0x95 PF: > { %s14_s15 = sadd.s32 1, %s389_s15  }
  0x96   : > { %p11_p4 = scmp.ge.s32.totalorder %s14_s15, 4  }
  0x98   :  { %13 = sbr.rel (!%p11_p4) target bundleno = 1 (0x1), region = 69 }

// kernel: decoder_forward.2
= control target key start
LH: loop header
LB: loop body
LE: loop exit
PB: predicated region body
PF: predicated region fallthrough
CT: control target
= control target key end

     0   :  { %s4661_s15 = smov 0   ;;  %s6263_s0 = inlined_call_operand.vmem [shape: bf16[2,342,4], index: 0, kind: input, shape index: {}]   ;;  %s6264_s1 = inlined_call_operand.vmem [shape: bf16[9,4,32], index: 1, kind: input, shape index: {}]   ;;  %s6265_s2 = inlined_call_operand.vmem [shape: f32[288,1], index: 2, kind: input, shape index: {}]   ;;  %s6266_s3 = inlined_call_operand.vmem [shape: bf16[2,288,32], index: 3, kind: output, shape index: {0}]   ;;  %s6267_s4 = inlined_call_operand.vmem [shape: f32[2,2,32], index: 4, kind: output, shape index: {1}]  }
   0x1 LB: > { %s3775_s16 = sadd.s32 4294967295, %s4633_s15   ;;  %p3779_p0 = scmp.ge.s32.totalorder %s4633_s15, 1  ;;  %s4633_s15 = sphi %s4661_s15, %s15_s15  }
   0x2   : > { %p165_p1 = scmp.lt.s32.totalorder %s4633_s15, 3 }
   0x4   : > { %p166_p2 = pnand %p3779_p0, %p165_p1 }
   0x6   : > { %169 = sbr.rel (%p166_p2) target bundleno = 577 (0x241), region = 32 }
   0xb   : > { %v3783_v0 = vld [vmem:[%s6264_s1 + $0x2] sm:$0x3]  ;;  %vm551_vm0 = vcmask 1041408   ;;  %p195_p3 = scmp.lt.s32.totalorder %s3775_s16, 1  ;;  %v3839_v2 = vld [vmem:[%s6264_s1 + $0x4] sm:$0x3] }
   0xc   : > { %4565 = vmatprep.subr.msk.bf16.mxu0 %vm551_vm0, %v3783_v0  ;;  %4566 = vmatprep.subr.msk.bf16.mxu1 %vm551_vm0, %v3783_v0  ;;  %v553_v1 = vsel %vm551_vm0, %v3783_v0, 0  ;;  %v251_v3 = vld [vmem:[%s6264_s1] sm:$0x3]  ;;  %vm347_vm1 = vsmask.f32 7424  ;;  %vm496_vm2 = vcmask 31744  }
   0xd   : > { %4222 = vmatpush3.bf16.msra.mxu0 %v553_v1  ;;  %4564 = vmatpush3.bf16.msra.mxu1 %v553_v1  ;;  %s6390_s16 = smov (!%p195_p3, %s3775_s16), 1  ;;  %v1043_v12 = vsel %vm551_vm0, %v3839_v2, 0  ;;  %v769_v16 = vsel %vm551_vm0, %v251_v3, 0  ;;  %v4750_v32 = vld [vmem:[%s6264_s1 + $0x8] sm:$0x3]  ;;  %vm950_vm3 = vcmask 1046528  }
   0xe   : > { %4568 = vmatprep.subr.msk.bf16.mxu0 %vm551_vm0, %v3839_v2  ;;  %4567 = vmatprep.subr.msk.bf16.mxu1 %vm551_vm0, %v251_v3  ;;  %s4575_s23 = smul.u32 172, %s6390_s16  ;;  %v4778_v43 = vld [vmem:[%s6264_s1 + $0x6] sm:$0x3]  ;;  %vm1494_vm4 = vsmask.f32 6400  ;;  %vm1852_vm5 = vcmask 1045504  }
   0xf   : > { %vm2396_vm6 = vsmask.f32 5376  ;;  %vm2754_vm7 = vcmask 1044480   ;;  %vm3652_vm8 = vcmask 257024   ;;  %vm3314_vm9 = vcmask 261120   ;;  %s3782_s21 = sshll.u32 %s6390_s16, 1 }
  0x10   : > { %s4689_s26 = scalar_lea.vmem %s6263_s0, %s4575_s23  ;;  %s208_s24 = scalar_lea.vmem %s6267_s4, %s3782_s21  ;;  %vm3392_vm10 = vcmask 253952  }
  0x11   : > { %v4692_v4 = vld [vmem:[%s4689_s26] sm:$0xff]   ;;  %v4695_v5 = vld [vmem:[%s4689_s26 + $0x8] sm:$0xff]   ;;  %v4702_v10 = vld [vmem:[%s4689_s26 + $0x50] sm:$0xff]  }
  0x12   : > { %v349_v6 = vshrl.u32 %v4692_v4, 16  ;;  %v351_v7 = vshll.u32 %v4692_v4, 16  ;;  %v6270_v8 = vshll.u32 %v4695_v5, 16  ;;  %v6269_v9 = vshrl.u32 %v4695_v5, 16  ;;  %6301 = vst [vmem:[#allocation2_spill] sm:$0xff] %v4702_v10  ;;  %v4705_v11 = vld [vmem:[%s4689_s26 + $0x58] sm:$0xff]  }
  0x13   : > { %6302 = vst [vmem:[#allocation3_spill] sm:$0xff] %v4705_v11  ;;  %v4711_v15 = vld [vmem:[%s4689_s26 + $0x10] sm:$0xff]   ;;  %v4715_v17 = vshll.u32 %v4702_v10, 16  ;;  %v4718_v18 = vshrl.u32 %v4702_v10, 16  ;;  %v4721_v19 = vshll.u32 %v4705_v11, 16  ;;  %v4724_v20 = vshrl.u32 %v4705_v11, 16 }
  0x14   : > { %v353_v13 = vrot.slane %v351_v7, 1  ;;  %v358_v14 = vrot.slane %v6270_v8, 1  ;;  %v4729_v23 = vshll.u32 %v4711_v15, 16  ;;  %v4732_v24 = vld [vmem:[%s4689_s26 + $0x60] sm:$0xff]   ;;  %v4737_v27 = vld [vmem:[%s4689_s26 + $0x18] sm:$0xff]   ;;  %v4740_v28 = vshrl.u32 %v4711_v15, 16 }
  0x15   : > { %6304 = vst [vmem:[#allocation5_spill] sm:$0xff] %v4732_v24  ;;  %v6268_v25 = vrot.slane %v4715_v17, 1  ;;  %v438_v26 = vrot.slane %v4721_v19, 1  ;;  %v4745_v31 = vshll.u32 %v4732_v24, 16  ;;  %v4758_v35 = vshll.u32 %v4737_v27, 16  ;;  %v4761_v36 = vld [vmem:[%s4689_s26 + $0x68] sm:$0xff]  }
  0x16   : > { %v354_v21 = vor.u32 %v353_v13, %v349_v6  ;;  %v362_v22 = vor.u32 %v6269_v9, %v358_v14  ;;  %6303 = vst [vmem:[#allocation4_spill] sm:$0xff] %v4729_v23  ;;  %6305 = vst [vmem:[#allocation6_spill] sm:$0xff] %v4740_v28  ;;  %v366_v30 = vrot.slane %v4729_v23, 1  ;;  %v4764_v37 = vshrl.u32 %v4732_v24, 16  ;;  %v4767_v38 = vld [vmem:[%s4689_s26 + $0x20] sm:$0xff]   ;;  %v4790_v48 = vld [vmem:[%s4689_s26 + $0x70] sm:$0xff]  }
  0x17   : > { %v434_v33 = vor.u32 %v4718_v18, %v6268_v25  ;;  %v442_v34 = vor.u32 %v4724_v20, %v438_v26  ;;  %6306 = vst [vmem:[#allocation7_spill] sm:$0xff] %v4761_v36  ;;  %v446_v40 = vrot.slane %v4745_v31, 1  ;;  %v4773_v42 = vshrl.u32 %v4737_v27, 16  ;;  %6307 = vst [vmem:[#allocation8_spill] sm:$0xff] %v4790_v48  ;;  %v4799_v52 = vld [vmem:[%s4689_s26 + $0x28] sm:$0xff]   ;;  %v4819_v60 = vld [vmem:[%s4689_s26 + $0x78] sm:$0xff]  }
  0x18   : > { %v359_v29 = vsel %vm347_vm1, %v354_v21, %v358_v14  ;;  %v367_v39 = vsel %vm347_vm1, %v362_v22, %v366_v30  ;;  %v370_v41 = vor.u32 %v4740_v28, %v366_v30  ;;  %v374_v45 = vrot.slane %v4758_v35, 1  ;;  %v4822_v61 = vld [vmem:[%s4689_s26 + $0x30] sm:$0xff]   ;;  %v4830_v1 = vld [vmem:[%s4689_s26 + $0x80] sm:$0xff]  }
  0x19   : > { %4223 = vmatprep.mubr.msk.bf16.mxu0 %vm496_vm2, %v359_v29  ;;  %v439_v44 = vsel %vm347_vm1, %v434_v33, %v438_v26  ;;  %v4784_v46 = vshll.u32 %v4761_v36, 16  ;;  %v4787_v47 = vshll.u32 %v4767_v38, 16  ;;  %v447_v49 = vsel %vm347_vm1, %v442_v34, %v446_v40  ;;  %6309 = vst [vmem:[#allocation10_spill] sm:$0xff] %v4822_v61  ;;  %6311 = vst [vmem:[#allocation12_spill] sm:$0xff] %v4830_v1  ;;  %v4861_v33 = vld [vmem:[%s4689_s26 + $0x88] sm:$0xff]  }
  0x1a   : > { %4224 = vmatmul.mubr.msk.bf16.vlgmr.msra.gmra.mxu0 %vm496_vm2, %v367_v39  ;;  %4243 = vmatprep.mubr.msk.bf16.mxu1 %vm496_vm2, %v439_v44  ;;  %v450_v50 = vor.u32 %v4764_v37, %v446_v40  ;;  %v4796_v51 = vshrl.u32 %v4761_v36, 16  ;;  %v375_v53 = vsel %vm347_vm1, %v370_v41, %v374_v45  ;;  %v378_v55 = vor.u32 %v4773_v42, %v374_v45  ;;  %v4871_v44 = vld [vmem:[%s4689_s26 + $0x40] sm:$0xff]  }
  0x1b   : > { %4298 = vmatpush3.bf16.msra.mxu0 %v1043_v12  ;;  %4244 = vmatmul.mubr.msk.bf16.vlgmr.msra.gmra.mxu1 %vm496_vm2, %v447_v49  ;;  %v454_v54 = vrot.slane %v4784_v46, 1  ;;  %v382_v56 = vrot.slane %v4787_v47, 1  ;;  %v4810_v57 = vshll.u32 %v4790_v48, 16  ;;  %v4813_v58 = vshrl.u32 %v4767_v38, 16  ;;  %v4840_v12 = vld [vmem:[%s4689_s26 + $0x38] sm:$0xff]   ;;  %6316 = vst [vmem:[#allocation17_spill] sm:$0xff] %v4871_v44 }
  0x1c   : > { %4570 = vmatprep.subr.msk.bf16.mxu0 %vm551_vm0, %v4750_v32  ;;  %4260 = vmatpush3.bf16.msra.mxu1 %v769_v16  ;;  %v4816_v59 = vshll.u32 %v4799_v52, 16  ;;  %v4827_v0 = vshrl.u32 %v4790_v48, 16  ;;  %6312 = vst [vmem:[#allocation13_spill] sm:$0xff] %v4840_v12  ;;  %v4843_v13 = vshll.u32 %v4819_v60, 16  ;;  %v4846_v14 = vshrl.u32 %v4799_v52, 16 }
  0x1d   : > { %4227 = vmatprep.mubr.msk.bf16.mxu0 %vm496_vm2, %v375_v53  ;;  %6308 = vst [vmem:[#allocation9_spill] sm:$0xff] %v4810_v57  ;;  %v455_v62 = vsel %vm347_vm1, %v450_v50, %v454_v54  ;;  %v458_v63 = vor.u32 %v4796_v51, %v454_v54  ;;  %4569 = vmatprep.subr.msk.bf16.mxu1 %vm551_vm0, %v4778_v43  ;;  %v462_v3 = vrot.slane %v4810_v57, 1  ;;  %v4849_v16 = vshll.u32 %v4822_v61, 16 }
  0x1e   : > { %6310 = vst [vmem:[#allocation11_spill] sm:$0xff] %v4827_v0  ;;  %4247 = vmatprep.mubr.msk.bf16.mxu1 %vm496_vm2, %v455_v62  ;;  %v383_v2 = vsel %vm347_vm1, %v378_v55, %v382_v56  ;;  %v386_v6 = vor.u32 %v4813_v58, %v382_v56  ;;  %v390_v7 = vrot.slane %v4816_v59, 1  ;;  %6313 = vst [vmem:[#allocation14_spill] sm:$0xff] %v4843_v13  ;;  %v4852_v21 = vshrl.u32 %v4819_v60, 16  ;;  %v246_v56 = vld [vmem:[%s4689_s26 + $0x90] sm:$0xf] }
  0x1f   : > { %v463_v22 = vsel %vm347_vm1, %v458_v63, %v462_v3  ;;  %v466_v29 = vor.u32 %v4827_v0, %v462_v3  ;;  %v4858_v30 = vshll.u32 %v4830_v1, 16  ;;  %v470_v34 = vrot.slane %v4843_v13, 1 }
  0x20   : > { %6314 = vst [vmem:[#allocation15_spill] sm:$0xff] %v4852_v21  ;;  %v391_v26 = vsel %vm347_vm1, %v386_v6, %v390_v7  ;;  %v394_v39 = vor.u32 %v4846_v14, %v390_v7  ;;  %v398_v40 = vrot.slane %v4849_v16, 1  ;;  %v4868_v41 = vshrl.u32 %v4822_v61, 16 }
  0x21   : > { %6315 = vst [vmem:[#allocation16_spill] sm:$0xff] %v4858_v30  ;;  %v478_v45 = vrot.slane %v4858_v30, 1  ;;  %v4876_v49 = vshll.u32 %v4840_v12, 16  ;;  %v4879_v50 = vshrl.u32 %v4830_v1, 16  ;;  %v4882_v53 = vshll.u32 %v4861_v33, 16 }
  0x22   : > { %4228 = vmatmul.mubr.msk.bf16.gmra.mxu0 %vm496_vm2, %v383_v2  ;;  %v471_v54 = vsel %vm347_vm1, %v466_v29, %v470_v34  ;;  %v402_v55 = vor.u32 %v4868_v41, %v398_v40  ;;  %v474_v62 = vor.u32 %v4852_v21, %v470_v34  ;;  %v4892_v2 = vld [vmem:[%s4689_s26 + $0x48] sm:$0xff]   ;;  %v4897_v7 = vshll.u32 %v4871_v44, 16 }
  0x23   : > { %4231 = vmatprep.mubr.msk.bf16.mxu0 %vm496_vm2, %v391_v26  ;;  %6317 = vst [vmem:[#allocation18_spill] sm:$0xff] %v4879_v50  ;;  %6318 = vst [vmem:[#allocation19_spill] sm:$0xff] %v4882_v53  ;;  %4248 = vmatmul.mubr.msk.bf16.gmra.mxu1 %vm496_vm2, %v463_v22  ;;  %v406_v63 = vrot.slane %v4876_v49, 1  ;;  %v482_v3 = vor.u32 %v4879_v50, %v478_v45  ;;  %v486_v6 = vrot.slane %v4882_v53, 1  ;;  %v4901_v29 = vshrl.u32 %v4840_v12, 16 }
  0x24   : > { %4251 = vmatprep.mubr.msk.bf16.mxu1 %vm496_vm2, %v471_v54  ;;  %6319 = vst [vmem:[#allocation20_spill] sm:$0xff] %v4892_v2  ;;  %v3802_v22 = vcombine.low %v246_v56, %v246_v56  ;;  %v399_v26 = vsel %vm347_vm1, %v394_v39, %v398_v40  ;;  %v4905_v34 = vshrl.u32 %v4871_v44, 16  ;;  %v479_v25 = vsel %vm347_vm1, %v474_v62, %v478_v45 }
  0x25   : > { %v407_v54 = vsel %vm347_vm1, %v402_v55, %v406_v63  ;;  %v4909_v9 = vshrl.u32 %v4861_v33, 16  ;;  %v4912_v53 = vshll.u32 %v4892_v2, 16  ;;  %v487_v39 = vsel %vm347_vm1, %v482_v3, %v486_v6 }
  0x26   : > { %v492_v8 = vshll.u32 %v3802_v22, 16  ;;  %v414_v40 = vrot.slane %v4897_v7, 1  ;;  %v410_v55 = vor.u32 %v4901_v29, %v406_v63  ;;  %v4926_v3 = vshrl.u32 %v4892_v2, 16 }
  0x27   : > { %6320 = vst [vmem:[#allocation21_spill] sm:$0xff] %v4909_v9  ;;  %v422_v62 = vrot.slane %v4912_v53, 1  ;;  %v490_v30 = vor.u32 %v4909_v9, %v486_v6  ;;  %v6321_v63 = vshll.u32 %v4695_v5, 16  ;;  %v986_v6 = vrot.slane %v3802_v22, 1  ;;  %v4972_v9 = vld [vmem:[%s6264_s1 + $0xa] sm:$0x3] }
  0x28   : > { %v418_v45 = vor.u32 %v4905_v34, %v414_v40  ;;  %v494_v50 = vrot.slane %v492_v8, 1  ;;  %v954_v22 = vrot.slane %v4711_v15, 1 }
  0x29   : > { %v4931_v13 = vrot.slane %v6321_v63, 2  ;;  %v426_v8 = vor.u32 %v4926_v3, %v422_v62 }
  0x2a   : > { %4232 = vmatmul.mubr.msk.bf16.gmra.mxu0 %vm496_vm2, %v399_v26  ;;  %v415_v26 = vsel %vm347_vm1, %v410_v55, %v414_v40  ;;  %v6322_v40 = vshrl.u32 %v4695_v5, 16 }
  0x2b   : > { %4235 = vmatprep.mubr.msk.bf16.mxu0 %vm496_vm2, %v407_v54  ;;  %4252 = vmatmul.mubr.msk.bf16.gmra.mxu1 %vm496_vm2, %v479_v25  ;;  %v423_v54 = vsel %vm347_vm1, %v418_v45, %v422_v62  ;;  %v495_v25 = vsel %vm347_vm1, %v490_v30, %v494_v50  ;;  %v951_v30 = vrot.slane %v4692_v4, 1  ;;  %v952_v50 = vrot.slane %v4695_v5, 1 }
  0x2c   : > { %4255 = vmatprep.mubr.msk.bf16.mxu1 %vm496_vm2, %v487_v39  ;;  %v4936_v39 = vrot.slane %v4861_v33, 1  ;;  %v4942_v55 = vrot.slane %v6322_v40, 1  ;;  %v1506_v62 = vrot.slane %v4813_v58, 1 }
  0x2d   : > { %v953_v40 = vsel %vm950_vm3, %v951_v30, %v952_v50 }
  0x2e   : > { %v4949_v45 = vsel %vm950_vm3, %v4936_v39, %v986_v6  ;;  %v247_v6 = vld [vmem:[%s4689_s26 + $0x94] sm:$0xf] }
  0x2f   : > { %v4977_v30 = vcombine.low %v246_v56, %v247_v6  ;;  %v4994_v56 = vld [vmem:[%s6264_s1 + $0xc] sm:$0x3]  ;;  %v962_v6 = vrot.slane %v4822_v61, 1 }
  0x31   : > { %6324 = vst [vmem:[#allocation22_spill] sm:$0xff] %v4977_v30 }
  0x32   : > { %4236 = vmatmul.mubr.msk.bf16.gmra.mxu0 %vm496_vm2, %v415_v26  ;;  %v1507_v26 = vrot.slane %v4787_v47, 2 }
  0x33   : > { %4239 = vmatprep.mubr.msk.bf16.mxu0 %vm496_vm2, %v423_v54  ;;  %4256 = vmatmul.mubr.msk.bf16.gmra.mxu1 %vm496_vm2, %v495_v25  ;;  %v6323_v54 = vrot.slane %v4715_v17, 1 }
  0x34   : > { %4261 = vmatprep.mubr.msk.bf16.mxu1 %vm496_vm2, %v4692_v4  ;;  %v4960_v25 = vor.u32 %v1507_v26, %v1506_v62  ;;  %v1277_v4 = vsel %vm551_vm0, %v4778_v43, 0  ;;  %v4984_v43 = vsel %vm950_vm3, %v952_v50, %v954_v22  ;;  %v1635_v62 = vsel %vm551_vm0, %v4750_v32, 0 }
  0x35   : > { %v431_v63 = vsel %vm347_vm1, %v426_v8, %v6323_v54  ;;  %v956_v8 = vrot.slane %v4737_v27, 1  ;;  %v6281_v54 = vrot.slane %v4977_v30, 1  ;;  %v958_v50 = vrot.slane %v4767_v38, 1 }
  0x37   : > { %v4989_v26 = vsel %vm950_vm3, %v954_v22, %v956_v8  ;;  %v5006_v32 = vsel %vm950_vm3, %v4936_v39, %v6281_v54  ;;  %v960_v22 = vrot.slane %v4799_v52, 1  ;;  %v968_v54 = vrot.slane %v4892_v2, 1 }
  0x3a   : > { %4240 = vmatmul.mubr.msk.bf16.gmra.mxu0 %vm496_vm2, %v431_v63  ;;  %v5016_v63 = vsel %vm950_vm3, %v956_v8, %v958_v50  ;;  %v5032_v8 = vsel %vm950_vm3, %v960_v22, %v962_v6 }
  0x3b   : > { %4299 = vmatprep.mubr.msk.bf16.mxu0 %vm496_vm2, %v953_v40  ;;  %4262 = vmatmul.mubr.msk.bf16.vlgmr.msra.gmra.mxu1 %vm496_vm2, %v4695_v5  ;;  %v5019_v40 = vsel %vm950_vm3, %v958_v50, %v960_v22  ;;  %v966_v50 = vrot.slane %v4871_v44, 1 }
  0x3c   : > { %4336 = vmatpush3.bf16.msra.mxu1 %v1277_v4  ;;  %4265 = vmatprep.mubr.msk.bf16.mxu1 %vm496_vm2, %v4711_v15  ;;  %v964_v4 = vrot.slane %v4840_v12, 1 }
  0x3d   : > { %4571 = vmatprep.subr.msk.bf16.mxu1 %vm551_vm0, %v4972_v9 }
  0x3e   : > { %v5048_v22 = vsel %vm950_vm3, %v964_v4, %v966_v50 }
  0x42   : > { %4300 = vmatmul.mubr.msk.bf16.vlgmr.msra.gmra.mxu0 %vm496_vm2, %v4984_v43 }
  0x43   : > { %4374 = vmatpush3.bf16.msra.mxu0 %v1635_v62  ;;  %4303 = vmatprep.mubr.msk.bf16.mxu0 %vm496_vm2, %v4989_v26  ;;  %v5035_v62 = vsel %vm950_vm3, %v962_v6, %v964_v4  ;;  %v5051_v6 = vsel %vm950_vm3, %v966_v50, %v968_v54 }
  0x44   : > { %4266 = vmatmul.mubr.msk.bf16.gmra.mxu1 %vm496_vm2, %v4737_v27  ;;  %4572 = vmatprep.subr.msk.bf16.mxu0 %vm551_vm0, %v4994_v56 }
  0x45   : > { %4269 = vmatprep.mubr.msk.bf16.mxu1 %vm496_vm2, %v4767_v38 }
  0x4a   : > { %4304 = vmatmul.mubr.msk.bf16.gmra.mxu0 %vm496_vm2, %v5016_v63 }
  0x4b   : > { %4307 = vmatprep.mubr.msk.bf16.mxu0 %vm496_vm2, %v5019_v40 }
  0x4c   : > { %4270 = vmatmul.mubr.msk.bf16.gmra.mxu1 %vm496_vm2, %v4799_v52 }
  0x4d   : > { %4273 = vmatprep.mubr.msk.bf16.mxu1 %vm496_vm2, %v4822_v61  ;;  %v970_v61 = vrot.slane %v4702_v10, 1 }
  0x4f   : > { %v5064_v4 = vsel %vm950_vm3, %v968_v54, %v970_v61 }
  0x52   : > { %4308 = vmatmul.mubr.msk.bf16.gmra.mxu0 %vm496_vm2, %v5032_v8 }
  0x53   : > { %4311 = vmatprep.mubr.msk.bf16.mxu0 %vm496_vm2, %v5035_v62 }
  0x54   : > { %4274 = vmatmul.mubr.msk.bf16.gmra.mxu1 %vm496_vm2, %v4840_v12  ;;  %v972_v12 = vrot.slane %v4705_v11, 1 }
  0x55   : > { %4277 = vmatprep.mubr.msk.bf16.mxu1 %vm496_vm2, %v4871_v44  ;;  %v974_v44 = vrot.slane %v4732_v24, 1 }
  0x56   : > { %v5067_v50 = vsel %vm950_vm3, %v970_v61, %v972_v12 }
  0x57   : > { %v5080_v54 = vsel %vm950_vm3, %v972_v12, %v974_v44 }
  0x5a   : > { %4312 = vmatmul.mubr.msk.bf16.gmra.mxu0 %vm496_vm2, %v5048_v22 }
  0x5b   : > { %4315 = vmatprep.mubr.msk.bf16.mxu0 %vm496_vm2, %v5051_v6 }
  0x5c   : > { %4278 = vmatmul.mubr.msk.bf16.gmra.mxu1 %vm496_vm2, %v4892_v2  ;;  %v976_v2 = vrot.slane %v4761_v36, 1 }
  0x5d   : > { %4281 = vmatprep.mubr.msk.bf16.mxu1 %vm496_vm2, %v4702_v10  ;;  %v978_v10 = vrot.slane %v4790_v48, 1 }
  0x5e   : > { %v5083_v61 = vsel %vm950_vm3, %v974_v44, %v976_v2 }
  0x5f   : > { %v5096_v12 = vsel %vm950_vm3, %v976_v2, %v978_v10 }
  0x62   : > { %4316 = vmatmul.mubr.msk.bf16.gmra.mxu0 %vm496_vm2, %v5064_v4 }
  0x63   : > { %4319 = vmatprep.mubr.msk.bf16.mxu0 %vm496_vm2, %v5067_v50 }
  0x64   : > { %4282 = vmatmul.mubr.msk.bf16.gmra.mxu1 %vm496_vm2, %v4705_v11  ;;  %v980_v11 = vrot.slane %v4819_v60, 1 }
  0x65   : > { %4285 = vmatprep.mubr.msk.bf16.mxu1 %vm496_vm2, %v4732_v24  ;;  %v982_v24 = vrot.slane %v4830_v1, 1 }
  0x66   : > { %v5099_v44 = vsel %vm950_vm3, %v978_v10, %v980_v11 }
  0x67   : > { %v5111_v2 = vsel %vm950_vm3, %v980_v11, %v982_v24  ;;  %v5115_v10 = vsel %vm950_vm3, %v982_v24, %v4936_v39  ;;  %v1502_v11 = vrot.slane %v4773_v42, 1  ;;  %v1503_v24 = vrot.slane %v4758_v35, 2 }
  0x68   : > { %v6325_v39 = vor.u32 %v4931_v13, %v4942_v55  ;;  %v1511_v13 = vrot.slane %v4816_v59, 2  ;;  %v2179_v55 = vsel %vm551_vm0, %v4994_v56, 0 }
  0x6a   : > { %4320 = vmatmul.mubr.msk.bf16.gmra.mxu0 %vm496_vm2, %v5080_v54 }
  0x6b   : > { %4323 = vmatprep.mubr.msk.bf16.mxu0 %vm496_vm2, %v5083_v61 }
  0x6c   : > { %4286 = vmatmul.mubr.msk.bf16.gmra.mxu1 %vm496_vm2, %v4761_v36  ;;  %v1499_v36 = vrot.slane %v4729_v23, 2 }
  0x6d   : > { %4289 = vmatprep.mubr.msk.bf16.mxu1 %vm496_vm2, %v4790_v48  ;;  %v1498_v48 = vrot.slane %v4740_v28, 1  ;;  %v1945_v28 = vsel %vm551_vm0, %v4972_v9, 0 }
  0x72   : > { %4324 = vmatmul.mubr.msk.bf16.gmra.mxu0 %vm496_vm2, %v5096_v12 }
  0x73   : > { %4327 = vmatprep.mubr.msk.bf16.mxu0 %vm496_vm2, %v5099_v44 }
  0x74   : > { %4290 = vmatmul.mubr.msk.bf16.gmra.mxu1 %vm496_vm2, %v4819_v60 }
  0x75   : > { %4293 = vmatprep.mubr.msk.bf16.mxu1 %vm496_vm2, %v4830_v1  ;;  %v1500_v1 = vor.u32 %v1499_v36, %v1498_v48  ;;  %v1504_v36 = vor.u32 %v1503_v24, %v1502_v11  ;;  %v5141_v48 = vld [vmem:[%s6264_s1 + $0xe] sm:$0x3]  ;;  %v2404_v11 = vrot.slane %v4813_v58, 2 }
  0x77   : > { %v1501_v23 = vsel %vm1494_vm4, %v6325_v39, %v1500_v1  ;;  %v1505_v9 = vsel %vm1494_vm4, %v1500_v1, %v1504_v36  ;;  %v1518_v39 = vrot.slane %v4901_v29, 1 }
  0x7a   : > { %4328 = vmatmul.mubr.msk.bf16.gmra.mxu0 %vm496_vm2, %v5111_v2 }
  0x7b   : > { %4331 = vmatprep.mubr.msk.bf16.mxu0 %vm496_vm2, %v5115_v10 }
  0x7c   : > { %4294 = vmatmul.mubr.msk.bf16.gmra.mxu1 %vm496_vm2, %v4861_v33 }
  0x7d   : > { %4337 = vmatprep.mubr.msk.bf16.mxu1 %vm496_vm2, %v4984_v43  ;;  %v1515_v43 = vrot.slane %v4849_v16, 2 }
  0x82   : > { %4332 = vmatmul.mubr.msk.bf16.gmra.mxu0 %vm496_vm2, %v4949_v45  ;;  %v1509_v45 = vsel %vm1494_vm4, %v1504_v36, %v4960_v25  ;;  %v1519_v36 = vrot.slane %v4876_v49, 2 }
  0x83   : > { %4375 = vmatprep.mubr.msk.bf16.mxu0 %vm496_vm2, %v1501_v23  ;;  %v1510_v23 = vrot.slane %v4846_v14, 1 }
  0x84   : > { %4338 = vmatmul.mubr.msk.bf16.vlgmr.msra.gmra.mxu1 %vm496_vm2, %v4989_v26  ;;  %v5161_v26 = vld [vmem:[%s6264_s1 + $0x10] sm:$0x3] }
  0x85   : > { %4412 = vmatpush3.bf16.msra.mxu1 %v1945_v28  ;;  %4341 = vmatprep.mubr.msk.bf16.mxu1 %vm496_vm2, %v5016_v63  ;;  %v1514_v28 = vrot.slane %v4868_v41, 1  ;;  %v1512_v1 = vor.u32 %v1511_v13, %v1510_v23  ;;  %v2405_v63 = vrot.slane %v4787_v47, 3  ;;  %v1523_v23 = vrot.slane %v4897_v7, 2 }
  0x86   : > { %4573 = vmatprep.subr.msk.bf16.mxu1 %vm551_vm0, %v5141_v48  ;;  %v1520_v47 = vor.u32 %v1519_v36, %v1518_v39  ;;  %v1539_v39 = vrot.slane %v4745_v31, 2  ;;  %v4635_v36 = vmov 0  }
  0x87   : > { %v1516_v56 = vor.u32 %v1515_v43, %v1514_v28  ;;  %v1513_v24 = vsel %vm1494_vm4, %v4960_v25, %v1512_v1  ;;  %v5180_v13 = vor.u32 %v2405_v63, %v2404_v11  ;;  %v1530_v28 = vrot.slane %v4718_v18, 1  ;;  %4586 = vset.pattern.permute.xlu0 %v4635_v36  ;;  %4587 = vset.pattern.permute.xlu1 %v4635_v36  ;;  %v6328_v36 = vld [vmem:[#allocation16_spill] sm:$0xff] }
  0x88   : > { %v1531_v43 = vrot.slane %v4715_v17, 2  ;;  %v1535_v63 = vrot.slane %v4721_v19, 2 }
  0x89   : > { %v1521_v25 = vsel %vm1494_vm4, %v1516_v56, %v1520_v47 }
  0x8a   : > { %4376 = vmatmul.mubr.msk.bf16.vlgmr.msra.gmra.mxu0 %vm496_vm2, %v1505_v9  ;;  %v1522_v9 = vrot.slane %v4905_v34, 1 }
  0x8b   : > { %4450 = vmatpush3.bf16.msra.mxu0 %v2179_v55  ;;  %4379 = vmatprep.mubr.msk.bf16.mxu0 %vm496_vm2, %v1509_v45  ;;  %v1527_v55 = vrot.slane %v4912_v53, 2 }
  0x8c   : > { %4342 = vmatmul.mubr.msk.bf16.gmra.mxu1 %vm496_vm2, %v5019_v40  ;;  %4574 = vmatprep.subr.msk.bf16.mxu0 %vm551_vm0, %v5161_v26  ;;  %v1517_v40 = vsel %vm1494_vm4, %v1512_v1, %v1516_v56  ;;  %v1524_v58 = vor.u32 %v1523_v23, %v1522_v9  ;;  %v1534_v56 = vrot.slane %v4724_v20, 1  ;;  %v3064_v9 = vld [vmem:[%s6265_s2 + $0x10] sm:$0xff]  ;;  %v3063_v23 = vld [vmem:[%s6265_s2 + $0x8] sm:$0xff] }
  0x8d   : > { %4345 = vmatprep.mubr.msk.bf16.mxu1 %vm496_vm2, %v5032_v8  ;;  %v1526_v8 = vrot.slane %v4926_v3, 1  ;;  %3110 = vperm.xlu1 %4587, %v3064_v9  }
  0x8e   : > { %v1525_v45 = vsel %vm1494_vm4, %v1520_v47, %v1524_v58 }
  0x92   : > { %4380 = vmatmul.mubr.msk.bf16.gmra.mxu0 %vm496_vm2, %v1513_v24  ;;  %v1538_v24 = vrot.slane %v4764_v37, 1 }
  0x93   : > { %4383 = vmatprep.mubr.msk.bf16.mxu0 %vm496_vm2, %v1517_v40 }
  0x94   : > { %4346 = vmatmul.mubr.msk.bf16.gmra.mxu1 %vm496_vm2, %v5035_v62  ;;  %v1528_v62 = vor.u32 %v1527_v55, %v1526_v8  ;;  %v1540_v40 = vor.u32 %v1539_v39, %v1538_v24  ;;  %v1546_v8 = vrot.slane %v4827_v0, 1  ;;  %v1547_v55 = vrot.slane %v4810_v57, 2  ;;  %v6327_v24 = vld [vmem:[#allocation18_spill] sm:$0xff]  ;;  %v6356_v0 = vld [vmem:[#allocation4_spill] sm:$0xff] }
  0x95   : > { %4349 = vmatprep.mubr.msk.bf16.mxu1 %vm496_vm2, %v5048_v22  ;;  %v1532_v22 = vor.u32 %v1531_v43, %v1530_v28  ;;  %v1554_v39 = vrot.slane %v6327_v24, 1 }
  0x96   : > { %v1529_v1 = vsel %vm1494_vm4, %v1524_v58, %v1528_v62  ;;  %v1542_v58 = vrot.slane %v4796_v51, 1  ;;  %v1548_v43 = vor.u32 %v1547_v55, %v1546_v8  ;;  %v6329_v8 = vld [vmem:[#allocation21_spill] sm:$0xff] }
  0x97   : > { %v1533_v11 = vsel %vm1494_vm4, %v1528_v62, %v1532_v22  ;;  %v3067_v62 = vld [vmem:[%s6265_s2 + $0x28] sm:$0xff]  ;;  %v1558_v55 = vrot.slane %v6329_v8, 1 }
  0x9a   : > { %4384 = vmatmul.mubr.msk.bf16.gmra.mxu0 %vm496_vm2, %v1521_v25 }
  0x9b   : > { %4387 = vmatprep.mubr.msk.bf16.mxu0 %vm496_vm2, %v1525_v45  ;;  %v3065_v45 = vld [vmem:[%s6265_s2 + $0x18] sm:$0xff] }
  0x9c   : > { %4350 = vmatmul.mubr.msk.bf16.gmra.mxu1 %vm496_vm2, %v5051_v6  ;;  %v3062_v6 = vld [vmem:[%s6265_s2] sm:$0xff]  ;;  %3115 = vperm.xlu1 %4587, %v3065_v45   ;;  %v6330_v45 = vld [vmem:[#allocation19_spill] sm:$0xff] }
  0x9d   : > { %4353 = vmatprep.mubr.msk.bf16.mxu1 %vm496_vm2, %v5064_v4  ;;  %3100 = vperm.xlu0 %4586, %v3062_v6   ;;  %v1536_v4 = vor.u32 %v1535_v63, %v1534_v56  ;;  %v1550_v56 = vrot.slane %v4852_v21, 1  ;;  %v6326_v63 = vld [vmem:[#allocation14_spill] sm:$0xff]  ;;  %v1555_v6 = vrot.slane %v6328_v36, 2  ;;  %v6352_v36 = vld [vmem:[#allocation12_spill] sm:$0xff] }
  0x9f   : > { %v1537_v47 = vsel %vm1494_vm4, %v1532_v22, %v1536_v4  ;;  %v1541_v25 = vsel %vm1494_vm4, %v1536_v4, %v1540_v40  ;;  %v3068_v22 = vld [vmem:[%s6265_s2 + $0x30] sm:$0xff]  ;;  %v3069_v4 = vld [vmem:[%s6265_s2 + $0x38] sm:$0xff]  ;;  %v1556_v9 = vor.u32 %v1555_v6, %v1554_v39  ;;  %v3075_v6 = vld [vmem:[%s6265_s2 + $0x68] sm:$0xff] }
  0xa0   : > { %3125 = vperm.xlu1 %4587, %v3067_v62  }
  0xa1   : > { %3105 = vperm.xlu0 %4586, %v3063_v23   ;;  %v6295_v23 = vshrl.u32 %v4977_v30, 16 }
  0xa2   : > { %4388 = vmatmul.mubr.msk.bf16.gmra.mxu0 %vm496_vm2, %v1529_v1 }
  0xa3   : > { %4391 = vmatprep.mubr.msk.bf16.mxu0 %vm496_vm2, %v1533_v11  ;;  %v1565_v62 = vrot.slane %v6295_v23, 1 }
  0xa4   : > { %4354 = vmatmul.mubr.msk.bf16.gmra.mxu1 %vm496_vm2, %v5067_v50  ;;  %v1543_v50 = vrot.slane %v4784_v46, 2  ;;  %3135 = vperm.xlu1 %4587, %v3069_v4   ;;  %v3076_v4 = vld [vmem:[%s6265_s2 + $0x70] sm:$0xff] }
  0xa5   : > { %4357 = vmatprep.mubr.msk.bf16.mxu1 %vm496_vm2, %v5080_v54  ;;  %v3066_v54 = vld [vmem:[%s6265_s2 + $0x20] sm:$0xff] }
  0xa6   : > { %3120 = vperm.xlu0 %4586, %v3066_v54   ;;  %v1544_v28 = vor.u32 %v1543_v50, %v1542_v58  ;;  %v3071_v58 = vld [vmem:[%s6265_s2 + $0x48] sm:$0xff]  ;;  %v3072_v50 = vld [vmem:[%s6265_s2 + $0x50] sm:$0xff]  ;;  %v1559_v54 = vrot.slane %v6330_v45, 2 }
  0xa8   : > { %v1545_v1 = vsel %vm1494_vm4, %v1540_v40, %v1544_v28  ;;  %v1549_v11 = vsel %vm1494_vm4, %v1544_v28, %v1548_v43  ;;  %3145 = vperm.xlu1 %4587, %v3071_v58   ;;  %v1854_v58 = vrot.slane %v4711_v15, 2 }
  0xaa   : > { %4392 = vmatmul.mubr.msk.bf16.gmra.mxu0 %vm496_vm2, %v1537_v47  ;;  %3130 = vperm.xlu0 %4586, %v3068_v22   ;;  %v6294_v47 = vshll.u32 %v4977_v30, 16 }
  0xab   : > { %4395 = vmatprep.mubr.msk.bf16.mxu0 %vm496_vm2, %v1541_v25  ;;  %v5272_v25 = vld [vmem:[%s4689_s26 + $0x98] sm:$0xf] }
  0xac   : > { %4358 = vmatmul.mubr.msk.bf16.gmra.mxu1 %vm496_vm2, %v5083_v61  ;;  %v1551_v61 = vrot.slane %v6326_v63, 2  ;;  %v1568_v22 = vrot.slane %v6294_v47, 2 }
  0xad   : > { %4361 = vmatprep.mubr.msk.bf16.mxu1 %vm496_vm2, %v5096_v12  ;;  %v3070_v12 = vld [vmem:[%s6265_s2 + $0x40] sm:$0xff] }
  0xae   : > { %3140 = vperm.xlu0 %4586, %v3070_v12   ;;  %v1552_v40 = vor.u32 %v1551_v61, %v1550_v56  ;;  %v1560_v56 = vor.u32 %v1559_v54, %v1558_v55  ;;  %v1569_v39 = vor.u32 %v1568_v22, %v1565_v62  ;;  %v3077_v54 = vld [vmem:[%s6265_s2 + $0x78] sm:$0xff]  ;;  %v3079_v62 = vld [vmem:[%s6265_s2 + $0x88] sm:$0xff]  ;;  %v3080_v22 = vld [vmem:[%s6265_s2 + $0x90] sm:$0xff] }
  0xb0   : > { %v1557_v28 = vsel %vm1494_vm4, %v1552_v40, %v1556_v9  ;;  %v1570_v55 = vsel %vm1494_vm4, %v1560_v56, %v1569_v39 }
  0xb2   : > { %4396 = vmatmul.mubr.msk.bf16.gmra.mxu0 %vm496_vm2, %v1545_v1  ;;  %3150 = vperm.xlu0 %4586, %v3072_v50   ;;  %v5290_v1 = vcombine.low %v5272_v25, %v5272_v25 }
  0xb3   : > { %4399 = vmatprep.mubr.msk.bf16.mxu0 %vm496_vm2, %v1549_v11 }
  0xb4   : > { %4362 = vmatmul.mubr.msk.bf16.gmra.mxu1 %vm496_vm2, %v5099_v44  ;;  %v1553_v44 = vsel %vm1494_vm4, %v1548_v43, %v1552_v40  ;;  %v3074_v43 = vld [vmem:[%s6265_s2 + $0x60] sm:$0xff]  ;;  %v1572_v61 = vshrl.u32 %v5290_v1, 16  ;;  %v1575_v11 = vshll.u32 %v5290_v1, 16  ;;  %v1268_v12 = vrot.slane %v5290_v1, 1 }
  0xb5   : > { %4365 = vmatprep.mubr.msk.bf16.mxu1 %vm496_vm2, %v5111_v2  ;;  %v3073_v2 = vld [vmem:[%s6265_s2 + $0x58] sm:$0xff]  ;;  %v1853_v40 = vrot.slane %v4695_v5, 2  ;;  %v6331_v5 = vrot.slane %v4977_v30, 1 }
  0xb6   : > { %3155 = vperm.xlu1 %4587, %v3073_v2   ;;  %3160 = vperm.xlu0 %4586, %v3074_v43   ;;  %v1574_v50 = vrot.slane %v1572_v61, 1  ;;  %v1856_v2 = vrot.slane %v4737_v27, 2  ;;  %v1858_v43 = vrot.slane %v4767_v38, 2  ;;  %v3081_v61 = vld [vmem:[%s6265_s2 + $0x98] sm:$0xff]  ;;  %v2537_v27 = vsel %vm551_vm0, %v5141_v48, 0 }
  0xb7   : > { %v1269_v15 = vsel %vm950_vm3, %v6331_v5, %v1268_v12  ;;  %v1860_v48 = vrot.slane %v4799_v52, 2  ;;  %v6332_v12 = vld [vmem:[#allocation10_spill] sm:$0xff]  ;;  %v6334_v5 = vld [vmem:[#allocation17_spill] sm:$0xff] }
  0xb8   : > { %v1859_v38 = vsel %vm1852_vm5, %v1856_v2, %v1858_v43 }
  0xba   : > { %4400 = vmatmul.mubr.msk.bf16.gmra.mxu0 %vm496_vm2, %v1553_v44  ;;  %3165 = vperm.xlu1 %4587, %v3075_v6   ;;  %v1577_v44 = vrot.slane %v1575_v11, 2  ;;  %v3082_v11 = vld [vmem:[%s6265_s2 + $0xa0] sm:$0xff]  ;;  %v1857_v6 = vsel %vm1852_vm5, %v1854_v58, %v1856_v2 }
  0xbb   : > { %4403 = vmatprep.mubr.msk.bf16.mxu0 %vm496_vm2, %v1557_v28  ;;  %3170 = vperm.xlu0 %4586, %v3076_v4   ;;  %v3084_v4 = vld [vmem:[%s6265_s2 + $0xb0] sm:$0xff] }
  0xbc   : > { %4366 = vmatmul.mubr.msk.bf16.gmra.mxu1 %vm496_vm2, %v5115_v10  ;;  %v1561_v10 = vsel %vm1494_vm4, %v1556_v9, %v1560_v56  ;;  %v1855_v9 = vsel %vm1852_vm5, %v1853_v40, %v1854_v58  ;;  %v1578_v28 = vor.u32 %v1577_v44, %v1574_v50  ;;  %v1862_v40 = vrot.slane %v6332_v12, 2  ;;  %v3086_v44 = vld [vmem:[%s6265_s2 + $0xc0] sm:$0xff] }
  0xbd   : > { %4369 = vmatprep.mubr.msk.bf16.mxu1 %vm496_vm2, %v5006_v32  ;;  %v3078_v32 = vld [vmem:[%s6265_s2 + $0x80] sm:$0xff]  ;;  %v2847_v58 = vsel %vm551_vm0, %v5161_v26, 0  ;;  %v1861_v50 = vsel %vm1852_vm5, %v1858_v43, %v1860_v48  ;;  %v3087_v26 = vld [vmem:[%s6265_s2 + $0xc8] sm:$0xff] }
  0xbe   : > { %3175 = vperm.xlu1 %4587, %v3077_v54   ;;  %v1579_v56 = vsel %vm1494_vm4, %v1569_v39, %v1578_v28  ;;  %v3083_v39 = vld [vmem:[%s6265_s2 + $0xa8] sm:$0xff]  ;;  %v1863_v52 = vsel %vm1852_vm5, %v1860_v48, %v1862_v40 }
  0xbf   : > { %3180 = vperm.xlu0 %4586, %v3078_v32   ;;  %v3088_v32 = vld [vmem:[%s6265_s2 + $0xd0] sm:$0xff] }
  0xc2   : > { %4404 = vmatmul.mubr.msk.bf16.gmra.mxu0 %vm496_vm2, %v1561_v10  ;;  %3185 = vperm.xlu1 %4587, %v3079_v62   ;;  %v3085_v10 = vld [vmem:[%s6265_s2 + $0xb8] sm:$0xff]  ;;  %v3090_v62 = vld [vmem:[%s6265_s2 + $0xe0] sm:$0xff] }
  0xc3   : > { %4407 = vmatprep.mubr.msk.bf16.mxu0 %vm496_vm2, %v1570_v55  ;;  %3190 = vperm.xlu0 %4586, %v3080_v22   ;;  %v6333_v55 = vld [vmem:[#allocation13_spill] sm:$0xff] }
  0xc4   : > { %4370 = vmatmul.mubr.msk.bf16.gmra.mxu1 %vm496_vm2, %v1269_v15  ;;  %v1864_v54 = vrot.slane %v6333_v55, 2  ;;  %v1866_v15 = vrot.slane %v6334_v5, 2  ;;  %v6339_v5 = vld [vmem:[#allocation3_spill] sm:$0xff] }
  0xc5   : > { %4413 = vmatprep.mubr.msk.bf16.mxu1 %vm496_vm2, %v1855_v9  ;;  %v3089_v9 = vld [vmem:[%s6265_s2 + $0xd8] sm:$0xff] }
  0xc6   : > { %3195 = vperm.xlu1 %4587, %v3081_v61   ;;  %v1865_v28 = vsel %vm1852_vm5, %v1862_v40, %v1864_v54  ;;  %v1867_v2 = vsel %vm1852_vm5, %v1864_v54, %v1866_v15  ;;  %v3091_v61 = vld [vmem:[%s6265_s2 + $0xe8] sm:$0xff] }
  0xc7   : > { %3200 = vperm.xlu0 %4586, %v3082_v11   ;;  %v6335_v11 = vld [vmem:[#allocation20_spill] sm:$0xff] }
  0xca   : > { %4408 = vmatmul.mubr.msk.bf16.gmra.mxu0 %vm496_vm2, %v1579_v56  ;;  %3205 = vperm.xlu1 %4587, %v3083_v39  }
  0xcb   : > { %4451 = vmatprep.mubr.msk.bf16.mxu0 %vm496_vm2, %v1857_v6  ;;  %3210 = vperm.xlu0 %4586, %v3084_v4   ;;  %v6336_v4 = vld [vmem:[#allocation2_spill] sm:$0xff] }
  0xcc   : > { %4414 = vmatmul.mubr.msk.bf16.vlgmr.msra.gmra.mxu1 %vm496_vm2, %v1857_v6  ;;  %v1868_v6 = vrot.slane %v6335_v11, 2  ;;  %v1870_v48 = vrot.slane %v6336_v4, 2 }
  0xcd   : > { %4488 = vmatpush3.bf16.msra.mxu1 %v2537_v27  ;;  %4417 = vmatprep.mubr.msk.bf16.mxu1 %vm496_vm2, %v1859_v38  ;;  %v3092_v27 = vld [vmem:[%s6265_s2 + $0xf0] sm:$0xff] }
  0xce   : > { %3215 = vperm.xlu1 %4587, %v3085_v10   ;;  %v1869_v10 = vsel %vm1852_vm5, %v1866_v15, %v1868_v6  ;;  %v1872_v15 = vrot.slane %v6339_v5, 2 }
  0xcf   : > { %3220 = vperm.xlu0 %4586, %v3086_v44  }
  0xd0   : > { %v1873_v4 = vsel %vm1852_vm5, %v1870_v48, %v1872_v15 }
  0xd2   : > { %4452 = vmatmul.mubr.msk.bf16.vlgmr.msra.gmra.mxu0 %vm496_vm2, %v1859_v38  ;;  %3225 = vperm.xlu1 %4587, %v3087_v26   ;;  %v1871_v26 = vsel %vm1852_vm5, %v1868_v6, %v1870_v48  ;;  %v6345_v48 = vld [vmem:[#allocation7_spill] sm:$0xff] }
  0xd3   : > { %4526 = vmatpush3.bf16.msra.mxu0 %v2847_v58  ;;  %4455 = vmatprep.mubr.msk.bf16.mxu0 %vm496_vm2, %v1861_v50  ;;  %v3093_v58 = vld [vmem:[%s6265_s2 + $0xf8] sm:$0xff] }
  0xd4   : > { %4418 = vmatmul.mubr.msk.bf16.gmra.mxu1 %vm496_vm2, %v1861_v50  ;;  %3230 = vperm.xlu0 %4586, %v3088_v32   ;;  %v3094_v50 = vld [vmem:[%s6265_s2 + $0x100] sm:$0xff]  ;;  %v3095_v32 = vld [vmem:[%s6265_s2 + $0x108] sm:$0xff] }
  0xd5   : > { %4421 = vmatprep.mubr.msk.bf16.mxu1 %vm496_vm2, %v1863_v52 }
  0xd6   : > { %3235 = vperm.xlu1 %4587, %v3089_v9   ;;  %v3096_v9 = vld [vmem:[%s6265_s2 + $0x110] sm:$0xff] }
  0xd8   : > { %3240 = vperm.xlu0 %4586, %v3090_v62  }
  0xda   : > { %v5385_v22 = vpop.f32.mrf.mxu0  ;;  %4456 = vmatmul.mubr.msk.bf16.gmra.mxu0 %vm496_vm2, %v1863_v52  ;;  %3245 = vperm.xlu1 %4587, %v3091_v61  }
  0xdb   : > { %4459 = vmatprep.mubr.msk.bf16.mxu0 %vm496_vm2, %v1865_v28  ;;  %v5390_v43 = vpop.f32.mrf.mxu1 }
  0xdc   : > { %4422 = vmatmul.mubr.msk.bf16.gmra.mxu1 %vm496_vm2, %v1865_v28  ;;  %v5393_v56 = vpop.f32.mrf.mxu0  ;;  %3250 = vperm.xlu0 %4586, %v3092_v27   ;;  %v3097_v27 = vld [vmem:[%s6265_s2 + $0x118] sm:$0xff] }
  0xdd   : > { %4425 = vmatprep.mubr.msk.bf16.mxu1 %vm496_vm2, %v1867_v2  ;;  %v5403_v38 = vpop.f32.mrf.mxu1 }
  0xde   : > { %v5405_v39 = vpop.f32.mrf.mxu0  ;;  %3255 = vperm.xlu1 %4587, %v3093_v58  }
  0xdf   : > { %v5408_v12 = vpop.f32.mrf.mxu1 }
  0xe0   : > { %v5410_v40 = vpop.f32.mrf.mxu0  ;;  %3260 = vperm.xlu0 %4586, %v3094_v50  }
  0xe1   : > { %v5419_v44 = vpop.f32.mrf.mxu1 }
  0xe2   : > { %6337 = vst [vmem:[#allocation10_spill] sm:$0xff] %v5419_v44  ;;  %v5421_v52 = vpop.f32.mrf.mxu0  ;;  %4460 = vmatmul.mubr.msk.bf16.gmra.mxu0 %vm496_vm2, %v1867_v2  ;;  %v6341_v2 = vld [vmem:[#allocation5_spill] sm:$0xff]  ;;  %3265 = vperm.xlu1 %4587, %v3095_v32   ;;  %v2401_v44 = vrot.slane %v4758_v35, 3  ;;  %v1888_v35 = vrot.slane %v5290_v1, 2 }
  0xe3   : > { %4463 = vmatprep.mubr.msk.bf16.mxu0 %vm496_vm2, %v1869_v10  ;;  %v5426_v55 = vpop.f32.mrf.mxu1  ;;  %v1874_v61 = vrot.slane %v6341_v2, 2 }
  0xe4   : > { %6338 = vst [vmem:[#allocation13_spill] sm:$0xff] %v5426_v55  ;;  %4426 = vmatmul.mubr.msk.bf16.gmra.mxu1 %vm496_vm2, %v1869_v10  ;;  %v5429_v54 = vpop.f32.mrf.mxu0  ;;  %3270 = vperm.xlu0 %4586, %v3096_v9   ;;  %v1876_v9 = vrot.slane %v6345_v48, 2  ;;  %v6355_v55 = vld [vmem:[#allocation6_spill] sm:$0xff] }
  0xe5   : > { %4429 = vmatprep.mubr.msk.bf16.mxu1 %vm496_vm2, %v1871_v26  ;;  %v5439_v28 = vpop.f32.mrf.mxu1  ;;  %v1875_v50 = vsel %vm1852_vm5, %v1872_v15, %v1874_v61  ;;  %v2397_v57 = vrot.slane %v6355_v55, 2 }
  0xe6   : > { %6340 = vst [vmem:[#allocation17_spill] sm:$0xff] %v5439_v28  ;;  %v5441_v62 = vpop.f32.mrf.mxu0  ;;  %3275 = vperm.xlu1 %4587, %v3097_v27   ;;  %v1877_v45 = vsel %vm1852_vm5, %v1874_v61, %v1876_v9  ;;  %v1880_v61 = vrot.slane %v4819_v60, 2 }
  0xe7   : > { %v5444_v11 = vpop.f32.mrf.mxu1 }
  0xe8   : > { %6342 = vst [vmem:[#allocation20_spill] sm:$0xff] %v5444_v11  ;;  %v5446_v6 = vpop.f32.mrf.mxu0 }
  0xe9   : > { %v5452_v58 = vpop.f32.mrf.mxu1 }
  0xea   : > { %6343 = vst [vmem:[#allocation2_spill] sm:$0xff] %v5452_v58  ;;  %v5454_v10 = vpop.f32.mrf.mxu0  ;;  %4464 = vmatmul.mubr.msk.bf16.gmra.mxu0 %vm496_vm2, %v1871_v26  ;;  %v6347_v26 = vld [vmem:[#allocation8_spill] sm:$0xff]  ;;  %v249_v58 = vld [vmem:[%s4689_s26 + $0x9c] sm:$0xf] }
  0xeb   : > { %4467 = vmatprep.mubr.msk.bf16.mxu0 %vm496_vm2, %v1873_v4  ;;  %v5459_v32 = vpop.f32.mrf.mxu1  ;;  %v1878_v23 = vrot.slane %v6347_v26, 2 }
  0xec   : > { %6344 = vst [vmem:[#allocation3_spill] sm:$0xff] %v5459_v32  ;;  %4430 = vmatmul.mubr.msk.bf16.gmra.mxu1 %vm496_vm2, %v1873_v4  ;;  %v5462_v5 = vpop.f32.mrf.mxu0 }
  0xed   : > { %4433 = vmatprep.mubr.msk.bf16.mxu1 %vm496_vm2, %v1875_v50  ;;  %v5466_v2 = vpop.f32.mrf.mxu1  ;;  %v1879_v48 = vsel %vm1852_vm5, %v1876_v9, %v1878_v23 }
  0xee   : > { %6346 = vst [vmem:[#allocation5_spill] sm:$0xff] %v5466_v2  ;;  %v5468_v47 = vpop.f32.mrf.mxu0 }
  0xef   : > { %v5471_v15 = vpop.f32.mrf.mxu1 }
  0xf0   : > { %6348 = vst [vmem:[#allocation7_spill] sm:$0xff] %v5471_v15  ;;  %v5473_v27 = vpop.f32.mrf.mxu0 }
  0xf1   : > { %v5476_v8 = vpop.f32.mrf.mxu1 }
  0xf2   : > { %6349 = vst [vmem:[#allocation8_spill] sm:$0xff] %v5476_v8  ;;  %v5478_v4 = vpop.f32.mrf.mxu0  ;;  %4468 = vmatmul.mubr.msk.bf16.gmra.mxu0 %vm496_vm2, %v1875_v50  ;;  %v1882_v50 = vrot.slane %v6352_v36, 2 }
  0xf3   : > { %4471 = vmatprep.mubr.msk.bf16.mxu0 %vm496_vm2, %v1877_v45  ;;  %v5483_v2 = vpop.f32.mrf.mxu1 }
  0xf4   : > { %6350 = vst [vmem:[#allocation23_spill] sm:$0xff] %v5483_v2  ;;  %4434 = vmatmul.mubr.msk.bf16.gmra.mxu1 %vm496_vm2, %v1877_v45  ;;  %v5486_v26 = vpop.f32.mrf.mxu0  ;;  %v1881_v2 = vsel %vm1852_vm5, %v1878_v23, %v1880_v61  ;;  %v1883_v60 = vsel %vm1852_vm5, %v1880_v61, %v1882_v50  ;;  %v1884_v23 = vrot.slane %v4861_v33, 2 }
  0xf5   : > { %4437 = vmatprep.mubr.msk.bf16.mxu1 %vm496_vm2, %v1879_v48  ;;  %v5490_v15 = vpop.f32.mrf.mxu1 }
  0xf6   : > { %6351 = vst [vmem:[#allocation24_spill] sm:$0xff] %v5490_v15  ;;  %v5492_v8 = vpop.f32.mrf.mxu0 }
  0xf7   : > { %v5495_v9 = vpop.f32.mrf.mxu1 }
  0xf8   : > { %6353 = vst [vmem:[#allocation12_spill] sm:$0xff] %v5495_v9  ;;  %v5497_v24 = vpop.f32.mrf.mxu0 }
  0xf9   : > { %v5500_v45 = vpop.f32.mrf.mxu1 }
  0xfa   : > { %6354 = vst [vmem:[#allocation25_spill] sm:$0xff] %v5500_v45  ;;  %v5502_v32 = vpop.f32.mrf.mxu0  ;;  %4472 = vmatmul.mubr.msk.bf16.gmra.mxu0 %vm496_vm2, %v1879_v48  ;;  %v1886_v45 = vrot.slane %v4977_v30, 2 }
  0xfb   : > { %4475 = vmatprep.mubr.msk.bf16.mxu0 %vm496_vm2, %v1881_v2  ;;  %v4263_v15 = vpop.f32.mrf.mxu1 }
  0xfc   : > { %4438 = vmatmul.mubr.msk.bf16.gmra.mxu1 %vm496_vm2, %v1881_v2  ;;  %v5508_v36 = vpop.f32.mrf.mxu0  ;;  %v814_v9 = vadd.f32 %v4263_v15, %v5385_v22  ;;  %v5521_v2 = vcombine.low %v5272_v25, %v249_v58  ;;  %v1885_v15 = vsel %vm1852_vm5, %v1882_v50, %v1884_v23  ;;  %v1887_v33 = vsel %vm1852_vm5, %v1884_v23, %v1886_v45  ;;  %v5546_v23 = vld [vmem:[%s4689_s26 + $0xa0] ss:$0 sps:$4 sm:$0xff]  }
  0xfd   : > { %4441 = vmatprep.mubr.msk.bf16.mxu1 %vm496_vm2, %v1883_v60  ;;  %v805_v11 = vpop.f32.mrf.mxu1  ;;  %v1889_v1 = vsel %vm1852_vm5, %v1886_v45, %v1888_v35  ;;  %v4612_v35 = vld [vmem:[%s4689_s26 + $0x18] sm:$0xff]  }
  0xfe   : > { %v5515_v48 = vpop.f32.mrf.mxu0  ;;  %v806_v61 = vadd.f32 %v805_v11, %v5393_v56  ;;  %v2398_v56 = vrot.slane %v6356_v0, 3  ;;  %v2400_v11 = vrot.slane %v4773_v42, 2  ;;  %v2168_v50 = vrot.slane %v5521_v2, 2 }
  0xff   : > { %v4264_v28 = vpop.f32.mrf.mxu1 }
 0x100   : > { %v5518_v63 = vpop.f32.mrf.mxu0  ;;  %v817_v22 = vadd.f32 %v4264_v28, %v5405_v39 }
 0x101   : > { %v808_v21 = vpop.f32.mrf.mxu1 }
 0x102   : > { %v4301_v30 = vpop.f32.mrf.mxu0  ;;  %4476 = vmatmul.mubr.msk.bf16.gmra.mxu0 %vm496_vm2, %v1883_v60  ;;  %v809_v25 = vadd.f32 %v808_v21, %v5410_v40  ;;  %v2402_v40 = vor.u32 %v2401_v44, %v2400_v11 }
 0x103   : > { %v5532_v58 = vadd.f32 %v4301_v30, %v814_v9  ;;  %4479 = vmatprep.mubr.msk.bf16.mxu0 %vm496_vm2, %v1885_v15  ;;  %v2399_v30 = vor.u32 %v2398_v56, %v2397_v57  ;;  %v2409_v56 = vrot.slane %v4816_v59, 3 }
 0x104   : > { %v4267_v39 = vpop.f32.mrf.mxu1  ;;  %4442 = vmatmul.mubr.msk.bf16.gmra.mxu1 %vm496_vm2, %v1885_v15  ;;  %v1079_v28 = vpop.f32.mrf.mxu0 }
 0x105   : > { %6357 = vst [vmem:[#allocation6_spill] sm:$0xff] %v5532_v58  ;;  %v830_v55 = vadd.f32 %v4267_v39, %v5421_v52  ;;  %v5538_v0 = vadd.f32 %v1079_v28, %v806_v61  ;;  %4445 = vmatprep.mubr.msk.bf16.mxu1 %vm496_vm2, %v1887_v33  ;;  %v2169_v52 = vsel %vm1852_vm5, %v1886_v45, %v2168_v50 }
 0x106   : > { %v821_v42 = vpop.f32.mrf.mxu1  ;;  %v4302_v21 = vpop.f32.mrf.mxu0 }
 0x107   : > { %v822_v9 = vadd.f32 %v821_v42, %v5429_v54  ;;  %v5543_v60 = vadd.f32 %v4302_v21, %v817_v22  ;;  %v2403_v54 = vsel %vm2396_vm6, %v2399_v30, %v2402_v40  ;;  %v2408_v22 = vrot.slane %v4846_v14, 2 }
 0x108   : > { %v4268_v15 = vpop.f32.mrf.mxu1  ;;  %v1082_v58 = vpop.f32.mrf.mxu0  ;;  %v2756_v42 = vrot.slane %v4612_v35, 3 }
 0x109   : > { %v833_v61 = vadd.f32 %v4268_v15, %v5441_v62  ;;  %v5550_v39 = vadd.f32 %v1082_v58, %v809_v25  ;;  %v2170_v62 = vrot.slane %v5546_v23, 2  ;;  %v4611_v58 = vld [vmem:[%s4689_s26 + $0x10] sm:$0xff]  }
 0x10a   : > { %v824_v57 = vpop.f32.mrf.mxu1  ;;  %v4305_v44 = vpop.f32.mrf.mxu0  ;;  %4480 = vmatmul.mubr.msk.bf16.gmra.mxu0 %vm496_vm2, %v1887_v33  ;;  %v2755_v33 = vrot.slane %v4611_v58, 3 }
 0x10b   : > { %v825_v11 = vadd.f32 %v824_v57, %v5446_v6  ;;  %v5558_v28 = vadd.f32 %v4305_v44, %v830_v55  ;;  %4483 = vmatprep.mubr.msk.bf16.mxu0 %vm496_vm2, %v2169_v52  ;;  %v2410_v55 = vor.u32 %v2409_v56, %v2408_v22  ;;  %v2171_v52 = vsel %vm1852_vm5, %v2168_v50, %v2170_v62 }
 0x10c   : > { %v4271_v45 = vpop.f32.mrf.mxu1  ;;  %4446 = vmatmul.mubr.msk.bf16.gmra.mxu1 %vm496_vm2, %v1889_v1  ;;  %v1095_v25 = vpop.f32.mrf.mxu0  ;;  %v2757_v44 = vsel %vm2754_vm7, %v2755_v33, %v2756_v42  ;;  %v2416_v56 = vrot.slane %v4901_v29, 2  ;;  %v4614_v33 = vld [vmem:[%s4689_s26 + $0x28] sm:$0xff]  }
 0x10d   : > { %v846_v14 = vadd.f32 %v4271_v45, %v5454_v10  ;;  %v5566_v21 = vadd.f32 %v1095_v25, %v822_v9  ;;  %4489 = vmatprep.mubr.msk.bf16.mxu1 %vm496_vm2, %v2403_v54  ;;  %v2412_v10 = vrot.slane %v4868_v41, 2  ;;  %v2413_v9 = vrot.slane %v4849_v16, 3 }
 0x10e   : > { %v837_v59 = vpop.f32.mrf.mxu1  ;;  %v4306_v6 = vpop.f32.mrf.mxu0  ;;  %v2411_v50 = vsel %vm2396_vm6, %v5180_v13, %v2410_v55  ;;  %v2417_v41 = vrot.slane %v4876_v49, 3  ;;  %v2760_v35 = vrot.slane %v4614_v33, 3 }
 0x10f   : > { %v838_v30 = vadd.f32 %v837_v59, %v5462_v5  ;;  %v5570_v15 = vadd.f32 %v4306_v6, %v833_v61  ;;  %v2407_v5 = vsel %vm2396_vm6, %v2402_v40, %v5180_v13  ;;  %v2414_v58 = vor.u32 %v2413_v9, %v2412_v10 }
 0x110   : > { %v4272_v1 = vpop.f32.mrf.mxu1  ;;  %v1098_v57 = vpop.f32.mrf.mxu0  ;;  %v2420_v9 = vrot.slane %v4905_v34, 2  ;;  %v4615_v34 = vld [vmem:[%s4689_s26 + $0x30] sm:$0xff]  }
 0x111   : > { %v849_v54 = vadd.f32 %v4272_v1, %v5468_v47  ;;  %v5577_v45 = vadd.f32 %v1098_v57, %v825_v11  ;;  %v4613_v11 = vld [vmem:[%s4689_s26 + $0x20] sm:$0xff]  }
 0x112   : > { %v840_v61 = vpop.f32.mrf.mxu1  ;;  %v4309_v22 = vpop.f32.mrf.mxu0  ;;  %4484 = vmatmul.mubr.msk.bf16.gmra.mxu0 %vm496_vm2, %v2171_v52  ;;  %v2758_v40 = vrot.slane %v4613_v11, 3 }
 0x113   : > { %v841_v16 = vadd.f32 %v840_v61, %v5473_v27  ;;  %v5587_v47 = vadd.f32 %v4309_v22, %v846_v14  ;;  %4527 = vmatprep.mubr.msk.bf16.mxu0 %vm496_vm2, %v2757_v44  ;;  %v2418_v14 = vor.u32 %v2417_v41, %v2416_v56  ;;  %v2415_v44 = vsel %vm2396_vm6, %v2410_v55, %v2414_v58  ;;  %v4616_v41 = vld [vmem:[%s4689_s26 + $0x38] sm:$0xff]  }
 0x114   : > { %v4275_v62 = vpop.f32.mrf.mxu1  ;;  %4490 = vmatmul.mubr.msk.bf16.vlgmr.msra.gmra.mxu1 %vm496_vm2, %v2407_v5  ;;  %v1111_v25 = vpop.f32.mrf.mxu0  ;;  %v2759_v52 = vsel %vm2754_vm7, %v2756_v42, %v2758_v40  ;;  %v2424_v61 = vrot.slane %v4926_v3, 2  ;;  %v2425_v55 = vrot.slane %v4912_v53, 3 }
 0x115   : > { %v862_v13 = vadd.f32 %v4275_v62, %v5478_v4  ;;  %v5594_v29 = vadd.f32 %v1111_v25, %v838_v30  ;;  %4493 = vmatprep.mubr.msk.bf16.mxu1 %vm496_vm2, %v2411_v50  ;;  %v2761_v4 = vsel %vm2754_vm7, %v2758_v40, %v2760_v35  ;;  %v2419_v42 = vsel %vm2396_vm6, %v2414_v58, %v2418_v14 }
 0x116   : > { %v853_v49 = vpop.f32.mrf.mxu1  ;;  %v4310_v27 = vpop.f32.mrf.mxu0  ;;  %v2762_v50 = vrot.slane %v4615_v34, 3  ;;  %v2426_v62 = vor.u32 %v2425_v55, %v2424_v61 }
 0x117   : > { %v854_v59 = vadd.f32 %v853_v49, %v5486_v26  ;;  %v5598_v6 = vadd.f32 %v4310_v27, %v849_v54  ;;  %v2421_v26 = vrot.slane %v4897_v7, 3 }
 0x118   : > { %v4276_v1 = vpop.f32.mrf.mxu1  ;;  %v1114_v57 = vpop.f32.mrf.mxu0  ;;  %v2763_v33 = vsel %vm2754_vm7, %v2760_v35, %v2762_v50 }
 0x119   : > { %v865_v30 = vadd.f32 %v4276_v1, %v5492_v8  ;;  %v5604_v10 = vadd.f32 %v1114_v57, %v841_v16  ;;  %v2764_v16 = vrot.slane %v4616_v41, 3  ;;  %v2422_v53 = vor.u32 %v2421_v26, %v2420_v9 }
 0x11a   : > { %v856_v54 = vpop.f32.mrf.mxu1  ;;  %v4313_v5 = vpop.f32.mrf.mxu0  ;;  %4528 = vmatmul.mubr.msk.bf16.vlgmr.msra.gmra.mxu0 %vm496_vm2, %v2759_v52 }
 0x11b   : > { %v857_v22 = vadd.f32 %v856_v54, %v5497_v24  ;;  %v5613_v8 = vadd.f32 %v4313_v5, %v862_v13  ;;  %4531 = vmatprep.mubr.msk.bf16.mxu0 %vm496_vm2, %v2761_v4  ;;  %v2765_v27 = vsel %vm2754_vm7, %v2762_v50, %v2764_v16  ;;  %v2423_v57 = vsel %vm2396_vm6, %v2418_v14, %v2422_v53  ;;  %v4618_v5 = vld [vmem:[%s4689_s26 + $0x48] sm:$0xff]  }
 0x11c   : > { %v4279_v56 = vpop.f32.mrf.mxu1  ;;  %4494 = vmatmul.mubr.msk.bf16.gmra.mxu1 %vm496_vm2, %v2415_v44  ;;  %v1127_v7 = vpop.f32.mrf.mxu0  ;;  %v2427_v35 = vsel %vm2396_vm6, %v2422_v53, %v2426_v62  ;;  %v2432_v4 = vrot.slane %v4724_v20, 2  ;;  %v2436_v53 = vrot.slane %v4764_v37, 2  ;;  %v4619_v37 = vld [vmem:[%s4689_s26 + $0x50] sm:$0xff]  }
 0x11d   : > { %v878_v11 = vadd.f32 %v4279_v56, %v5502_v32  ;;  %v5620_v40 = vadd.f32 %v1127_v7, %v854_v59  ;;  %4497 = vmatprep.mubr.msk.bf16.mxu1 %vm496_vm2, %v2419_v42  ;;  %v2428_v32 = vrot.slane %v4718_v18, 2  ;;  %v2429_v59 = vrot.slane %v4715_v17, 3 }
 0x11e   : > { %v869_v3 = vpop.f32.mrf.mxu1  ;;  %v4314_v24 = vpop.f32.mrf.mxu0  ;;  %v2768_v42 = vrot.slane %v4618_v5, 3  ;;  %v6361_v5 = vld [vmem:[#allocation13_spill] sm:$0xff] }
 0x11f   : > { %v870_v25 = vadd.f32 %v869_v3, %v5508_v36  ;;  %v5624_v58 = vadd.f32 %v4314_v24, %v865_v30  ;;  %v2433_v30 = vrot.slane %v4721_v19, 3  ;;  %v2430_v54 = vor.u32 %v2429_v59, %v2428_v32  ;;  %v4620_v32 = vld [vmem:[%s4689_s26 + $0x58] sm:$0xff]  }
 0x120   : > { %v4280_v13 = vpop.f32.mrf.mxu1  ;;  %v1130_v49 = vpop.f32.mrf.mxu0  ;;  %v2437_v3 = vrot.slane %v4745_v31, 3  ;;  %v2772_v59 = vrot.slane %v4620_v32, 3 }
 0x121   : > { %v881_v52 = vadd.f32 %v4280_v13, %v5515_v48  ;;  %v5631_v1 = vadd.f32 %v1130_v49, %v857_v22  ;;  %v4617_v48 = vld [vmem:[%s4689_s26 + $0x40] sm:$0xff]   ;;  %v2431_v56 = vsel %vm2396_vm6, %v2426_v62, %v2430_v54  ;;  %v2441_v62 = vrot.slane %v4784_v46, 3 }
 0x122   : > { %v872_v36 = vpop.f32.mrf.mxu1  ;;  %v4317_v44 = vpop.f32.mrf.mxu0  ;;  %4532 = vmatmul.mubr.msk.bf16.gmra.mxu0 %vm496_vm2, %v2763_v33  ;;  %v2766_v9 = vrot.slane %v4617_v48, 3  ;;  %v2440_v33 = vrot.slane %v4796_v51, 2  ;;  %v2770_v49 = vrot.slane %v4619_v37, 3  ;;  %v2438_v46 = vor.u32 %v2437_v3, %v2436_v53  ;;  %v6364_v3 = vld [vmem:[#allocation17_spill] sm:$0xff]  ;;  %v4622_v37 = vld [vmem:[%s4689_s26 + $0x68] sm:$0xff]  }
 0x123   : > { %v873_v18 = vadd.f32 %v872_v36, %v5518_v63  ;;  %v5639_v17 = vadd.f32 %v4317_v44, %v878_v11  ;;  %4535 = vmatprep.mubr.msk.bf16.mxu0 %vm496_vm2, %v2765_v27  ;;  %v2434_v63 = vor.u32 %v2433_v30, %v2432_v4  ;;  %v6358_v44 = vld [vmem:[#allocation10_spill] sm:$0xff] }
 0x124   : > { %v4283_v14 = vpop.f32.mrf.mxu1  ;;  %4498 = vmatmul.mubr.msk.bf16.gmra.mxu1 %vm496_vm2, %v2423_v57  ;;  %v1143_v26 = vpop.f32.mrf.mxu0  ;;  %v2767_v22 = vsel %vm2754_vm7, %v2764_v16, %v2766_v9  ;;  %v2769_v7 = vsel %vm2754_vm7, %v2766_v9, %v2768_v42  ;;  %v2442_v36 = vor.u32 %v2441_v62, %v2440_v33  ;;  %v2771_v30 = vsel %vm2754_vm7, %v2768_v42, %v2770_v49 }
 0x125   : > { %v5645_v61 = vadd.f32 %v1143_v26, %v870_v25  ;;  %4501 = vmatprep.mubr.msk.bf16.mxu1 %vm496_vm2, %v2427_v35  ;;  %v894_v41 = vadd.f32 %v4283_v14, %v5390_v43  ;;  %v2435_v16 = vsel %vm2396_vm6, %v2430_v54, %v2434_v63  ;;  %v2773_v9 = vsel %vm2754_vm7, %v2770_v49, %v2772_v59  ;;  %v6360_v26 = vld [vmem:[#allocation9_spill] sm:$0xff] }
 0x126   : > { %v885_v19 = vpop.f32.mrf.mxu1  ;;  %v4318_v20 = vpop.f32.mrf.mxu0  ;;  %v2445_v54 = vrot.slane %v6360_v26, 3  ;;  %v2443_v42 = vsel %vm2396_vm6, %v2438_v46, %v2442_v36  ;;  %v2776_v49 = vrot.slane %v4622_v37, 3  ;;  %v4624_v37 = vld [vmem:[%s4689_s26 + $0x78] sm:$0xff]  }
 0x127   : > { %v5648_v55 = vadd.f32 %v4318_v20, %v881_v52  ;;  %v886_v13 = vadd.f32 %v885_v19, %v5403_v38 }
 0x128   : > { %v4284_v34 = vpop.f32.mrf.mxu1  ;;  %v1146_v50 = vpop.f32.mrf.mxu0 }
 0x129   : > { %v5654_v11 = vadd.f32 %v1146_v50, %v873_v18  ;;  %v897_v52 = vadd.f32 %v4284_v34, %v5408_v12  ;;  %v6359_v12 = vld [vmem:[#allocation11_spill] sm:$0xff] }
 0x12a   : > { %v888_v24 = vpop.f32.mrf.mxu1  ;;  %v4321_v25 = vpop.f32.mrf.mxu0  ;;  %4536 = vmatmul.mubr.msk.bf16.gmra.mxu0 %vm496_vm2, %v2767_v22  ;;  %v2444_v14 = vrot.slane %v6359_v12, 2  ;;  %v2439_v22 = vsel %vm2396_vm6, %v2434_v63, %v2438_v46 }
 0x12b   : > { %v5663_v43 = vadd.f32 %v4321_v25, %v894_v41  ;;  %4539 = vmatprep.mubr.msk.bf16.mxu0 %vm496_vm2, %v2769_v7  ;;  %v889_v35 = vadd.f32 %v888_v24, %v6358_v44  ;;  %v6363_v41 = vld [vmem:[#allocation14_spill] sm:$0xff] }
 0x12c   : > { %v4287_v27 = vpop.f32.mrf.mxu1  ;;  %4502 = vmatmul.mubr.msk.bf16.gmra.mxu1 %vm496_vm2, %v2431_v56  ;;  %v1159_v31 = vpop.f32.mrf.mxu0  ;;  %v6362_v56 = vld [vmem:[#allocation15_spill] sm:$0xff]  ;;  %v2449_v53 = vrot.slane %v6363_v41, 3 }
 0x12d   : > { %v5670_v57 = vadd.f32 %v1159_v31, %v886_v13  ;;  %4505 = vmatprep.mubr.msk.bf16.mxu1 %vm496_vm2, %v2435_v16  ;;  %v910_v19 = vadd.f32 %v4287_v27, %v6361_v5  ;;  %v2448_v7 = vrot.slane %v6362_v56, 2  ;;  %v4621_v16 = vld [vmem:[%s4689_s26 + $0x60] sm:$0xff]   ;;  %v2446_v13 = vor.u32 %v2445_v54, %v2444_v14  ;;  %v6365_v27 = vld [vmem:[#allocation20_spill] sm:$0xff]  ;;  %v6367_v14 = vld [vmem:[#allocation3_spill] sm:$0xff] }
 0x12e   : > { %v901_v51 = vpop.f32.mrf.mxu1  ;;  %v4322_v38 = vpop.f32.mrf.mxu0  ;;  %v2774_v33 = vrot.slane %v4621_v16, 3  ;;  %v6368_v5 = vld [vmem:[#allocation18_spill] sm:$0xff]  ;;  %v6370_v56 = vld [vmem:[#allocation21_spill] sm:$0xff]  ;;  %v4623_v16 = vld [vmem:[%s4689_s26 + $0x70] sm:$0xff]  }
 0x12f   : > { %v5674_v4 = vadd.f32 %v4322_v38, %v897_v52  ;;  %v902_v24 = vadd.f32 %v901_v51, %v6364_v3  ;;  %v2450_v51 = vor.u32 %v2449_v53, %v2448_v7  ;;  %v6366_v38 = vld [vmem:[#allocation2_spill] sm:$0xff]  ;;  %v2447_v12 = vsel %vm2396_vm6, %v2442_v36, %v2446_v13  ;;  %v6371_v36 = vld [vmem:[#allocation19_spill] sm:$0xff]  ;;  %v6372_v53 = vld [vmem:[#allocation5_spill] sm:$0xff] }
 0x130   : > { %v4288_v18 = vpop.f32.mrf.mxu1  ;;  %v1162_v48 = vpop.f32.mrf.mxu0  ;;  %v2456_v7 = vrot.slane %v6370_v56, 2  ;;  %v2457_v41 = vrot.slane %v6371_v36, 3  ;;  %v6378_v36 = vld [vmem:[#allocation23_spill] sm:$0xff] }
 0x131   : > { %v5681_v20 = vadd.f32 %v1162_v48, %v889_v35  ;;  %v913_v31 = vadd.f32 %v4288_v18, %v6365_v27  ;;  %v2777_v18 = vsel %vm2754_vm7, %v2774_v33, %v2776_v49  ;;  %v2780_v27 = vrot.slane %v4624_v37, 3  ;;  %v6379_v37 = vld [vmem:[#allocation24_spill] sm:$0xff] }
 0x132   : > { %v904_v34 = vpop.f32.mrf.mxu1  ;;  %v4325_v50 = vpop.f32.mrf.mxu0  ;;  %4540 = vmatmul.mubr.msk.bf16.gmra.mxu0 %vm496_vm2, %v2771_v30  ;;  %v2775_v30 = vsel %vm2754_vm7, %v2772_v59, %v2774_v33  ;;  %v2451_v59 = vsel %vm2396_vm6, %v2446_v13, %v2450_v51  ;;  %v2778_v33 = vrot.slane %v4623_v16, 3 }
 0x133   : > { %v5689_v25 = vadd.f32 %v4325_v50, %v910_v19  ;;  %4543 = vmatprep.mubr.msk.bf16.mxu0 %vm496_vm2, %v2773_v9  ;;  %v905_v44 = vadd.f32 %v904_v34, %v6366_v38  ;;  %v2452_v19 = vrot.slane %v6368_v5, 2 }
 0x134   : > { %v4291_v63 = vpop.f32.mrf.mxu1  ;;  %4506 = vmatmul.mubr.msk.bf16.gmra.mxu1 %vm496_vm2, %v2439_v22  ;;  %v1175_v62 = vpop.f32.mrf.mxu0  ;;  %v6369_v22 = vld [vmem:[#allocation16_spill] sm:$0xff]  ;;  %v2779_v5 = vsel %vm2754_vm7, %v2776_v49, %v2778_v33 }
 0x135   : > { %v5696_v32 = vadd.f32 %v1175_v62, %v902_v24  ;;  %4509 = vmatprep.mubr.msk.bf16.mxu1 %vm496_vm2, %v2443_v42  ;;  %v926_v26 = vadd.f32 %v4291_v63, %v6367_v14  ;;  %v2453_v34 = vrot.slane %v6369_v22, 3  ;;  %v6374_v14 = vld [vmem:[#allocation8_spill] sm:$0xff] }
 0x136   : > { %v917_v52 = vpop.f32.mrf.mxu1  ;;  %v4326_v46 = vpop.f32.mrf.mxu0 }
 0x137   : > { %v5700_v35 = vadd.f32 %v4326_v46, %v913_v31  ;;  %v918_v3 = vadd.f32 %v917_v52, %v6372_v53  ;;  %v6373_v31 = vld [vmem:[#allocation7_spill] sm:$0xff]  ;;  %v2454_v38 = vor.u32 %v2453_v34, %v2452_v19 }
 0x138   : > { %v4292_v48 = vpop.f32.mrf.mxu1  ;;  %v1178_v9 = vpop.f32.mrf.mxu0 }
 0x139   : > { %v5706_v54 = vadd.f32 %v1178_v9, %v905_v44  ;;  %v929_v13 = vadd.f32 %v4292_v48, %v6373_v31  ;;  %v2465_v9 = vshrl.u32 %v5521_v2, 16 }
 0x13a   : > { %v920_v50 = vpop.f32.mrf.mxu1  ;;  %v4329_v42 = vpop.f32.mrf.mxu0  ;;  %4544 = vmatmul.mubr.msk.bf16.gmra.mxu0 %vm496_vm2, %v2775_v30  ;;  %v2458_v30 = vor.u32 %v2457_v41, %v2456_v7 }
 0x13b   : > { %v5715_v24 = vadd.f32 %v4329_v42, %v926_v26  ;;  %4547 = vmatprep.mubr.msk.bf16.mxu0 %vm496_vm2, %v2777_v18  ;;  %v2468_v18 = vshll.u32 %v5521_v2, 16  ;;  %v921_v26 = vadd.f32 %v920_v50, %v6374_v14  ;;  %v2781_v42 = vsel %vm2754_vm7, %v2778_v33, %v2780_v27 }
 0x13c   : > { %v4295_v63 = vpop.f32.mrf.mxu1  ;;  %4510 = vmatmul.mubr.msk.bf16.gmra.mxu1 %vm496_vm2, %v2447_v12  ;;  %v1191_v62 = vpop.f32.mrf.mxu0  ;;  %v2455_v50 = vsel %vm2396_vm6, %v2450_v51, %v2454_v38  ;;  %v2459_v16 = vsel %vm2396_vm6, %v2454_v38, %v2458_v30  ;;  %v2467_v33 = vrot.slane %v2465_v9, 2  ;;  %v6380_v38 = vld [vmem:[#allocation12_spill] sm:$0xff] }
 0x13d   : > { %v5722_v46 = vadd.f32 %v1191_v62, %v918_v3  ;;  %4513 = vmatprep.mubr.msk.bf16.mxu1 %vm496_vm2, %v2451_v59  ;;  %v6375_v59 = vld [vmem:[#allocation22_spill] sm:$0xff]  ;;  %v942_v41 = vadd.f32 %v4295_v63, %v6378_v36  ;;  %v2470_v62 = vrot.slane %v2468_v18, 3 }
 0x13e   : > { %v933_v52 = vpop.f32.mrf.mxu1  ;;  %v4330_v44 = vpop.f32.mrf.mxu0  ;;  %v6376_v19 = vshrl.u32 %v6375_v59, 16  ;;  %v6377_v56 = vshll.u32 %v6375_v59, 16  ;;  %v4625_v63 = vld [vmem:[%s4689_s26 + $0x80] sm:$0xff]  }
 0x13f   : > { %v5728_v12 = vadd.f32 %v4330_v44, %v929_v13  ;;  %v934_v31 = vadd.f32 %v933_v52, %v6379_v37  ;;  %v2782_v44 = vrot.slane %v4625_v63, 3  ;;  %v6381_v18 = vld [vmem:[#allocation6_spill] sm:$0xff] }
 0x140   : > { %v4296_v22 = vpop.f32.mrf.mxu1  ;;  %v1194_v48 = vpop.f32.mrf.mxu0  ;;  %v2460_v34 = vrot.slane %v6376_v19, 2  ;;  %v2461_v7 = vrot.slane %v6377_v56, 3 }
 0x141   : > { %v5737_v53 = vadd.f32 %v1194_v48, %v921_v26  ;;  %v4626_v48 = vld [vmem:[%s4689_s26 + $0x88] sm:$0xff]   ;;  %v945_v9 = vadd.f32 %v4296_v22, %v6380_v38  ;;  %v2783_v63 = vsel %vm2754_vm7, %v2780_v27, %v2782_v44  ;;  %s4576_s26 = smul.u32 144, %s6390_s16 }
 0x142   : > { %v936_v3 = vpop.f32.mrf.mxu1  ;;  %v4333_v49 = vpop.f32.mrf.mxu0  ;;  %4548 = vmatmul.mubr.msk.bf16.gmra.mxu0 %vm496_vm2, %v2779_v5  ;;  %v2462_v26 = vor.u32 %v2461_v7, %v2460_v34  ;;  %v2784_v19 = vrot.slane %v4626_v48, 3  ;;  %v2474_v5 = vshrl.u32 %v5546_v23, 16 }
 0x143   : > { %v5743_v13 = vadd.f32 %v4333_v49, %v942_v41  ;;  %4551 = vmatprep.mubr.msk.bf16.mxu0 %vm496_vm2, %v2781_v42  ;;  %v2477_v42 = vshll.u32 %v5546_v23, 16  ;;  %v2471_v49 = vor.u32 %v2470_v62, %v2467_v33  ;;  %s6021_s20 = scalar_lea.vmem %s6266_s3, %s4576_s26 }
 0x144   : > { %v4339_v14 = vpop.f32.mrf.mxu1  ;;  %4514 = vmatmul.mubr.msk.bf16.gmra.mxu1 %vm496_vm2, %v2455_v50  ;;  %v1207_v51 = vpop.f32.mrf.mxu0  ;;  %v6382_v50 = vld [vmem:[#allocation25_spill] sm:$0xff]  ;;  %v2476_v38 = vrot.slane %v2474_v5, 2  ;;  %v2788_v5 = vrot.slane %v5521_v2, 3 }
 0x145   : > { %v1458_v56 = vadd.f32 %v4339_v14, %v6381_v18  ;;  %v5752_v52 = vadd.f32 %v1207_v51, %v934_v31  ;;  %4517 = vmatprep.mubr.msk.bf16.mxu1 %vm496_vm2, %v2459_v16  ;;  %v937_v37 = vadd.f32 %v936_v3, %v6382_v50  ;;  %v2463_v31 = vsel %vm2396_vm6, %v2458_v30, %v2462_v26 }
 0x146   : > { %v1313_v36 = vpop.f32.mrf.mxu1  ;;  %v4334_v41 = vpop.f32.mrf.mxu0  ;;  %v2785_v14 = vsel %vm2754_vm7, %v2782_v44, %v2784_v19  ;;  %v2479_v33 = vrot.slane %v2477_v42, 3  ;;  %v2786_v30 = vrot.slane %v6375_v59, 3 }
 0x147   : > { %v1456_v34 = vadd.f32 %v1313_v36, %v5538_v0  ;;  %v5758_v7 = vadd.f32 %v4334_v41, %v945_v9  ;;  %v2472_v0 = vsel %vm2396_vm6, %v2462_v26, %v2471_v49 }
 0x148   : > { %v4340_v22 = vpop.f32.mrf.mxu1  ;;  %v1210_v48 = vpop.f32.mrf.mxu0  ;;  %v2480_v26 = vor.u32 %v2479_v33, %v2476_v38  ;;  %v2787_v59 = vsel %vm2754_vm7, %v2784_v19, %v2786_v30  ;;  %v2790_v19 = vrot.slane %v5546_v23, 3 }
 0x149   : > { %v1459_v16 = vadd.f32 %v4340_v22, %v5543_v60  ;;  %v5764_v51 = vadd.f32 %v1210_v48, %v937_v37 }
 0x14a   : > { %v1316_v62 = vpop.f32.mrf.mxu1  ;;  %v4377_v3 = vpop.f32.mrf.mxu0  ;;  %4552 = vmatmul.mubr.msk.bf16.gmra.mxu0 %vm496_vm2, %v2783_v63  ;;  %v2789_v63 = vsel %vm2754_vm7, %v2786_v30, %v2788_v5 }
 0x14b   : > { %v1457_v27 = vadd.f32 %v1316_v62, %v5550_v39  ;;  %v5769_v9 = vadd.f32 %v4377_v3, %v1458_v56  ;;  %4555 = vmatprep.mubr.msk.bf16.mxu0 %vm496_vm2, %v2785_v14 }
 0x14c   : > { %v4343_v44 = vpop.f32.mrf.mxu1  ;;  %4518 = vmatmul.mubr.msk.bf16.gmra.mxu1 %vm496_vm2, %v2463_v31  ;;  %v1671_v60 = vpop.f32.mrf.mxu0 }
 0x14d   : > { %v1462_v18 = vadd.f32 %v4343_v44, %v5558_v28  ;;  %v5776_v42 = vadd.f32 %v1671_v60, %v1456_v34  ;;  %4521 = vmatprep.mubr.msk.bf16.mxu1 %vm496_vm2, %v2472_v0  ;;  %v2481_v34 = vsel %vm2396_vm6, %v2471_v49, %v2480_v26 }
 0x14e   : > { %v1329_v39 = vpop.f32.mrf.mxu1  ;;  %v4378_v56 = vpop.f32.mrf.mxu0 }
 0x14f   : > { %v1460_v36 = vadd.f32 %v1329_v39, %v5566_v21  ;;  %v5780_v41 = vadd.f32 %v4378_v56, %v1459_v16 }
 0x150   : > { %v4344_v50 = vpop.f32.mrf.mxu1  ;;  %v1674_v37 = vpop.f32.mrf.mxu0 }
 0x151   : > { %v1463_v2 = vadd.f32 %v4344_v50, %v5570_v15  ;;  %v5785_v28 = vadd.f32 %v1674_v37, %v1457_v27 }
 0x152   : > { %v1332_v22 = vpop.f32.mrf.mxu1  ;;  %v4381_v48 = vpop.f32.mrf.mxu0  ;;  %4556 = vmatmul.mubr.msk.bf16.gmra.mxu0 %vm496_vm2, %v2787_v59 }
 0x153   : > { %v1461_v21 = vadd.f32 %v1332_v22, %v5577_v45  ;;  %v5790_v31 = vadd.f32 %v4381_v48, %v1462_v18  ;;  %4559 = vmatprep.mubr.msk.bf16.mxu0 %vm496_vm2, %v2789_v63  ;;  %v2791_v45 = vsel %vm2754_vm7, %v2788_v5, %v2790_v19 }
 0x154   : > { %v4347_v14 = vpop.f32.mrf.mxu1  ;;  %4522 = vmatmul.mubr.msk.bf16.gmra.mxu1 %vm496_vm2, %v2481_v34  ;;  %v1687_v15 = vpop.f32.mrf.mxu0 }
 0x155   : > { %v1466_v16 = vadd.f32 %v4347_v14, %v5587_v47  ;;  %v5796_v38 = vadd.f32 %v1687_v15, %v1460_v36 }
 0x156   : > { %v1345_v49 = vpop.f32.mrf.mxu1  ;;  %v4382_v33 = vpop.f32.mrf.mxu0 }
 0x157   : > { %v1464_v62 = vadd.f32 %v1345_v49, %v5594_v29  ;;  %v5799_v3 = vadd.f32 %v4382_v33, %v1463_v2 }
 0x158   : > { %v4348_v0 = vpop.f32.mrf.mxu1  ;;  %v1690_v27 = vpop.f32.mrf.mxu0 }
 0x159   : > { %v1467_v23 = vadd.f32 %v4348_v0, %v5598_v6  ;;  %v5803_v30 = vadd.f32 %v1690_v27, %v1461_v21 }
 0x15a   : > { %v1348_v44 = vpop.f32.mrf.mxu1  ;;  %v4385_v60 = vpop.f32.mrf.mxu0  ;;  %4560 = vmatmul.mubr.msk.bf16.gmra.mxu0 %vm496_vm2, %v2791_v45 }
 0x15b   : > { %v1465_v47 = vadd.f32 %v1348_v44, %v5604_v10  ;;  %v5807_v18 = vadd.f32 %v4385_v60, %v1466_v16 }
 0x15c   : > { %v4351_v26 = vpop.f32.mrf.mxu1  ;;  %v1703_v29 = vpop.f32.mrf.mxu0 }
 0x15d   : > { %v1470_v39 = vadd.f32 %v4351_v26, %v5613_v8  ;;  %v5810_v56 = vadd.f32 %v1703_v29, %v1464_v62 }
 0x15e   : > { %v1361_v5 = vpop.f32.mrf.mxu1  ;;  %v4386_v36 = vpop.f32.mrf.mxu0 }
 0x15f   : > { %v1468_v6 = vadd.f32 %v1361_v5, %v5620_v40  ;;  %v5813_v59 = vadd.f32 %v4386_v36, %v1467_v23 }
 0x160   : > { %v4352_v50 = vpop.f32.mrf.mxu1  ;;  %v1706_v37 = vpop.f32.mrf.mxu0 }
 0x161   : > { %v1471_v63 = vadd.f32 %v4352_v50, %v5624_v58  ;;  %v5816_v2 = vadd.f32 %v1706_v37, %v1465_v47 }
 0x162   : > { %v1364_v10 = vpop.f32.mrf.mxu1  ;;  %v4389_v34 = vpop.f32.mrf.mxu0 }
 0x163   : > { %v1469_v22 = vadd.f32 %v1364_v10, %v5631_v1  ;;  %v5819_v48 = vadd.f32 %v4389_v34, %v1470_v39 }
 0x164   : > { %v4355_v8 = vpop.f32.mrf.mxu1  ;;  %v1719_v21 = vpop.f32.mrf.mxu0 }
 0x165   : > { %v1474_v19 = vadd.f32 %v4355_v8, %v5639_v17  ;;  %v5822_v14 = vadd.f32 %v1719_v21, %v1468_v6 }
 0x166   : > { %v1377_v40 = vpop.f32.mrf.mxu1  ;;  %v4390_v15 = vpop.f32.mrf.mxu0 }
 0x167   : > { %v1472_v16 = vadd.f32 %v1377_v40, %v5645_v61  ;;  %v5825_v49 = vadd.f32 %v4390_v15, %v1471_v63 }
 0x168   : > { %v4356_v58 = vpop.f32.mrf.mxu1  ;;  %v1722_v33 = vpop.f32.mrf.mxu0 }
 0x169   : > { %v1475_v62 = vadd.f32 %v4356_v58, %v5648_v55  ;;  %v5828_v45 = vadd.f32 %v1722_v33, %v1469_v22 }
 0x16a   : > { %v1380_v1 = vpop.f32.mrf.mxu1  ;;  %v4393_v0 = vpop.f32.mrf.mxu0 }
 0x16b   : > { %v1473_v27 = vadd.f32 %v1380_v1, %v5654_v11  ;;  %v5831_v23 = vadd.f32 %v4393_v0, %v1474_v19 }
 0x16c   : > { %v4359_v17 = vpop.f32.mrf.mxu1  ;;  %v1735_v44 = vpop.f32.mrf.mxu0 }
 0x16d   : > { %v1478_v60 = vadd.f32 %v4359_v17, %v5663_v43  ;;  %v5834_v47 = vadd.f32 %v1735_v44, %v1472_v16 }
 0x16e   : > { %v1393_v61 = vpop.f32.mrf.mxu1  ;;  %v4394_v26 = vpop.f32.mrf.mxu0 }
 0x16f   : > { %v1476_v29 = vadd.f32 %v1393_v61, %v5670_v57  ;;  %v5837_v39 = vadd.f32 %v4394_v26, %v1475_v62 }
 0x170   : > { %v4360_v55 = vpop.f32.mrf.mxu1  ;;  %v1738_v5 = vpop.f32.mrf.mxu0 }
 0x171   : > { %v1479_v36 = vadd.f32 %v4360_v55, %v5674_v4  ;;  %v5840_v6 = vadd.f32 %v1738_v5, %v1473_v27 }
 0x172   : > { %v1396_v11 = vpop.f32.mrf.mxu1  ;;  %v4397_v50 = vpop.f32.mrf.mxu0 }
 0x173   : > { %v1477_v37 = vadd.f32 %v1396_v11, %v5681_v20  ;;  %v5843_v63 = vadd.f32 %v4397_v50, %v1478_v60 }
 0x174   : > { %v4363_v43 = vpop.f32.mrf.mxu1  ;;  %v1751_v10 = vpop.f32.mrf.mxu0 }
 0x175   : > { %v1482_v34 = vadd.f32 %v4363_v43, %v5689_v25  ;;  %v5846_v22 = vadd.f32 %v1751_v10, %v1476_v29 }
 0x176   : > { %v1409_v57 = vpop.f32.mrf.mxu1  ;;  %v4398_v8 = vpop.f32.mrf.mxu0 }
 0x177   : > { %v1480_v21 = vadd.f32 %v1409_v57, %v5696_v32  ;;  %v5849_v19 = vadd.f32 %v4398_v8, %v1479_v36 }
 0x178   : > { %v4364_v4 = vpop.f32.mrf.mxu1  ;;  %v1754_v40 = vpop.f32.mrf.mxu0 }
 0x179   : > { %v1483_v15 = vadd.f32 %v4364_v4, %v5700_v35  ;;  %v5852_v16 = vadd.f32 %v1754_v40, %v1477_v37 }
 0x17a   : > { %v1412_v20 = vpop.f32.mrf.mxu1  ;;  %v4401_v58 = vpop.f32.mrf.mxu0 }
 0x17b   : > { %v1481_v33 = vadd.f32 %v1412_v20, %v5706_v54  ;;  %v5855_v62 = vadd.f32 %v4401_v58, %v1482_v34 }
 0x17c   : > { %v4367_v25 = vpop.f32.mrf.mxu1  ;;  %v1767_v1 = vpop.f32.mrf.mxu0 }
 0x17d   : > { %v1486_v0 = vadd.f32 %v4367_v25, %v5715_v24  ;;  %v5858_v27 = vadd.f32 %v1767_v1, %v1480_v21 }
 0x17e   : > { %v1425_v32 = vpop.f32.mrf.mxu1  ;;  %v4402_v17 = vpop.f32.mrf.mxu0 }
 0x17f   : > { %v1484_v44 = vadd.f32 %v1425_v32, %v5722_v46  ;;  %v5861_v60 = vadd.f32 %v4402_v17, %v1483_v15 }
 0x180   : > { %v4368_v35 = vpop.f32.mrf.mxu1  ;;  %v1770_v61 = vpop.f32.mrf.mxu0 }
 0x181   : > { %v1487_v26 = vadd.f32 %v4368_v35, %v5728_v12  ;;  %v5864_v29 = vadd.f32 %v1770_v61, %v1481_v33 }
 0x182   : > { %v1428_v54 = vpop.f32.mrf.mxu1  ;;  %v4405_v55 = vpop.f32.mrf.mxu0 }
 0x183   : > { %v1485_v5 = vadd.f32 %v1428_v54, %v5737_v53  ;;  %v5867_v36 = vadd.f32 %v4405_v55, %v1486_v0 }
 0x184   : > { %v4371_v24 = vpop.f32.mrf.mxu1  ;;  %v1783_v11 = vpop.f32.mrf.mxu0 }
 0x185   : > { %v1490_v50 = vadd.f32 %v4371_v24, %v5743_v13  ;;  %v5870_v37 = vadd.f32 %v1783_v11, %v1484_v44 }
 0x186   : > { %v1441_v46 = vpop.f32.mrf.mxu1  ;;  %v4406_v43 = vpop.f32.mrf.mxu0 }
 0x187   : > { %v1488_v10 = vadd.f32 %v1441_v46, %v5752_v52  ;;  %v5873_v34 = vadd.f32 %v4406_v43, %v1487_v26 }
 0x188   : > { %v4372_v12 = vpop.f32.mrf.mxu1  ;;  %v1786_v57 = vpop.f32.mrf.mxu0 }
 0x189   : > { %v1491_v8 = vadd.f32 %v4372_v12, %v5758_v7  ;;  %v5876_v21 = vadd.f32 %v1786_v57, %v1485_v5 }
 0x18a   : > { %v1444_v53 = vpop.f32.mrf.mxu1  ;;  %v4409_v4 = vpop.f32.mrf.mxu0 }
 0x18b   : > { %v1489_v40 = vadd.f32 %v1444_v53, %v5764_v51  ;;  %v5879_v15 = vadd.f32 %v4409_v4, %v1490_v50 }
 0x18c   : > { %v4415_v13 = vpop.f32.mrf.mxu1  ;;  %v1799_v20 = vpop.f32.mrf.mxu0 }
 0x18d   : > { %v2126_v58 = vadd.f32 %v4415_v13, %v5769_v9  ;;  %v5882_v33 = vadd.f32 %v1799_v20, %v1488_v10 }
 0x18e   : > { %v1981_v52 = vpop.f32.mrf.mxu1  ;;  %v4410_v25 = vpop.f32.mrf.mxu0 }
 0x18f   : > { %v2124_v1 = vadd.f32 %v1981_v52, %v5776_v42  ;;  %v5885_v0 = vadd.f32 %v4410_v25, %v1491_v8 }
 0x190   : > { %v4416_v7 = vpop.f32.mrf.mxu1  ;;  %v1802_v32 = vpop.f32.mrf.mxu0 }
 0x191   : > { %v2127_v17 = vadd.f32 %v4416_v7, %v5780_v41  ;;  %v5888_v44 = vadd.f32 %v1802_v32, %v1489_v40 }
 0x192   : > { %v1984_v51 = vpop.f32.mrf.mxu1  ;;  %v4453_v35 = vpop.f32.mrf.mxu0 }
 0x193   : > { %v2125_v61 = vadd.f32 %v1984_v51, %v5785_v28  ;;  %v5891_v26 = vadd.f32 %v4453_v35, %v2126_v58 }
 0x194   : > { %v4419_v9 = vpop.f32.mrf.mxu1  ;;  %v2215_v54 = vpop.f32.mrf.mxu0 }
 0x195   : > { %v2130_v55 = vadd.f32 %v4419_v9, %v5790_v31  ;;  %v5894_v5 = vadd.f32 %v2215_v54, %v2124_v1 }
 0x196   : > { %v1997_v42 = vpop.f32.mrf.mxu1  ;;  %v4454_v24 = vpop.f32.mrf.mxu0 }
 0x197   : > { %v2128_v11 = vadd.f32 %v1997_v42, %v5796_v38  ;;  %v5897_v50 = vadd.f32 %v4454_v24, %v2127_v17 }
 0x198   : > { %v4420_v41 = vpop.f32.mrf.mxu1  ;;  %v2218_v46 = vpop.f32.mrf.mxu0 }
 0x199   : > { %v2131_v43 = vadd.f32 %v4420_v41, %v5799_v3  ;;  %v5900_v10 = vadd.f32 %v2218_v46, %v2125_v61 }
 0x19a   : > { %v2000_v28 = vpop.f32.mrf.mxu1  ;;  %v4457_v12 = vpop.f32.mrf.mxu0 }
 0x19b   : > { %v2129_v57 = vadd.f32 %v2000_v28, %v5803_v30  ;;  %v5903_v8 = vadd.f32 %v4457_v12, %v2130_v55 }
 0x19c   : > { %v4423_v31 = vpop.f32.mrf.mxu1  ;;  %v2231_v53 = vpop.f32.mrf.mxu0 }
 0x19d   : > { %v2134_v4 = vadd.f32 %v4423_v31, %v5807_v18  ;;  %v5906_v40 = vadd.f32 %v2231_v53, %v2128_v11 }
 0x19e   : > { %v2013_v38 = vpop.f32.mrf.mxu1  ;;  %v4458_v13 = vpop.f32.mrf.mxu0 }
 0x19f   : > { %v2132_v20 = vadd.f32 %v2013_v38, %v5810_v56  ;;  %v5909_v58 = vadd.f32 %v4458_v13, %v2131_v43 }
 0x1a0   : > { %v4424_v3 = vpop.f32.mrf.mxu1  ;;  %v2234_v52 = vpop.f32.mrf.mxu0 }
 0x1a1   : > { %v2135_v25 = vadd.f32 %v4424_v3, %v5813_v59  ;;  %v5912_v1 = vadd.f32 %v2234_v52, %v2129_v57 }
 0x1a2   : > { %v2016_v30 = vpop.f32.mrf.mxu1  ;;  %v4461_v7 = vpop.f32.mrf.mxu0 }
 0x1a3   : > { %v2133_v32 = vadd.f32 %v2016_v30, %v5816_v2  ;;  %v5915_v17 = vadd.f32 %v4461_v7, %v2134_v4 }
 0x1a4   : > { %v4427_v18 = vpop.f32.mrf.mxu1  ;;  %v2247_v51 = vpop.f32.mrf.mxu0 }
 0x1a5   : > { %v2138_v35 = vadd.f32 %v4427_v18, %v5819_v48  ;;  %v5918_v61 = vadd.f32 %v2247_v51, %v2132_v20 }
 0x1a6   : > { %v2029_v56 = vpop.f32.mrf.mxu1  ;;  %v4462_v9 = vpop.f32.mrf.mxu0 }
 0x1a7   : > { %v2136_v54 = vadd.f32 %v2029_v56, %v5822_v14  ;;  %v5921_v55 = vadd.f32 %v4462_v9, %v2135_v25 }
 0x1a8   : > { %v4428_v59 = vpop.f32.mrf.mxu1  ;;  %v2250_v42 = vpop.f32.mrf.mxu0 }
 0x1a9   : > { %v2139_v24 = vadd.f32 %v4428_v59, %v5825_v49  ;;  %v5924_v11 = vadd.f32 %v2250_v42, %v2133_v32 }
 0x1aa   : > { %v2032_v2 = vpop.f32.mrf.mxu1  ;;  %v4465_v41 = vpop.f32.mrf.mxu0 }
 0x1ab   : > { %v2137_v46 = vadd.f32 %v2032_v2, %v5828_v45  ;;  %v5927_v43 = vadd.f32 %v4465_v41, %v2138_v35 }
 0x1ac   : > { %v4431_v48 = vpop.f32.mrf.mxu1  ;;  %v2263_v28 = vpop.f32.mrf.mxu0 }
 0x1ad   : > { %v2142_v12 = vadd.f32 %v4431_v48, %v5831_v23  ;;  %v5930_v57 = vadd.f32 %v2263_v28, %v2136_v54 }
 0x1ae   : > { %v2045_v14 = vpop.f32.mrf.mxu1  ;;  %v4466_v31 = vpop.f32.mrf.mxu0 }
 0x1af   : > { %v2140_v53 = vadd.f32 %v2045_v14, %v5834_v47  ;;  %v5933_v4 = vadd.f32 %v4466_v31, %v2139_v24  ;;  %v5959_v31 = vpop.permute.xlu0 %3100 }
 0x1b0   : > { %v4432_v49 = vpop.f32.mrf.mxu1  ;;  %v2266_v38 = vpop.f32.mrf.mxu0 }
 0x1b1   : > { %v2143_v13 = vadd.f32 %v4432_v49, %v5837_v39  ;;  %v5936_v20 = vadd.f32 %v2266_v38, %v2137_v46 }
 0x1b2   : > { %v2048_v45 = vpop.f32.mrf.mxu1  ;;  %v4469_v3 = vpop.f32.mrf.mxu0 }
 0x1b3   : > { %v2141_v52 = vadd.f32 %v2048_v45, %v5840_v6  ;;  %v5939_v25 = vadd.f32 %v4469_v3, %v2142_v12 }
 0x1b4   : > { %v4435_v23 = vpop.f32.mrf.mxu1  ;;  %v2279_v30 = vpop.f32.mrf.mxu0 }
 0x1b5   : > { %v2146_v7 = vadd.f32 %v4435_v23, %v5843_v63  ;;  %v5942_v32 = vadd.f32 %v2279_v30, %v2140_v53 }
 0x1b6   : > { %v2061_v47 = vpop.f32.mrf.mxu1  ;;  %v4470_v18 = vpop.f32.mrf.mxu0 }
 0x1b7   : > { %v2144_v51 = vadd.f32 %v2061_v47, %v5846_v22  ;;  %v5945_v35 = vadd.f32 %v4470_v18, %v2143_v13  ;;  %v5964_v13 = vpop.permute.xlu1 %3110  ;;  %v5972_v47 = vpop.permute.xlu0 %3105 }
 0x1b8   : > { %v4436_v39 = vpop.f32.mrf.mxu1  ;;  %v2282_v56 = vpop.f32.mrf.mxu0 }
 0x1b9   : > { %v2147_v9 = vadd.f32 %v4436_v39, %v5849_v19  ;;  %v5948_v54 = vadd.f32 %v2282_v56, %v2141_v52 }
 0x1ba   : > { %v2064_v6 = vpop.f32.mrf.mxu1  ;;  %v4473_v59 = vpop.f32.mrf.mxu0 }
 0x1bb   : > { %v2145_v42 = vadd.f32 %v2064_v6, %v5852_v16  ;;  %v5951_v24 = vadd.f32 %v4473_v59, %v2146_v7  ;;  %v5977_v56 = vpop.permute.xlu1 %3115 }
 0x1bc   : > { %v4439_v63 = vpop.f32.mrf.mxu1  ;;  %v2295_v2 = vpop.f32.mrf.mxu0 }
 0x1bd   : > { %v2150_v41 = vadd.f32 %v4439_v63, %v5855_v62  ;;  %v5954_v46 = vadd.f32 %v2295_v2, %v2144_v51 }
 0x1be   : > { %v2077_v22 = vpop.f32.mrf.mxu1  ;;  %v4474_v48 = vpop.f32.mrf.mxu0 }
 0x1bf   : > { %v2148_v28 = vadd.f32 %v2077_v22, %v5858_v27  ;;  %v5957_v12 = vadd.f32 %v4474_v48, %v2147_v9 }
 0x1c0   : > { %v4440_v19 = vpop.f32.mrf.mxu1  ;;  %v2298_v14 = vpop.f32.mrf.mxu0 }
 0x1c1   : > { %v2151_v16 = vadd.f32 %v4440_v19, %v5861_v60  ;;  %v5962_v53 = vadd.f32 %v2298_v14, %v2145_v42  ;;  %v5990_v19 = vpop.permute.xlu1 %3125 }
 0x1c2   : > { %v2080_v49 = vpop.f32.mrf.mxu1  ;;  %v4477_v38 = vpop.f32.mrf.mxu0 }
 0x1c3   : > { %v2149_v62 = vadd.f32 %v2080_v49, %v5864_v29  ;;  %v5967_v45 = vadd.f32 %v4477_v38, %v2150_v41  ;;  %v5985_v41 = vpop.permute.xlu0 %3120 }
 0x1c4   : > { %v4443_v3 = vpop.f32.mrf.mxu1  ;;  %v2311_v27 = vpop.f32.mrf.mxu0 }
 0x1c5   : > { %v2154_v52 = vadd.f32 %v4443_v3, %v5867_v36  ;;  %v5970_v23 = vadd.f32 %v2311_v27, %v2148_v28 }
 0x1c6   : > { %v2093_v30 = vpop.f32.mrf.mxu1  ;;  %v4478_v7 = vpop.f32.mrf.mxu0 }
 0x1c7   : > { %v2152_v60 = vadd.f32 %v2093_v30, %v5870_v37  ;;  %v5975_v18 = vadd.f32 %v4478_v7, %v2151_v16 }
 0x1c8   : > { %v4444_v51 = vpop.f32.mrf.mxu1  ;;  %v2314_v39 = vpop.f32.mrf.mxu0 }
 0x1c9   : > { %v2155_v29 = vadd.f32 %v4444_v51, %v5873_v34  ;;  %v5980_v9 = vadd.f32 %v2314_v39, %v2149_v62 }
 0x1ca   : > { %v2096_v6 = vpop.f32.mrf.mxu1  ;;  %v4481_v36 = vpop.f32.mrf.mxu0 }
 0x1cb   : > { %v2153_v59 = vadd.f32 %v2096_v6, %v5876_v21  ;;  %v5983_v42 = vadd.f32 %v4481_v36, %v2154_v52 }
 0x1cc   : > { %v4447_v63 = vpop.f32.mrf.mxu1  ;;  %v2327_v2 = vpop.f32.mrf.mxu0 }
 0x1cd   : > { %v2158_v37 = vadd.f32 %v4447_v63, %v5879_v15  ;;  %v5988_v22 = vadd.f32 %v2327_v2, %v2152_v60  ;;  %v5998_v15 = vpop.permute.xlu0 %3130 }
 0x1ce   : > { %v2109_v48 = vpop.f32.mrf.mxu1  ;;  %v4482_v28 = vpop.f32.mrf.mxu0 }
 0x1cf   : > { %v2156_v34 = vadd.f32 %v2109_v48, %v5882_v33  ;;  %v5993_v14 = vadd.f32 %v4482_v28, %v2155_v29  ;;  %v6003_v33 = vpop.permute.xlu1 %3135 }
 0x1d0   : > { %v4448_v16 = vpop.f32.mrf.mxu1  ;;  %v2330_v21 = vpop.f32.mrf.mxu0 }
 0x1d1   : > { %v2159_v49 = vadd.f32 %v4448_v16, %v5885_v0  ;;  %v5996_v38 = vadd.f32 %v2330_v21, %v2153_v59  ;;  %v6010_v36 = vpop.permute.xlu0 %3140 }
 0x1d2   : > { %v2112_v62 = vpop.f32.mrf.mxu1  ;;  %v4485_v3 = vpop.f32.mrf.mxu0 }
 0x1d3   : > { %v2157_v27 = vadd.f32 %v2112_v62, %v5888_v44  ;;  %v6001_v52 = vadd.f32 %v4485_v3, %v2158_v37  ;;  %v6015_v37 = vpop.permute.xlu1 %3145 }
 0x1d4   : > { %v4491_v30 = vpop.f32.mrf.mxu1  ;;  %v2343_v7 = vpop.f32.mrf.mxu0 }
 0x1d5   : > { %v6005_v60 = vadd.f32 %v2343_v7, %v2156_v34  ;;  %v2718_v59 = vadd.f32 %v4491_v30, %v5891_v26 }
 0x1d6   : > { %v2573_v51 = vpop.f32.mrf.mxu1  ;;  %v4486_v39 = vpop.f32.mrf.mxu0 }
 0x1d7   : > { %6383 = vst [vmem:[#allocation4_spill] sm:$0xff] %v6005_v60  ;;  %v6007_v0 = vadd.f32 %v4486_v39, %v2159_v49  ;;  %v2716_v48 = vadd.f32 %v2573_v51, %v5894_v5 }
 0x1d8   : > { %v4492_v29 = vpop.f32.mrf.mxu1  ;;  %v2346_v6 = vpop.f32.mrf.mxu0 }
 0x1d9   : > { %6384 = vst [vmem:[#allocation10_spill] sm:$0xff] %v6007_v0  ;;  %v6013_v44 = vadd.f32 %v2346_v6, %v2157_v27  ;;  %v2719_v49 = vadd.f32 %v4492_v29, %v5897_v50  ;;  %v6024_v27 = vpop.permute.xlu0 %3150 }
 0x1da   : > { %v2576_v63 = vpop.f32.mrf.mxu1  ;;  %v4529_v2 = vpop.f32.mrf.mxu0 }
 0x1db   : > { %6385 = vst [vmem:[#allocation11_spill] sm:$0xff] %v6013_v44  ;;  %v3028_v28 = vadd.f32 %v4529_v2, %v2718_v59  ;;  %v2717_v7 = vadd.f32 %v2576_v63, %v5900_v10  ;;  %v6031_v2 = vpop.permute.xlu1 %3155 }
 0x1dc   : > { %v4495_v34 = vpop.f32.mrf.mxu1  ;;  %v2883_v16 = vpop.f32.mrf.mxu0 }
 0x1dd   : > { %v4016_v21 = vpack.c.bf16 %v3028_v28, %v3028_v28  ;;  %v3026_v26 = vadd.f32 %v2883_v16, %v2716_v48  ;;  %v3280_v5 = vmul.f32 %v5964_v13, %v3028_v28  ;;  %v2722_v50 = vadd.f32 %v4495_v34, %v5903_v8 }
 0x1de   : > { %v2589_v62 = vpop.f32.mrf.mxu1  ;;  %v4530_v3 = vpop.f32.mrf.mxu0 }
 0x1df   : > { %3655 = vst.msk [vmem:[%s6021_s20 + $0x8] sm:$0xf] %vm3652_vm8, %v4016_v21  ;;  %v3278_v30 = vmul.f32 %v5959_v31, %v3026_v26  ;;  %v4014_v51 = vpack.c.bf16 %v3026_v26, %v3026_v26  ;;  %v3029_v6 = vadd.f32 %v4530_v3, %v2719_v49  ;;  %v3396_v16 = vmul.f32 %v3280_v5, %v3280_v5  ;;  %v6041_v3 = vpop.permute.xlu0 %3160 }
 0x1e0   : > { %v4496_v39 = vpop.f32.mrf.mxu1  ;;  %v2886_v59 = vpop.f32.mrf.mxu0  ;;  %v2720_v10 = vadd.f32 %v2589_v62, %v5906_v40 }
 0x1e1   : > { %3653 = vst.msk [vmem:[%s6021_s20] sm:$0xf] %vm3652_vm8, %v4014_v51  ;;  %v3281_v13 = vmul.f32 %v5977_v56, %v3029_v6  ;;  %v4017_v29 = vpack.c.bf16 %v3029_v6, %v3029_v6  ;;  %v3027_v28 = vadd.f32 %v2886_v59, %v2717_v7  ;;  %v3394_v63 = vmul.f32 %v3278_v30, %v3278_v30 }
 0x1e2   : > { %v2592_v48 = vpop.f32.mrf.mxu1  ;;  %v4533_v31 = vpop.f32.mrf.mxu0  ;;  %v3318_v56 = vsel %vm3314_vm9, %v3280_v5, 0.0  ;;  %v3315_v7 = vsel %vm3314_vm9, %v3278_v30, 0.0  ;;  %v2723_v40 = vadd.f32 %v4496_v39, %v5909_v58 }
 0x1e3   : > { %v3032_v21 = vadd.f32 %v4533_v31, %v2722_v50  ;;  %3656 = vst.msk [vmem:[%s6021_s20 + $0xc] sm:$0xf] %vm3652_vm8, %v4017_v29  ;;  %v3279_v26 = vmul.f32 %v5972_v47, %v3027_v28  ;;  %v4015_v8 = vpack.c.bf16 %v3027_v28, %v3027_v28  ;;  %v3397_v62 = vmul.f32 %v3281_v13, %v3281_v13  ;;  %v6049_v28 = vpop.permute.xlu1 %3165 }
 0x1e4   : > { %v4499_v34 = vpop.f32.mrf.mxu1  ;;  %v2899_v49 = vpop.f32.mrf.mxu0  ;;  %v3433_v31 = vsel %vm3314_vm9, %v3396_v16, 0.0  ;;  %v3430_v5 = vsel %vm3314_vm9, %v3394_v63, 0.0  ;;  %v3320_v0 = vsel %vm3314_vm9, %v3281_v13, 0.0  ;;  %v2721_v16 = vadd.f32 %v2592_v48, %v5912_v1 }
 0x1e5   : > { %v4020_v51 = vpack.c.bf16 %v3032_v21, %v3032_v21  ;;  %v3030_v6 = vadd.f32 %v2899_v49, %v2720_v10  ;;  %v3316_v59 = vsel %vm3314_vm9, %v3279_v26, 0.0  ;;  %v3395_v50 = vmul.f32 %v3279_v26, %v3279_v26  ;;  %3654 = vst.msk [vmem:[%s6021_s20 + $0x4] sm:$0xf] %vm3652_vm8, %v4015_v8 }
 0x1e6   : > { %v2605_v47 = vpop.f32.mrf.mxu1  ;;  %v4534_v29 = vpop.f32.mrf.mxu0  ;;  %v3317_v44 = vadd.f32 %v3316_v59, %v3315_v7  ;;  %v3284_v30 = vmul.f32 %v5998_v15, %v3032_v21  ;;  %v3435_v7 = vsel %vm3314_vm9, %v3397_v62, 0.0  ;;  %v2726_v15 = vadd.f32 %v4499_v34, %v5915_v17 }
 0x1e7   : > { %3659 = vst.msk [vmem:[%s6021_s20 + $0x18] sm:$0xf] %vm3652_vm8, %v4020_v51  ;;  %v3431_v58 = vsel %vm3314_vm9, %v3395_v50, 0.0  ;;  %v3282_v39 = vmul.f32 %v5985_v41, %v3030_v6  ;;  %v4018_v10 = vpack.c.bf16 %v3030_v6, %v3030_v6  ;;  %v3033_v8 = vadd.f32 %v4534_v29, %v2723_v40  ;;  %v6064_v59 = vpop.permute.xlu0 %3170  ;;  %v6071_v29 = vpop.permute.xlu1 %3175 }
 0x1e8   : > { %v4500_v26 = vpop.f32.mrf.mxu1  ;;  %v2902_v49 = vpop.f32.mrf.mxu0  ;;  %v3319_v60 = vadd.f32 %v3318_v56, %v3317_v44  ;;  %v3432_v63 = vadd.f32 %v3431_v58, %v3430_v5  ;;  %v3400_v44 = vmul.f32 %v3284_v30, %v3284_v30  ;;  %v2724_v48 = vadd.f32 %v2605_v47, %v5918_v61 }
 0x1e9   : > { %v3398_v21 = vmul.f32 %v3282_v39, %v3282_v39  ;;  %3657 = vst.msk [vmem:[%s6021_s20 + $0x10] sm:$0xf] %vm3652_vm8, %v4018_v10  ;;  %v4021_v51 = vpack.c.bf16 %v3033_v8, %v3033_v8  ;;  %v3285_v13 = vmul.f32 %v6003_v33, %v3033_v8  ;;  %v3031_v1 = vadd.f32 %v2902_v49, %v2721_v16 }
 0x1ea   : > { %v2608_v41 = vpop.f32.mrf.mxu1  ;;  %v4537_v6 = vpop.f32.mrf.mxu0  ;;  %v3434_v40 = vadd.f32 %v3433_v31, %v3432_v63  ;;  %v3321_v50 = vadd.f32 %v3320_v0, %v3319_v60  ;;  %v3322_v56 = vsel %vm3314_vm9, %v3282_v39, 0.0  ;;  %v2727_v61 = vadd.f32 %v4500_v26, %v5921_v55 }
 0x1eb   : > { %3660 = vst.msk [vmem:[%s6021_s20 + $0x1c] sm:$0xf] %vm3652_vm8, %v4021_v51  ;;  %v3036_v34 = vadd.f32 %v4537_v6, %v2726_v15  ;;  %v3283_v60 = vmul.f32 %v5990_v19, %v3031_v1  ;;  %v4019_v33 = vpack.c.bf16 %v3031_v1, %v3031_v1  ;;  %v3437_v0 = vsel %vm3314_vm9, %v3398_v21, 0.0  ;;  %v6084_v21 = vpop.permute.xlu0 %3180 }
 0x1ec   : > { %v4503_v17 = vpop.f32.mrf.mxu1  ;;  %v2915_v62 = vpop.f32.mrf.mxu0  ;;  %v3323_v5 = vadd.f32 %v3322_v56, %v3321_v50  ;;  %v3436_v58 = vadd.f32 %v3435_v7, %v3434_v40  ;;  %v2725_v47 = vadd.f32 %v2608_v41, %v5924_v11  ;;  %v3401_v49 = vmul.f32 %v3285_v13, %v3285_v13 }
 0x1ed   : > { %v4024_v31 = vpack.c.bf16 %v3036_v34, %v3036_v34  ;;  %v3324_v16 = vsel %vm3314_vm9, %v3283_v60, 0.0  ;;  %v3399_v63 = vmul.f32 %v3283_v60, %v3283_v60  ;;  %3658 = vst.msk [vmem:[%s6021_s20 + $0x14] sm:$0xf] %vm3652_vm8, %v4019_v33  ;;  %v3326_v19 = vsel %vm3314_vm9, %v3284_v30, 0.0 }
 0x1ee   : > { %v2621_v39 = vpop.f32.mrf.mxu1  ;;  %v4538_v10 = vpop.f32.mrf.mxu0  ;;  %v3438_v8 = vadd.f32 %v3437_v0, %v3436_v58  ;;  %v3325_v7 = vadd.f32 %v3324_v16, %v3323_v5  ;;  %v3288_v15 = vmul.f32 %v6024_v27, %v3036_v34  ;;  %v3034_v55 = vadd.f32 %v2915_v62, %v2724_v48 }
 0x1ef   : > { %3663 = vst.msk [vmem:[%s6021_s20 + $0x28] sm:$0xf] %vm3652_vm8, %v4024_v31  ;;  %v3441_v51 = vsel %vm3314_vm9, %v3400_v44, 0.0  ;;  %v3439_v41 = vsel %vm3314_vm9, %v3399_v63, 0.0  ;;  %v3037_v6 = vadd.f32 %v4538_v10, %v2727_v61  ;;  %v3328_v50 = vsel %vm3314_vm9, %v3285_v13, 0.0  ;;  %v6090_v34 = vpop.permute.xlu1 %3185 }
 0x1f0   : > { %v4504_v26 = vpop.f32.mrf.mxu1  ;;  %v2918_v11 = vpop.f32.mrf.mxu0  ;;  %v3327_v1 = vadd.f32 %v3326_v19, %v3325_v7  ;;  %v3440_v30 = vadd.f32 %v3439_v41, %v3438_v8  ;;  %v3286_v27 = vmul.f32 %v6010_v36, %v3034_v55  ;;  %v3443_v62 = vsel %vm3314_vm9, %v3401_v49, 0.0 }
 0x1f1   : > { %v3035_v40 = vadd.f32 %v2918_v11, %v2725_v47  ;;  %v2730_v44 = vadd.f32 %v4503_v17, %v5927_v43  ;;  %v4022_v5 = vpack.c.bf16 %v3034_v55, %v3034_v55  ;;  %v4025_v58 = vpack.c.bf16 %v3037_v6, %v3037_v6  ;;  %v6103_v7 = vpop.permute.xlu0 %3190 }
 0x1f2   : > { %v2624_v56 = vpop.f32.mrf.mxu1  ;;  %v4541_v48 = vpop.f32.mrf.mxu0  ;;  %v3442_v60 = vadd.f32 %v3441_v51, %v3440_v30  ;;  %v3404_v33 = vmul.f32 %v3288_v15, %v3288_v15  ;;  %v3329_v0 = vadd.f32 %v3328_v50, %v3327_v1  ;;  %v3402_v13 = vmul.f32 %v3286_v27, %v3286_v27 }
 0x1f3   : > { %v3330_v31 = vsel %vm3314_vm9, %v3286_v27, 0.0  ;;  %3661 = vst.msk [vmem:[%s6021_s20 + $0x20] sm:$0xf] %vm3652_vm8, %v4022_v5  ;;  %v3289_v36 = vmul.f32 %v6031_v2, %v3037_v6  ;;  %3664 = vst.msk [vmem:[%s6021_s20 + $0x2c] sm:$0xf] %vm3652_vm8, %v4025_v58  ;;  %v3287_v10 = vmul.f32 %v6015_v37, %v3035_v40  ;;  %v4023_v43 = vpack.c.bf16 %v3035_v40, %v3035_v40  ;;  %v6110_v40 = vpop.permute.xlu1 %3195 }
 0x1f4   : > { %v4507_v61 = vpop.f32.mrf.mxu1  ;;  %v2931_v47 = vpop.f32.mrf.mxu0  ;;  %v3334_v17 = vsel %vm3314_vm9, %v3288_v15, 0.0  ;;  %v2728_v8 = vadd.f32 %v2621_v39, %v5930_v57  ;;  %v3331_v49 = vadd.f32 %v3330_v31, %v3329_v0  ;;  %v3444_v16 = vadd.f32 %v3443_v62, %v3442_v60 }
 0x1f5   : > { %v3445_v55 = vsel %vm3314_vm9, %v3402_v13, 0.0  ;;  %v3332_v11 = vsel %vm3314_vm9, %v3287_v10, 0.0  ;;  %v3403_v2 = vmul.f32 %v3287_v10, %v3287_v10  ;;  %3662 = vst.msk [vmem:[%s6021_s20 + $0x24] sm:$0xf] %vm3652_vm8, %v4023_v43  ;;  %v3040_v51 = vadd.f32 %v4541_v48, %v2730_v44 }
 0x1f6   : > { %v2637_v63 = vpop.f32.mrf.mxu1  ;;  %v4542_v19 = vpop.f32.mrf.mxu0  ;;  %v3446_v37 = vadd.f32 %v3445_v55, %v3444_v16  ;;  %v2731_v41 = vadd.f32 %v4504_v26, %v5933_v4  ;;  %v3333_v15 = vadd.f32 %v3332_v11, %v3331_v49  ;;  %v3038_v6 = vadd.f32 %v2931_v47, %v2728_v8 }
 0x1f7   : > { %v3449_v50 = vsel %vm3314_vm9, %v3404_v33, 0.0  ;;  %v3405_v1 = vmul.f32 %v3289_v36, %v3289_v36  ;;  %v3447_v30 = vsel %vm3314_vm9, %v3403_v2, 0.0  ;;  %v4028_v27 = vpack.c.bf16 %v3040_v51, %v3040_v51  ;;  %v6129_v55 = vpop.permute.xlu1 %3205 }
 0x1f8   : > { %v4508_v57 = vpop.f32.mrf.mxu1  ;;  %v2934_v39 = vpop.f32.mrf.mxu0  ;;  %v3335_v62 = vadd.f32 %v3334_v17, %v3333_v15  ;;  %v3448_v5 = vadd.f32 %v3447_v30, %v3446_v37  ;;  %v3290_v48 = vmul.f32 %v6041_v3, %v3038_v6  ;;  %v4026_v44 = vpack.c.bf16 %v3038_v6, %v3038_v6 }
 0x1f9   : > { %v3336_v58 = vsel %vm3314_vm9, %v3289_v36, 0.0  ;;  %v2729_v60 = vadd.f32 %v2624_v56, %v5936_v20  ;;  %v2734_v0 = vadd.f32 %v4507_v61, %v5939_v25  ;;  %3667 = vst.msk [vmem:[%s6021_s20 + $0x38] sm:$0xf] %vm3652_vm8, %v4028_v27  ;;  %v3041_v33 = vadd.f32 %v4542_v19, %v2731_v41  ;;  %v6123_v17 = vpop.permute.xlu0 %3200 }
 0x1fa   : > { %v2640_v4 = vpop.f32.mrf.mxu1  ;;  %v4545_v26 = vpop.f32.mrf.mxu0  ;;  %v3450_v13 = vadd.f32 %v3449_v50, %v3448_v5  ;;  %v3292_v47 = vmul.f32 %v6064_v59, %v3040_v51  ;;  %v3337_v31 = vadd.f32 %v3336_v58, %v3335_v62  ;;  %v3406_v10 = vmul.f32 %v3290_v48, %v3290_v48  ;;  %3665 = vst.msk [vmem:[%s6021_s20 + $0x30] sm:$0xf] %vm3652_vm8, %v4026_v44 }
 0x1fb   : > { %v3451_v36 = vsel %vm3314_vm9, %v3405_v1, 0.0  ;;  %v3338_v20 = vsel %vm3314_vm9, %v3290_v48, 0.0  ;;  %v4029_v25 = vpack.c.bf16 %v3041_v33, %v3041_v33  ;;  %v3039_v56 = vadd.f32 %v2934_v39, %v2729_v60 }
 0x1fc   : > { %v4511_v3 = vpop.f32.mrf.mxu1  ;;  %v2947_v43 = vpop.f32.mrf.mxu0  ;;  %v2732_v61 = vadd.f32 %v2637_v63, %v5942_v32  ;;  %v3339_v8 = vadd.f32 %v3338_v20, %v3337_v31  ;;  %v3452_v49 = vadd.f32 %v3451_v36, %v3450_v13  ;;  %v3293_v59 = vmul.f32 %v6071_v29, %v3041_v33 }
 0x1fd   : > { %v3453_v11 = vsel %vm3314_vm9, %v3406_v10, 0.0  ;;  %v2735_v2 = vadd.f32 %v4508_v57, %v5945_v35  ;;  %3668 = vst.msk [vmem:[%s6021_s20 + $0x3c] sm:$0xf] %vm3652_vm8, %v4029_v25  ;;  %v3291_v51 = vmul.f32 %v6049_v28, %v3039_v56  ;;  %v4027_v37 = vpack.c.bf16 %v3039_v56, %v3039_v56  ;;  %v6142_v48 = vpop.permute.xlu0 %3210 }
 0x1fe   : > { %v2653_v16 = vpop.f32.mrf.mxu1  ;;  %v4546_v19 = vpop.f32.mrf.mxu0  ;;  %v3408_v41 = vmul.f32 %v3292_v47, %v3292_v47  ;;  %v3454_v32 = vadd.f32 %v3453_v11, %v3452_v49  ;;  %v3044_v63 = vadd.f32 %v4545_v26, %v2734_v0  ;;  %v3042_v15 = vadd.f32 %v2947_v43, %v2732_v61 }
 0x1ff   : > { %v3342_v39 = vsel %vm3314_vm9, %v3292_v47, 0.0  ;;  %v2733_v50 = vadd.f32 %v2640_v4, %v5948_v54  ;;  %v3340_v1 = vsel %vm3314_vm9, %v3291_v51, 0.0  ;;  %v3407_v30 = vmul.f32 %v3291_v51, %v3291_v51  ;;  %3666 = vst.msk [vmem:[%s6021_s20 + $0x34] sm:$0xf] %vm3652_vm8, %v4027_v37  ;;  %v3216_v47 = vpop.permute.xlu1 %3215 }
 0x200   : > { %v4512_v6 = vpop.f32.mrf.mxu1  ;;  %v2950_v29 = vpop.f32.mrf.mxu0  ;;  %v3409_v35 = vmul.f32 %v3293_v59, %v3293_v59  ;;  %v3341_v57 = vadd.f32 %v3340_v1, %v3339_v8  ;;  %v4032_v28 = vpack.c.bf16 %v3044_v63, %v3044_v63  ;;  %v3294_v27 = vmul.f32 %v6084_v21, %v3042_v15 }
 0x201   : > { %v3455_v44 = vsel %vm3314_vm9, %v3407_v30, 0.0  ;;  %v3296_v54 = vmul.f32 %v6103_v7, %v3044_v63  ;;  %v4030_v4 = vpack.c.bf16 %v3042_v15, %v3042_v15  ;;  %v3045_v26 = vadd.f32 %v4546_v19, %v2735_v2  ;;  %v6161_v51 = vpop.permute.xlu0 %3220 }
 0x202   : > { %v2656_v62 = vpop.f32.mrf.mxu1  ;;  %v4549_v5 = vpop.f32.mrf.mxu0  ;;  %v3457_v58 = vsel %vm3314_vm9, %v3408_v41, 0.0  ;;  %v3343_v60 = vadd.f32 %v3342_v39, %v3341_v57  ;;  %v3456_v0 = vadd.f32 %v3455_v44, %v3454_v32  ;;  %v2738_v33 = vadd.f32 %v4511_v3, %v5951_v24  ;;  %3671 = vst.msk [vmem:[%s6021_s20 + $0x48] sm:$0xf] %vm3652_vm8, %v4032_v28 }
 0x203   : > { %v3344_v31 = vsel %vm3314_vm9, %v3293_v59, 0.0  ;;  %v2736_v10 = vadd.f32 %v2653_v16, %v5954_v46  ;;  %v3410_v43 = vmul.f32 %v3294_v27, %v3294_v27  ;;  %3669 = vst.msk [vmem:[%s6021_s20 + $0x40] sm:$0xf] %vm3652_vm8, %v4030_v4  ;;  %v4033_v7 = vpack.c.bf16 %v3045_v26, %v3045_v26 }
 0x204   : > { %v4515_v21 = vpop.f32.mrf.mxu1  ;;  %v2963_v13 = vpop.f32.mrf.mxu0  ;;  %v3458_v36 = vadd.f32 %v3457_v58, %v3456_v0  ;;  %v3345_v20 = vadd.f32 %v3344_v31, %v3343_v60  ;;  %v3297_v25 = vmul.f32 %v6110_v40, %v3045_v26  ;;  %v3043_v56 = vadd.f32 %v2950_v29, %v2733_v50 }
 0x205   : > { %v3459_v61 = vsel %vm3314_vm9, %v3409_v35, 0.0  ;;  %v3412_v8 = vmul.f32 %v3296_v54, %v3296_v54  ;;  %v3346_v49 = vsel %vm3314_vm9, %v3294_v27, 0.0  ;;  %v2739_v59 = vadd.f32 %v4512_v6, %v5957_v12  ;;  %3672 = vst.msk [vmem:[%s6021_s20 + $0x4c] sm:$0xf] %vm3652_vm8, %v4033_v7  ;;  %v6168_v50 = vpop.permute.xlu1 %3225 }
 0x206   : > { %v2669_v24 = vpop.f32.mrf.mxu1  ;;  %v4550_v3 = vpop.f32.mrf.mxu0  ;;  %v3347_v46 = vadd.f32 %v3346_v49, %v3345_v20  ;;  %v3460_v16 = vadd.f32 %v3459_v61, %v3458_v36  ;;  %v3295_v19 = vmul.f32 %v6090_v34, %v3043_v56  ;;  %v4031_v11 = vpack.c.bf16 %v3043_v56, %v3043_v56 }
 0x207   : > { %v3461_v37 = vsel %vm3314_vm9, %v3410_v43, 0.0  ;;  %v2737_v41 = vadd.f32 %v2656_v62, %v5962_v53  ;;  %v3048_v32 = vadd.f32 %v4549_v5, %v2738_v33  ;;  %v3046_v63 = vadd.f32 %v2963_v13, %v2736_v10  ;;  %v3231_v10 = vpop.permute.xlu0 %3230 }
 0x208   : > { %v4516_v2 = vpop.f32.mrf.mxu1  ;;  %v2966_v40 = vpop.f32.mrf.mxu0  ;;  %v3462_v15 = vadd.f32 %v3461_v37, %v3460_v16  ;;  %v3413_v12 = vmul.f32 %v3297_v25, %v3297_v25  ;;  %v3348_v6 = vsel %vm3314_vm9, %v3295_v19, 0.0  ;;  %v3411_v29 = vmul.f32 %v3295_v19, %v3295_v19  ;;  %3670 = vst.msk [vmem:[%s6021_s20 + $0x44] sm:$0xf] %vm3652_vm8, %v4031_v11 }
 0x209   : > { %v3350_v1 = vsel %vm3314_vm9, %v3296_v54, 0.0  ;;  %v3349_v30 = vadd.f32 %v3348_v6, %v3347_v46  ;;  %v4036_v35 = vpack.c.bf16 %v3048_v32, %v3048_v32  ;;  %v3298_v53 = vmul.f32 %v6123_v17, %v3046_v63 }
 0x20a   : > { %v2672_v39 = vpop.f32.mrf.mxu1  ;;  %v4553_v34 = vpop.f32.mrf.mxu0  ;;  %v3465_v57 = vsel %vm3314_vm9, %v3412_v8, 0.0  ;;  %v3463_v28 = vsel %vm3314_vm9, %v3411_v29, 0.0  ;;  %v4034_v27 = vpack.c.bf16 %v3046_v63, %v3046_v63  ;;  %v3049_v62 = vadd.f32 %v4550_v3, %v2739_v59 }
 0x20b   : > { %v3352_v4 = vsel %vm3314_vm9, %v3297_v25, 0.0  ;;  %v3351_v26 = vadd.f32 %v3350_v1, %v3349_v30  ;;  %v3464_v58 = vadd.f32 %v3463_v28, %v3462_v15  ;;  %v2742_v60 = vadd.f32 %v4515_v21, %v5967_v45  ;;  %3675 = vst.msk [vmem:[%s6021_s20 + $0x58] sm:$0xf] %vm3652_vm8, %v4036_v35 }
 0x20c   : > { %v4519_v5 = vpop.f32.mrf.mxu1  ;;  %v2979_v44 = vpop.f32.mrf.mxu0  ;;  %v3467_v54 = vsel %vm3314_vm9, %v3413_v12, 0.0  ;;  %v3300_v17 = vmul.f32 %v6142_v48, %v3048_v32  ;;  %v3414_v0 = vmul.f32 %v3298_v53, %v3298_v53  ;;  %3673 = vst.msk [vmem:[%s6021_s20 + $0x50] sm:$0xf] %vm3652_vm8, %v4034_v27  ;;  %v4037_v33 = vpack.c.bf16 %v3049_v62, %v3049_v62 }
 0x20d   : > { %v3466_v43 = vadd.f32 %v3465_v57, %v3464_v58  ;;  %v3353_v7 = vadd.f32 %v3352_v4, %v3351_v26  ;;  %v3301_v36 = vmul.f32 %v3216_v47, %v3049_v62  ;;  %v3047_v20 = vadd.f32 %v2966_v40, %v2737_v41  ;;  %v3236_v47 = vpop.permute.xlu1 %3235 }
 0x20e   : > { %v2685_v13 = vpop.f32.mrf.mxu1  ;;  %v4554_v31 = vpop.f32.mrf.mxu0  ;;  %v2740_v45 = vadd.f32 %v2669_v24, %v5970_v23  ;;  %v3354_v21 = vsel %vm3314_vm9, %v3298_v53, 0.0  ;;  %v2743_v25 = vadd.f32 %v4516_v2, %v5975_v18  ;;  %3676 = vst.msk [vmem:[%s6021_s20 + $0x5c] sm:$0xf] %vm3652_vm8, %v4037_v33  ;;  %v2741_v48 = vadd.f32 %v2672_v39, %v5980_v9 }
 0x20f   : > { %v3355_v61 = vadd.f32 %v3354_v21, %v3353_v7  ;;  %v3468_v8 = vadd.f32 %v3467_v54, %v3466_v43  ;;  %v3299_v49 = vmul.f32 %v6129_v55, %v3047_v20  ;;  %v4035_v59 = vpack.c.bf16 %v3047_v20, %v3047_v20  ;;  %v3241_v39 = vpop.permute.xlu0 %3240 }
 0x210   : > { %v4520_v56 = vpop.f32.mrf.mxu1  ;;  %v2982_v3 = vpop.f32.mrf.mxu0  ;;  %v3416_v46 = vmul.f32 %v3300_v17, %v3300_v17  ;;  %v3469_v23 = vsel %vm3314_vm9, %v3414_v0, 0.0  ;;  %v3052_v24 = vadd.f32 %v4553_v34, %v2742_v60  ;;  %v3050_v16 = vadd.f32 %v2979_v44, %v2740_v45 }
 0x211   : > { %v3470_v18 = vadd.f32 %v3469_v23, %v3468_v8  ;;  %v3417_v11 = vmul.f32 %v3301_v36, %v3301_v36  ;;  %v3356_v2 = vsel %vm3314_vm9, %v3299_v49, 0.0  ;;  %v3415_v9 = vmul.f32 %v3299_v49, %v3299_v49  ;;  %3674 = vst.msk [vmem:[%s6021_s20 + $0x54] sm:$0xf] %vm3652_vm8, %v4035_v59  ;;  %v3246_v44 = vpop.permute.xlu1 %3245 }
 0x212   : > { %v4557_v19 = vpop.f32.mrf.mxu0  ;;  %v2688_v40 = vpop.f32.mrf.mxu1  ;;  %v3358_v37 = vsel %vm3314_vm9, %v3300_v17, 0.0  ;;  %v3357_v55 = vadd.f32 %v3356_v2, %v3355_v61  ;;  %v4040_v41 = vpack.c.bf16 %v3052_v24, %v3052_v24  ;;  %v3302_v32 = vmul.f32 %v6161_v51, %v3050_v16 }
 0x213   : > { %v3471_v15 = vsel %vm3314_vm9, %v3415_v9, 0.0  ;;  %v3304_v12 = vmul.f32 %v3231_v10, %v3052_v24  ;;  %v4038_v6 = vpack.c.bf16 %v3050_v16, %v3050_v16  ;;  %v3053_v29 = vadd.f32 %v4554_v31, %v2743_v25 }
 0x214   : > { %v2995_v63 = vpop.f32.mrf.mxu0  ;;  %v3473_v34 = vsel %vm3314_vm9, %v3416_v46, 0.0  ;;  %v3360_v1 = vsel %vm3314_vm9, %v3301_v36, 0.0  ;;  %v3359_v30 = vadd.f32 %v3358_v37, %v3357_v55  ;;  %v3472_v35 = vadd.f32 %v3471_v15, %v3470_v18  ;;  %3679 = vst.msk [vmem:[%s6021_s20 + $0x68] sm:$0xf] %vm3652_vm8, %v4040_v41  ;;  %v4523_v62 = vpop.f32.mrf.mxu1  ;;  %v6386_v41 = vld [vmem:[#allocation4_spill] sm:$0xff] }
 0x215   : > { %v3475_v57 = vsel %vm3314_vm9, %v3417_v11, 0.0  ;;  %v2746_v51 = vadd.f32 %v4519_v5, %v5983_v42  ;;  %v3418_v28 = vmul.f32 %v3302_v32, %v3302_v32  ;;  %3677 = vst.msk [vmem:[%s6021_s20 + $0x60] sm:$0xf] %vm3652_vm8, %v4038_v6  ;;  %v4041_v27 = vpack.c.bf16 %v3053_v29, %v3053_v29  ;;  %v3256_v49 = vpop.permute.xlu1 %3255 }
 0x216   : > { %v4558_v53 = vpop.f32.mrf.mxu0  ;;  %v3474_v4 = vadd.f32 %v3473_v34, %v3472_v35  ;;  %v3361_v26 = vadd.f32 %v3360_v1, %v3359_v30  ;;  %v3305_v58 = vmul.f32 %v3236_v47, %v3053_v29  ;;  %v3051_v60 = vadd.f32 %v2982_v3, %v2741_v48  ;;  %v2701_v21 = vpop.f32.mrf.mxu1 }
 0x217   : > { %v3420_v17 = vmul.f32 %v3304_v12, %v3304_v12  ;;  %v2744_v0 = vadd.f32 %v2685_v13, %v5988_v22  ;;  %v3362_v33 = vsel %vm3314_vm9, %v3302_v32, 0.0  ;;  %v2747_v31 = vadd.f32 %v4520_v56, %v5993_v14  ;;  %3680 = vst.msk [vmem:[%s6021_s20 + $0x6c] sm:$0xf] %vm3652_vm8, %v4041_v27  ;;  %v3251_v13 = vpop.permute.xlu0 %3250 }
 0x218   : > { %v2998_v54 = vpop.f32.mrf.mxu0  ;;  %v3363_v42 = vadd.f32 %v3362_v33, %v3361_v26  ;;  %v3476_v5 = vadd.f32 %v3475_v57, %v3474_v4  ;;  %v3303_v10 = vmul.f32 %v6168_v50, %v3051_v60  ;;  %v4039_v43 = vpack.c.bf16 %v3051_v60, %v3051_v60  ;;  %v4524_v11 = vpop.f32.mrf.mxu1  ;;  %v6388_v33 = vld [vmem:[#allocation11_spill] sm:$0xff] }
 0x219   : > { %v3477_v36 = vsel %vm3314_vm9, %v3418_v28, 0.0  ;;  %v2745_v20 = vadd.f32 %v2688_v40, %v5996_v38  ;;  %v3056_v45 = vadd.f32 %v4557_v19, %v2746_v51  ;;  %v3054_v22 = vadd.f32 %v2995_v63, %v2744_v0  ;;  %v3266_v28 = vpop.permute.xlu1 %3265 }
 0x21a   : > { %v4561_v7 = vpop.f32.mrf.mxu0  ;;  %v3478_v25 = vadd.f32 %v3477_v36, %v3476_v5  ;;  %v3421_v48 = vmul.f32 %v3305_v58, %v3305_v58  ;;  %v3364_v14 = vsel %vm3314_vm9, %v3303_v10, 0.0  ;;  %v3419_v56 = vmul.f32 %v3303_v10, %v3303_v10  ;;  %3678 = vst.msk [vmem:[%s6021_s20 + $0x64] sm:$0xf] %vm3652_vm8, %v4039_v43 }
 0x21b   : > { %v3366_v50 = vsel %vm3314_vm9, %v3304_v12, 0.0  ;;  %v3365_v3 = vadd.f32 %v3364_v14, %v3363_v42  ;;  %v4044_v61 = vpack.c.bf16 %v3056_v45, %v3056_v45  ;;  %v3306_v8 = vmul.f32 %v3241_v39, %v3054_v22  ;;  %v3261_v12 = vpop.permute.xlu0 %3260 }
 0x21c   : > { %v3481_v38 = vsel %vm3314_vm9, %v3420_v17, 0.0  ;;  %v3479_v59 = vsel %vm3314_vm9, %v3419_v56, 0.0  ;;  %v4042_v47 = vpack.c.bf16 %v3054_v22, %v3054_v22  ;;  %v3057_v46 = vadd.f32 %v4558_v53, %v2747_v31  ;;  %v3011_v23 = vpop.f32.mrf.mxu0  ;;  %v2704_v53 = vpop.f32.mrf.mxu1 }
 0x21d   : > { %v3368_v24 = vsel %vm3314_vm9, %v3305_v58, 0.0  ;;  %v3367_v16 = vadd.f32 %v3366_v50, %v3365_v3  ;;  %v3480_v19 = vadd.f32 %v3479_v59, %v3478_v25  ;;  %v2750_v18 = vadd.f32 %v4523_v62, %v6001_v52  ;;  %3683 = vst.msk [vmem:[%s6021_s20 + $0x78] sm:$0xf] %vm3652_vm8, %v4044_v61  ;;  %v6387_v52 = vld [vmem:[#allocation10_spill] sm:$0xff]  ;;  %v3276_v56 = vpop.permute.xlu1 %3275 }
 0x21e   : > { %v3483_v2 = vsel %vm3314_vm9, %v3421_v48, 0.0  ;;  %v3308_v9 = vmul.f32 %v3251_v13, %v3056_v45  ;;  %v3422_v40 = vmul.f32 %v3306_v8, %v3306_v8  ;;  %3681 = vst.msk [vmem:[%s6021_s20 + $0x70] sm:$0xf] %vm3652_vm8, %v4042_v47  ;;  %v4045_v37 = vpack.c.bf16 %v3057_v46, %v3057_v46  ;;  %v4562_v1 = vpop.f32.mrf.mxu0 }
 0x21f   : > { %v3482_v55 = vadd.f32 %v3481_v38, %v3480_v19  ;;  %v2748_v32 = vadd.f32 %v2701_v21, %v6386_v41  ;;  %v3369_v63 = vadd.f32 %v3368_v24, %v3367_v16  ;;  %v3055_v15 = vadd.f32 %v2998_v54, %v2745_v20  ;;  %v3271_v20 = vpop.permute.xlu0 %3270 }
 0x220   : > { %v3370_v6 = vsel %vm3314_vm9, %v3306_v8, 0.0  ;;  %v2751_v29 = vadd.f32 %v4524_v11, %v6387_v52  ;;  %v3309_v39 = vmul.f32 %v3256_v49, %v3057_v46  ;;  %3684 = vst.msk [vmem:[%s6021_s20 + $0x7c] sm:$0xf] %vm3652_vm8, %v4045_v37  ;;  %v3060_v34 = vadd.f32 %v4561_v7, %v2750_v18  ;;  %v3014_v5 = vpop.f32.mrf.mxu0 }
 0x221   : > { %v3371_v30 = vadd.f32 %v3370_v6, %v3369_v63  ;;  %v3484_v35 = vadd.f32 %v3483_v2, %v3482_v55  ;;  %v3307_v57 = vmul.f32 %v3246_v44, %v3055_v15  ;;  %v4043_v51 = vpack.c.bf16 %v3055_v15, %v3055_v15 }
 0x222   : > { %v3424_v27 = vmul.f32 %v3308_v9, %v3308_v9  ;;  %v3485_v62 = vsel %vm3314_vm9, %v3422_v40, 0.0  ;;  %v4048_v4 = vpack.c.bf16 %v3060_v34, %v3060_v34  ;;  %v3058_v26 = vadd.f32 %v3011_v23, %v2748_v32 }
 0x223   : > { %v3486_v58 = vadd.f32 %v3485_v62, %v3484_v35  ;;  %v3372_v60 = vsel %vm3314_vm9, %v3307_v57, 0.0  ;;  %v3423_v54 = vmul.f32 %v3307_v57, %v3307_v57  ;;  %3682 = vst.msk [vmem:[%s6021_s20 + $0x74] sm:$0xf] %vm3652_vm8, %v4043_v51  ;;  %v3061_v17 = vadd.f32 %v4562_v1, %v2751_v29 }
 0x224   : > { %v3425_v0 = vmul.f32 %v3309_v39, %v3309_v39  ;;  %v2749_v31 = vadd.f32 %v2704_v53, %v6388_v33  ;;  %v3373_v42 = vadd.f32 %v3372_v60, %v3371_v30  ;;  %3687 = vst.msk [vmem:[%s6021_s20 + $0x88] sm:$0xf] %vm3652_vm8, %v4048_v4  ;;  %v3310_v44 = vmul.f32 %v3261_v12, %v3058_v26 }
 0x225   : > { %v3374_v10 = vsel %vm3314_vm9, %v3308_v9, 0.0  ;;  %v3487_v43 = vsel %vm3314_vm9, %v3423_v54, 0.0  ;;  %v4046_v7 = vpack.c.bf16 %v3058_v26, %v3058_v26  ;;  %v4049_v36 = vpack.c.bf16 %v3061_v17, %v3061_v17 }
 0x226   : > { %v3489_v45 = vsel %vm3314_vm9, %v3424_v27, 0.0  ;;  %v3375_v21 = vadd.f32 %v3374_v10, %v3373_v42  ;;  %v3488_v22 = vadd.f32 %v3487_v43, %v3486_v58  ;;  %v3376_v13 = vsel %vm3314_vm9, %v3309_v39, 0.0 }
 0x227   : > { %v3312_v25 = vmul.f32 %v3271_v20, %v3060_v34  ;;  %v3426_v48 = vmul.f32 %v3310_v44, %v3310_v44  ;;  %3685 = vst.msk [vmem:[%s6021_s20 + $0x80] sm:$0xf] %vm3652_vm8, %v4046_v7  ;;  %3688 = vst.msk [vmem:[%s6021_s20 + $0x8c] sm:$0xf] %vm3652_vm8, %v4049_v36  ;;  %v3059_v14 = vadd.f32 %v3014_v5, %v2749_v31  ;;  %v3491_v50 = vsel %vm3314_vm9, %v3425_v0, 0.0 }
 0x228   : > { %v3490_v3 = vadd.f32 %v3489_v45, %v3488_v22  ;;  %v3377_v61 = vadd.f32 %v3376_v13, %v3375_v21  ;;  %v3378_v8 = vsel %vm3314_vm9, %v3310_v44, 0.0  ;;  %v3313_v49 = vmul.f32 %v3276_v56, %v3061_v17 }
 0x229   : > { %v3311_v38 = vmul.f32 %v3266_v28, %v3059_v14  ;;  %v4047_v59 = vpack.c.bf16 %v3059_v14, %v3059_v14  ;;  %v3428_v23 = vmul.f32 %v3312_v25, %v3312_v25  ;;  %v3493_v24 = vsel %vm3314_vm9, %v3426_v48, 0.0 }
 0x22a   : > { %v3379_v47 = vadd.f32 %v3378_v8, %v3377_v61  ;;  %v3492_v46 = vadd.f32 %v3491_v50, %v3490_v3  ;;  %v3382_v2 = vsel %vm3314_vm9, %v3312_v25, 0.0  ;;  %v3429_v9 = vmul.f32 %v3313_v49, %v3313_v49 }
 0x22b   : > { %v3380_v16 = vsel %vm3314_vm9, %v3311_v38, 0.0  ;;  %v3427_v19 = vmul.f32 %v3311_v38, %v3311_v38  ;;  %3686 = vst.msk [vmem:[%s6021_s20 + $0x84] sm:$0xf] %vm3652_vm8, %v4047_v59  ;;  %v3497_v41 = vsel %vm3314_vm9, %v3428_v23, 0.0  ;;  %v3384_v32 = vsel %vm3314_vm9, %v3313_v49, 0.0 }
 0x22c   : > { %v3494_v18 = vadd.f32 %v3493_v24, %v3492_v46  ;;  %v3381_v11 = vadd.f32 %v3380_v16, %v3379_v47  ;;  %v3499_v12 = vsel %vm3314_vm9, %v3429_v9, 0.0 }
 0x22d   : > { %v3495_v40 = vsel %vm3314_vm9, %v3427_v19, 0.0 }
 0x22e   : > { %v3383_v37 = vadd.f32 %v3382_v2, %v3381_v11  ;;  %v3496_v55 = vadd.f32 %v3495_v40, %v3494_v18 }
 0x230   : > { %v3385_v63 = vadd.f32 %v3384_v32, %v3383_v37  ;;  %v3498_v15 = vadd.f32 %v3497_v41, %v3496_v55 }
 0x232   : > { %v3386_v6 = vrot.slane %v3385_v63, 4  ;;  %v3500_v52 = vadd.f32 %v3499_v12, %v3498_v15 }
 0x234   : > { %v3387_v29 = vadd.f32 %v3386_v6, %v3385_v63  ;;  %v3501_v39 = vrot.slane %v3500_v52, 4 }
 0x236   : > { %v3388_v34 = vrot.slane %v3387_v29, 2  ;;  %v3502_v1 = vadd.f32 %v3501_v39, %v3500_v52 }
 0x238   : > { %v3389_v30 = vadd.f32 %v3388_v34, %v3387_v29  ;;  %v3503_v35 = vrot.slane %v3502_v1, 2 }
 0x23a   : > { %v3390_v53 = vrot.slane %v3389_v30, 1  ;;  %v3504_v57 = vadd.f32 %v3503_v35, %v3502_v1 }
 0x23c   : > { %v3391_v51 = vadd.f32 %v3390_v53, %v3389_v30  ;;  %v3505_v28 = vrot.slane %v3504_v57, 1 }
 0x23e   : > { %3393 = vst.msk [vmem:[%s208_s24] sm:$0x1] %vm3392_vm10, %v3391_v51  ;;  %v3506_v27 = vadd.f32 %v3505_v28, %v3504_v57 }
 0x240   : > { %3507 = vst.msk [vmem:[%s208_s24 + $0x1] sm:$0x1] %vm3392_vm10, %v3506_v27 }
 0x241 PF: > { %s15_s15 = sadd.s32 1, %s4633_s15  }
 0x242   : > { %p12_p4 = scmp.ge.s32.totalorder %s15_s15, 4  }
 0x244   :  { %14 = sbr.rel (!%p12_p4) target bundleno = 1 (0x1), region = 82 }

</bundles_post_ra>
